<compile_context>
chip_gen: v7x
topology: tpu7x:2x2x1
jax: 0.10.0
libtpu: 0.0.40
codegen_flags: <defaults>
</compile_context>

<pallas_src>
import math
import functools

import jax
import jax.numpy as jnp
from jax import lax
from jax.experimental import pallas as pl
from jax.experimental.pallas import tpu as pltpu


def _round_up(n, m):
    return ((n + m - 1) // m) * m


def clip_layer_kernel(x_ref, g1_ref, b1_ref,
                      wqkv_ref, bqkv_ref, wo_ref, bo_ref,
                      g2_ref, b2_ref,
                      w1_ref, bias1_ref, w2_ref, bias2_ref,
                      o_ref, *, num_head, num_embed):
    S = x_ref.shape[1]              # padded sequence length (multiple of 128)
    E = num_embed
    H = num_head
    Dh = E // H

    # Residual path + all elementwise math in f32.
    x = x_ref[0].astype(jnp.float32)                              # (S, E)

    # ---- LayerNorm 1 -------------------------------------------------------
    mean = jnp.mean(x, axis=-1, keepdims=True)
    var = jnp.mean(jnp.square(x - mean), axis=-1, keepdims=True)
    xn = (x - mean) * lax.rsqrt(var + 1e-5)
    xn = xn * g1_ref[0] + b1_ref[0]

    # ---- Causal self-attention ----------------------------------------------
    # bf16 operands on the MXU, f32 accumulation.
    qkv = jnp.dot(xn.astype(jnp.bfloat16), wqkv_ref[...],
                  preferred_element_type=jnp.float32) + bqkv_ref[0]   # (S, 3E) f32

    row = lax.broadcasted_iota(jnp.int32, (S, S), 0)
    col = lax.broadcasted_iota(jnp.int32, (S, S), 1)
    causal = col > row                                            # True above diagonal

    inv_sqrt_dh = 1.0 / math.sqrt(Dh)

    # Slab-level scale (fold 1/sqrt(Dh) into q: S*E multiplies instead of
    # H*S*S) and bf16 cast, done once; heads then read static slices only.
    # Mask-before-scale vs scale-before-mask are identical: masked entries are -inf.
    q_all = (qkv[:, 0 * E:1 * E] * inv_sqrt_dh).astype(jnp.bfloat16)   # (S, E)
    k_all = qkv[:, 1 * E:2 * E].astype(jnp.bfloat16)                   # (S, E)
    v_all = qkv[:, 2 * E:3 * E].astype(jnp.bfloat16)                   # (S, E)

    # Per-head 2-D dots on static slices: avoids (S, H, Dh) reshapes and
    # 3-D einsum transposes (XLU relayouts). H is small -> static unroll.
    head_outs = []
    for h in range(H):
        lo = h * Dh
        q_h = q_all[:, lo:lo + Dh]
        k_h = k_all[:, lo:lo + Dh]
        v_h = v_all[:, lo:lo + Dh]

        s_h = lax.dot_general(q_h, k_h, (((1,), (1,)), ((), ())),
                              preferred_element_type=jnp.float32)     # (S, S)
        s_h = jnp.where(causal, -jnp.inf, s_h)

        m_h = jnp.max(s_h, axis=-1, keepdims=True)
        p_h = jnp.exp(s_h - m_h)
        # sum >= 1 (diagonal contributes exp(0)), so approx reciprocal is safe.
        inv_l = pl.reciprocal(jnp.sum(p_h, axis=-1, keepdims=True), approx=True)
        w_h = (p_h * inv_l).astype(jnp.bfloat16)

        head_outs.append(jnp.dot(w_h, v_h,
                                 preferred_element_type=jnp.float32))  # (S, Dh)

    # Single K=E out-projection dot (better MXU contraction than per-head K=Dh dots).
    attn = jnp.concatenate(head_outs, axis=-1)                    # (S, E) f32
    attn = jnp.dot(attn.astype(jnp.bfloat16), wo_ref[...],
                   preferred_element_type=jnp.float32) + bo_ref[0]

    x = x + attn                                                  # residual 1

    # ---- LayerNorm 2 -------------------------------------------------------
    mean2 = jnp.mean(x, axis=-1, keepdims=True)
    var2 = jnp.mean(jnp.square(x - mean2), axis=-1, keepdims=True)
    xn2 = (x - mean2) * lax.rsqrt(var2 + 1e-5)
    xn2 = xn2 * g2_ref[0] + b2_ref[0]

    # ---- MLP with QuickGELU --------------------------------------------------
    hid = jnp.dot(xn2.astype(jnp.bfloat16), w1_ref[...],
                  preferred_element_type=jnp.float32) + bias1_ref[0]
    hid = hid * jax.nn.sigmoid(1.702 * hid)                       # QuickGELU (f32, EUP)
    hid = jnp.dot(hid.astype(jnp.bfloat16), w2_ref[...],
                  preferred_element_type=jnp.float32) + bias2_ref[0]

    o_ref[0] = (x + hid).astype(o_ref.dtype)                      # residual 2


def clip_layer(x, params, *, num_head, num_embed):
    (g1, b1, wqkv, bqkv, wo, bo, g2, b2, w1, bias1, w2, bias2) = params
    B, S, E = x.shape
    assert E == num_embed and E % num_head == 0

    # Pad S to a lane-friendly multiple of 128 (e.g. CLIP text S=77 -> 128);
    # causal masking guarantees padded key columns never reach real query rows,
    # and padded query rows are sliced off below.
    S_pad = _round_up(S, 128)
    x_p = jnp.pad(x, ((0, 0), (0, S_pad - S), (0, 0))) if S_pad != S else x

    # Pre-cast matmul weights to bf16 (MXU-native; halves weight VMEM/DMA bytes).
    # Biases and LN params stay f32 (added post f32-accumulation).
    wqkv_b = wqkv.astype(jnp.bfloat16)
    wo_b = wo.astype(jnp.bfloat16)
    w1_b = w1.astype(jnp.bfloat16)
    w2_b = w2.astype(jnp.bfloat16)

    kernel = functools.partial(clip_layer_kernel,
                               num_head=num_head, num_embed=num_embed)

    # Batch-invariant operands: whole-array, resident in VMEM once (no
    # per-grid-step double buffering of weights).
    vmem_full = pl.BlockSpec(memory_space=pltpu.MemorySpace.VMEM)

    # Explicit scoped-VMEM budget: resident bf16 weights + activation working set.
    weight_bytes = (3 * E * E + E * E + 4 * E * E + 4 * E * E) * 2 \
        + (3 * E + E + 4 * E + E + 4 * E + 4 * E) * 4
    block_bytes = 2 * 2 * (S_pad * E * 4)                         # x/out blocks, 2-deep
    work_bytes = S_pad * (3 * E + 4 * E + 4 * E) * 4 + 2 * S_pad * S_pad * 4
    vmem_limit = int(1.5 * (weight_bytes + block_bytes + work_bytes))
    vmem_limit = min(max(vmem_limit, 32 * 1024 * 1024), 64 * 1024 * 1024)

    flops = B * (24 * S_pad * E * E + 4 * S_pad * S_pad * E)
    transcendentals = B * (num_head * S_pad * S_pad + 4 * S_pad * E + 2 * S_pad)
    bytes_accessed = weight_bytes + 2 * B * S_pad * E * 4

    # TODO(synk): for v7x with B<=1, add a second "parallel" grid axis over
    # query tiles so both TensorCores get work (keys/values stay full-length).

    out = pl.pallas_call(
        kernel,
        out_shape=jax.ShapeDtypeStruct((B, S_pad, E), x.dtype),
        grid_spec=pltpu.PrefetchScalarGridSpec(
            num_scalar_prefetch=0,
            grid=(B,),
            in_specs=[
                pl.BlockSpec((1, S_pad, E), lambda b: (b, 0, 0)),   # x
                vmem_full,                                          # ln1 gamma (1, E)
                vmem_full,                                          # ln1 beta  (1, E)
                vmem_full,                                          # in_proj W (E, 3E) bf16
                vmem_full,                                          # in_proj b (1, 3E)
                vmem_full,                                          # out_proj W (E, E) bf16
                vmem_full,                                          # out_proj b (1, E)
                vmem_full,                                          # ln2 gamma (1, E)
                vmem_full,                                          # ln2 beta  (1, E)
                vmem_full,                                          # linear1 W (E, 4E) bf16
                vmem_full,                                          # linear1 b (1, 4E)
                vmem_full,                                          # linear2 W (4E, E) bf16
                vmem_full,                                          # linear2 b (1, E)
            ],
            out_specs=pl.BlockSpec((1, S_pad, E), lambda b: (b, 0, 0)),
        ),
        compiler_params=pltpu.CompilerParams(
            dimension_semantics=("parallel",),
            vmem_limit_bytes=vmem_limit),
        cost_estimate=pl.CostEstimate(
            flops=flops,
            transcendentals=transcendentals,
            bytes_accessed=bytes_accessed),
    )(x_p, g1, b1, wqkv_b, bqkv, wo_b, bo, g2, b2, w1_b, bias1, w2_b, bias2)

    return out[:, :S, :] if S_pad != S else out


def make_params(key, num_embed):
    E = num_embed
    ks = jax.random.split(key, 8)
    scale = 0.02
    # Linear weights stored pre-transposed to (in, out); biases as (1, out).
    g1 = jnp.ones((1, E), jnp.float32)
    b1 = jnp.zeros((1, E), jnp.float32)
    wqkv = scale * jax.random.normal(ks[0], (E, 3 * E), jnp.float32)
    bqkv = scale * jax.random.normal(ks[1], (1, 3 * E), jnp.float32)
    wo = scale * jax.random.normal(ks[2], (E, E), jnp.float32)
    bo = scale * jax.random.normal(ks[3], (1, E), jnp.float32)
    g2 = jnp.ones((1, E), jnp.float32)
    b2 = jnp.zeros((1, E), jnp.float32)
    w1 = scale * jax.random.normal(ks[4], (E, 4 * E), jnp.float32)
    bias1 = scale * jax.random.normal(ks[5], (1, 4 * E), jnp.float32)
    w2 = scale * jax.random.normal(ks[6], (4 * E, E), jnp.float32)
    bias2 = scale * jax.random.normal(ks[7], (1, E), jnp.float32)
    return (g1, b1, wqkv, bqkv, wo, bo, g2, b2, w1, bias1, w2, bias2)


def clip_layer_ref(x, params, *, num_head, num_embed):
    """Pure-JAX f32 reference mirroring the PyTorch forward, for validation."""
    (g1, b1, wqkv, bqkv, wo, bo, g2, b2, w1, bias1, w2, bias2) = params
    B, S, E = x.shape
    H = num_head
    Dh = E // H

    def ln(y, g, b):
        mu = jnp.mean(y, axis=-1, keepdims=True)
        va = jnp.mean(jnp.square(y - mu), axis=-1, keepdims=True)
        return (y - mu) * lax.rsqrt(va + 1e-5) * g[0] + b[0]

    res = x
    y = ln(x, g1, b1)
    qkv = y @ wqkv + bqkv[0]
    q, k, v = jnp.split(qkv, 3, axis=-1)
    q = q.reshape(B, S, H, Dh).transpose(0, 2, 1, 3)
    k = k.reshape(B, S, H, Dh).transpose(0, 2, 1, 3)
    v = v.reshape(B, S, H, Dh).transpose(0, 2, 1, 3)
    scores = jnp.einsum('bhsd,bhtd->bhst', q, k)
    mask = jnp.triu(jnp.ones((S, S), bool), k=1)
    scores = jnp.where(mask[None, None], -jnp.inf, scores)
    scores = scores / math.sqrt(Dh)
    w = jax.nn.softmax(scores, axis=-1)
    attn = jnp.einsum('bhst,bhtd->bhsd', w, v).transpose(0, 2, 1, 3).reshape(B, S, E)
    attn = attn @ wo + bo[0]
    y = attn + res

    res = y
    z = ln(y, g2, b2)
    z = z @ w1 + bias1[0]
    z = z * jax.nn.sigmoid(1.702 * z)
    z = z @ w2 + bias2[0]
    return z + res


if __name__ == "__main__":
    B, S = 2, 8
    num_head, num_embed = 4, 32

    key = jax.random.PRNGKey(0)
    kx, kp = jax.random.split(key)
    x = jax.random.normal(kx, (B, S, num_embed), jnp.float32)
    params = make_params(kp, num_embed)

    out = clip_layer(x, params, num_head=num_head, num_embed=num_embed)
    out = jax.block_until_ready(out)

    ref = clip_layer_ref(x, params, num_head=num_head, num_embed=num_embed)
    assert out.shape == (B, S, num_embed)
    err = float(jnp.max(jnp.abs(out - ref)))
    # bf16 matmul operands + approx reciprocal => loosened tolerance vs. f32 ref.
    assert jnp.allclose(out, ref, atol=5e-2, rtol=5e-2), f"max abs err {err}"

    print("KERNEL_OK")
</pallas_src>

<mosaic_0001>
module attributes {stable_mosaic.version = 11 : i64} {
  func.func @clip_layer_kernel(%arg0: i32, %arg1: memref<1x128x32xf32, #tpu.memory_space<vmem>>, %arg2: memref<1x32xf32, #tpu.memory_space<vmem>>, %arg3: memref<1x32xf32, #tpu.memory_space<vmem>>, %arg4: memref<32x96xbf16, #tpu.memory_space<vmem>>, %arg5: memref<1x96xf32, #tpu.memory_space<vmem>>, %arg6: memref<32x32xbf16, #tpu.memory_space<vmem>>, %arg7: memref<1x32xf32, #tpu.memory_space<vmem>>, %arg8: memref<1x32xf32, #tpu.memory_space<vmem>>, %arg9: memref<1x32xf32, #tpu.memory_space<vmem>>, %arg10: memref<32x128xbf16, #tpu.memory_space<vmem>>, %arg11: memref<1x128xf32, #tpu.memory_space<vmem>>, %arg12: memref<128x32xbf16, #tpu.memory_space<vmem>>, %arg13: memref<1x32xf32, #tpu.memory_space<vmem>>, %arg14: memref<1x128x32xf32, #tpu.memory_space<vmem>>) attributes {dimension_semantics = [#tpu.dimension_semantics<parallel>], iteration_bounds = array<i64: 2>, scalar_prefetch = 0 : i64, scratch_operands = 0 : i64, tpu.core_type = #tpu.core_type<tc>, window_params = [{transform_indices = @transform_0, window_bounds = array<i64: 1, 128, 32>}, {pipeline_mode = #tpu.pipeline_mode<synchronous>, transform_indices = @transform_1, window_bounds = array<i64: 1, 32>}, {pipeline_mode = #tpu.pipeline_mode<synchronous>, transform_indices = @transform_2, window_bounds = array<i64: 1, 32>}, {pipeline_mode = #tpu.pipeline_mode<synchronous>, transform_indices = @transform_3, window_bounds = array<i64: 32, 96>}, {pipeline_mode = #tpu.pipeline_mode<synchronous>, transform_indices = @transform_4, window_bounds = array<i64: 1, 96>}, {pipeline_mode = #tpu.pipeline_mode<synchronous>, transform_indices = @transform_5, window_bounds = array<i64: 32, 32>}, {pipeline_mode = #tpu.pipeline_mode<synchronous>, transform_indices = @transform_6, window_bounds = array<i64: 1, 32>}, {pipeline_mode = #tpu.pipeline_mode<synchronous>, transform_indices = @transform_7, window_bounds = array<i64: 1, 32>}, {pipeline_mode = #tpu.pipeline_mode<synchronous>, transform_indices = @transform_8, window_bounds = array<i64: 1, 32>}, {pipeline_mode = #tpu.pipeline_mode<synchronous>, transform_indices = @transform_9, window_bounds = array<i64: 32, 128>}, {pipeline_mode = #tpu.pipeline_mode<synchronous>, transform_indices = @transform_10, window_bounds = array<i64: 1, 128>}, {pipeline_mode = #tpu.pipeline_mode<synchronous>, transform_indices = @transform_11, window_bounds = array<i64: 128, 32>}, {pipeline_mode = #tpu.pipeline_mode<synchronous>, transform_indices = @transform_12, window_bounds = array<i64: 1, 32>}, {transform_indices = @transform_13, window_bounds = array<i64: 1, 128, 32>}]} {
    %c0 = arith.constant 0 : index
    %c0_0 = arith.constant 0 : index
    %c0_1 = arith.constant 0 : index
    %0 = vector.load %arg1[%c0, %c0_0, %c0_1] : memref<1x128x32xf32, #tpu.memory_space<vmem>>, vector<1x128x32xf32>
    %1 = vector.shape_cast %0 : vector<1x128x32xf32> to vector<128x32xf32>
    %cst = arith.constant dense<0.000000e+00> : vector<128xf32>
    %2 = vector.multi_reduction <add>, %1, %cst [1] : vector<128x32xf32> to vector<128xf32>
    %3 = vector.shape_cast %2 : vector<128xf32> to vector<128x1xf32>
    %cst_2 = arith.constant 3.200000e+01 : f32
    %4 = vector.broadcast %cst_2 : f32 to vector<128x1xf32>
    %5 = arith.divf %3, %4 : vector<128x1xf32>
    %6 = vector.broadcast %5 : vector<128x1xf32> to vector<128x32xf32>
    %7 = arith.subf %1, %6 : vector<128x32xf32>
    %8 = arith.mulf %7, %7 : vector<128x32xf32>
    %cst_3 = arith.constant dense<0.000000e+00> : vector<128xf32>
    %9 = vector.multi_reduction <add>, %8, %cst_3 [1] : vector<128x32xf32> to vector<128xf32>
    %10 = vector.shape_cast %9 : vector<128xf32> to vector<128x1xf32>
    %cst_4 = arith.constant 3.200000e+01 : f32
    %11 = vector.broadcast %cst_4 : f32 to vector<128x1xf32>
    %12 = arith.divf %10, %11 : vector<128x1xf32>
    %13 = vector.broadcast %5 : vector<128x1xf32> to vector<128x32xf32>
    %14 = arith.subf %1, %13 : vector<128x32xf32>
    %cst_5 = arith.constant 9.99999974E-6 : f32
    %15 = vector.broadcast %cst_5 : f32 to vector<128x1xf32>
    %16 = arith.addf %12, %15 : vector<128x1xf32>
    %17 = math.rsqrt %16 : vector<128x1xf32>
    %18 = vector.broadcast %17 : vector<128x1xf32> to vector<128x32xf32>
    %19 = arith.mulf %14, %18 : vector<128x32xf32>
    %c0_6 = arith.constant 0 : index
    %c0_7 = arith.constant 0 : index
    %20 = vector.load %arg2[%c0_6, %c0_7] : memref<1x32xf32, #tpu.memory_space<vmem>>, vector<1x32xf32>
    %21 = vector.shape_cast %20 : vector<1x32xf32> to vector<32xf32>
    %22 = vector.shape_cast %21 : vector<32xf32> to vector<1x32xf32>
    %23 = vector.broadcast %22 : vector<1x32xf32> to vector<128x32xf32>
    %24 = arith.mulf %19, %23 : vector<128x32xf32>
    %c0_8 = arith.constant 0 : index
    %c0_9 = arith.constant 0 : index
    %25 = vector.load %arg3[%c0_8, %c0_9] : memref<1x32xf32, #tpu.memory_space<vmem>>, vector<1x32xf32>
    %26 = vector.shape_cast %25 : vector<1x32xf32> to vector<32xf32>
    %27 = vector.shape_cast %26 : vector<32xf32> to vector<1x32xf32>
    %28 = vector.broadcast %27 : vector<1x32xf32> to vector<128x32xf32>
    %29 = arith.addf %24, %28 : vector<128x32xf32>
    %30 = arith.truncf %29 : vector<128x32xf32> to vector<128x32xbf16>
    %c0_10 = arith.constant 0 : index
    %c0_11 = arith.constant 0 : index
    %31 = vector.load %arg4[%c0_10, %c0_11] : memref<32x96xbf16, #tpu.memory_space<vmem>>, vector<32x96xbf16>
    %cst_12 = arith.constant dense<0.000000e+00> : vector<128x96xf32>
    %32 = tpu.matmul %30, %31, %cst_12 {dimension_numbers = #tpu.dot_dimension_numbers<[1], [0], [0], [1], [0, 0, 1, 1], [], []>} : vector<128x32xbf16>, vector<32x96xbf16>, vector<128x96xf32> -> vector<128x96xf32>
    %c0_13 = arith.constant 0 : index
    %c0_14 = arith.constant 0 : index
    %33 = vector.load %arg5[%c0_13, %c0_14] : memref<1x96xf32, #tpu.memory_space<vmem>>, vector<1x96xf32>
    %34 = vector.shape_cast %33 : vector<1x96xf32> to vector<96xf32>
    %35 = vector.shape_cast %34 : vector<96xf32> to vector<1x96xf32>
    %36 = vector.broadcast %35 : vector<1x96xf32> to vector<128x96xf32>
    %37 = arith.addf %32, %36 : vector<128x96xf32>
    %38 = tpu.iota {dimensions = array<i32: 0>} : vector<128x128xi32>
    %39 = tpu.iota {dimensions = array<i32: 1>} : vector<128x128xi32>
    %40 = arith.cmpi sgt, %39, %38 : vector<128x128xi32>
    %41 = vector.extract_strided_slice %37 {offsets = [0, 0], sizes = [128, 32], strides = [1, 1]} : vector<128x96xf32> to vector<128x32xf32>
    %cst_15 = arith.constant 0.353553385 : f32
    %42 = vector.broadcast %cst_15 : f32 to vector<128x32xf32>
    %43 = arith.mulf %41, %42 : vector<128x32xf32>
    %44 = arith.truncf %43 : vector<128x32xf32> to vector<128x32xbf16>
    %45 = vector.extract_strided_slice %37 {offsets = [0, 32], sizes = [128, 32], strides = [1, 1]} : vector<128x96xf32> to vector<128x32xf32>
    %46 = arith.truncf %45 : vector<128x32xf32> to vector<128x32xbf16>
    %47 = vector.extract_strided_slice %37 {offsets = [0, 64], sizes = [128, 32], strides = [1, 1]} : vector<128x96xf32> to vector<128x32xf32>
    %48 = arith.truncf %47 : vector<128x32xf32> to vector<128x32xbf16>
    %49 = vector.extract_strided_slice %44 {offsets = [0, 0], sizes = [128, 8], strides = [1, 1]} : vector<128x32xbf16> to vector<128x8xbf16>
    %50 = vector.extract_strided_slice %46 {offsets = [0, 0], sizes = [128, 8], strides = [1, 1]} : vector<128x32xbf16> to vector<128x8xbf16>
    %51 = vector.extract_strided_slice %48 {offsets = [0, 0], sizes = [128, 8], strides = [1, 1]} : vector<128x32xbf16> to vector<128x8xbf16>
    %cst_16 = arith.constant dense<0.000000e+00> : vector<128x128xf32>
    %52 = tpu.matmul %49, %50, %cst_16 {dimension_numbers = #tpu.dot_dimension_numbers<[1], [1], [0], [0], [0, 0, 1, 0], [], []>} : vector<128x8xbf16>, vector<128x8xbf16>, vector<128x128xf32> -> vector<128x128xf32>
    %cst_17 = arith.constant 0xFF800000 : f32
    %53 = vector.broadcast %cst_17 : f32 to vector<128x128xf32>
    %54 = arith.select %40, %53, %52 : vector<128x128xi1>, vector<128x128xf32>
    %cst_18 = arith.constant dense<0xFF800000> : vector<128xf32>
    %55 = vector.multi_reduction <maximumf>, %54, %cst_18 [1] : vector<128x128xf32> to vector<128xf32>
    %56 = vector.shape_cast %55 : vector<128xf32> to vector<128x1xf32>
    %57 = vector.broadcast %56 : vector<128x1xf32> to vector<128x128xf32>
    %58 = arith.subf %54, %57 : vector<128x128xf32>
    %59 = math.exp %58 : vector<128x128xf32>
    %cst_19 = arith.constant dense<0.000000e+00> : vector<128xf32>
    %60 = vector.multi_reduction <add>, %59, %cst_19 [1] : vector<128x128xf32> to vector<128xf32>
    %61 = vector.shape_cast %60 : vector<128xf32> to vector<128x1xf32>
    %62 = tpu.reciprocal %61 {approx = true} : vector<128x1xf32> -> vector<128x1xf32>
    %63 = vector.broadcast %62 : vector<128x1xf32> to vector<128x128xf32>
    %64 = arith.mulf %59, %63 : vector<128x128xf32>
    %65 = arith.truncf %64 : vector<128x128xf32> to vector<128x128xbf16>
    %cst_20 = arith.constant dense<0.000000e+00> : vector<128x8xf32>
    %66 = tpu.matmul %65, %51, %cst_20 {dimension_numbers = #tpu.dot_dimension_numbers<[1], [0], [0], [1], [0, 0, 1, 1], [], []>} : vector<128x128xbf16>, vector<128x8xbf16>, vector<128x8xf32> -> vector<128x8xf32>
    %67 = vector.extract_strided_slice %44 {offsets = [0, 8], sizes = [128, 8], strides = [1, 1]} : vector<128x32xbf16> to vector<128x8xbf16>
    %68 = vector.extract_strided_slice %46 {offsets = [0, 8], sizes = [128, 8], strides = [1, 1]} : vector<128x32xbf16> to vector<128x8xbf16>
    %69 = vector.extract_strided_slice %48 {offsets = [0, 8], sizes = [128, 8], strides = [1, 1]} : vector<128x32xbf16> to vector<128x8xbf16>
    %cst_21 = arith.constant dense<0.000000e+00> : vector<128x128xf32>
    %70 = tpu.matmul %67, %68, %cst_21 {dimension_numbers = #tpu.dot_dimension_numbers<[1], [1], [0], [0], [0, 0, 1, 0], [], []>} : vector<128x8xbf16>, vector<128x8xbf16>, vector<128x128xf32> -> vector<128x128xf32>
    %cst_22 = arith.constant 0xFF800000 : f32
    %71 = vector.broadcast %cst_22 : f32 to vector<128x128xf32>
    %72 = arith.select %40, %71, %70 : vector<128x128xi1>, vector<128x128xf32>
    %cst_23 = arith.constant dense<0xFF800000> : vector<128xf32>
    %73 = vector.multi_reduction <maximumf>, %72, %cst_23 [1] : vector<128x128xf32> to vector<128xf32>
    %74 = vector.shape_cast %73 : vector<128xf32> to vector<128x1xf32>
    %75 = vector.broadcast %74 : vector<128x1xf32> to vector<128x128xf32>
    %76 = arith.subf %72, %75 : vector<128x128xf32>
    %77 = math.exp %76 : vector<128x128xf32>
    %cst_24 = arith.constant dense<0.000000e+00> : vector<128xf32>
    %78 = vector.multi_reduction <add>, %77, %cst_24 [1] : vector<128x128xf32> to vector<128xf32>
    %79 = vector.shape_cast %78 : vector<128xf32> to vector<128x1xf32>
    %80 = tpu.reciprocal %79 {approx = true} : vector<128x1xf32> -> vector<128x1xf32>
    %81 = vector.broadcast %80 : vector<128x1xf32> to vector<128x128xf32>
    %82 = arith.mulf %77, %81 : vector<128x128xf32>
    %83 = arith.truncf %82 : vector<128x128xf32> to vector<128x128xbf16>
    %cst_25 = arith.constant dense<0.000000e+00> : vector<128x8xf32>
    %84 = tpu.matmul %83, %69, %cst_25 {dimension_numbers = #tpu.dot_dimension_numbers<[1], [0], [0], [1], [0, 0, 1, 1], [], []>} : vector<128x128xbf16>, vector<128x8xbf16>, vector<128x8xf32> -> vector<128x8xf32>
    %85 = vector.extract_strided_slice %44 {offsets = [0, 16], sizes = [128, 8], strides = [1, 1]} : vector<128x32xbf16> to vector<128x8xbf16>
    %86 = vector.extract_strided_slice %46 {offsets = [0, 16], sizes = [128, 8], strides = [1, 1]} : vector<128x32xbf16> to vector<128x8xbf16>
    %87 = vector.extract_strided_slice %48 {offsets = [0, 16], sizes = [128, 8], strides = [1, 1]} : vector<128x32xbf16> to vector<128x8xbf16>
    %cst_26 = arith.constant dense<0.000000e+00> : vector<128x128xf32>
    %88 = tpu.matmul %85, %86, %cst_26 {dimension_numbers = #tpu.dot_dimension_numbers<[1], [1], [0], [0], [0, 0, 1, 0], [], []>} : vector<128x8xbf16>, vector<128x8xbf16>, vector<128x128xf32> -> vector<128x128xf32>
    %cst_27 = arith.constant 0xFF800000 : f32
    %89 = vector.broadcast %cst_27 : f32 to vector<128x128xf32>
    %90 = arith.select %40, %89, %88 : vector<128x128xi1>, vector<128x128xf32>
    %cst_28 = arith.constant dense<0xFF800000> : vector<128xf32>
    %91 = vector.multi_reduction <maximumf>, %90, %cst_28 [1] : vector<128x128xf32> to vector<128xf32>
    %92 = vector.shape_cast %91 : vector<128xf32> to vector<128x1xf32>
    %93 = vector.broadcast %92 : vector<128x1xf32> to vector<128x128xf32>
    %94 = arith.subf %90, %93 : vector<128x128xf32>
    %95 = math.exp %94 : vector<128x128xf32>
    %cst_29 = arith.constant dense<0.000000e+00> : vector<128xf32>
    %96 = vector.multi_reduction <add>, %95, %cst_29 [1] : vector<128x128xf32> to vector<128xf32>
    %97 = vector.shape_cast %96 : vector<128xf32> to vector<128x1xf32>
    %98 = tpu.reciprocal %97 {approx = true} : vector<128x1xf32> -> vector<128x1xf32>
    %99 = vector.broadcast %98 : vector<128x1xf32> to vector<128x128xf32>
    %100 = arith.mulf %95, %99 : vector<128x128xf32>
    %101 = arith.truncf %100 : vector<128x128xf32> to vector<128x128xbf16>
    %cst_30 = arith.constant dense<0.000000e+00> : vector<128x8xf32>
    %102 = tpu.matmul %101, %87, %cst_30 {dimension_numbers = #tpu.dot_dimension_numbers<[1], [0], [0], [1], [0, 0, 1, 1], [], []>} : vector<128x128xbf16>, vector<128x8xbf16>, vector<128x8xf32> -> vector<128x8xf32>
    %103 = vector.extract_strided_slice %44 {offsets = [0, 24], sizes = [128, 8], strides = [1, 1]} : vector<128x32xbf16> to vector<128x8xbf16>
    %104 = vector.extract_strided_slice %46 {offsets = [0, 24], sizes = [128, 8], strides = [1, 1]} : vector<128x32xbf16> to vector<128x8xbf16>
    %105 = vector.extract_strided_slice %48 {offsets = [0, 24], sizes = [128, 8], strides = [1, 1]} : vector<128x32xbf16> to vector<128x8xbf16>
    %cst_31 = arith.constant dense<0.000000e+00> : vector<128x128xf32>
    %106 = tpu.matmul %103, %104, %cst_31 {dimension_numbers = #tpu.dot_dimension_numbers<[1], [1], [0], [0], [0, 0, 1, 0], [], []>} : vector<128x8xbf16>, vector<128x8xbf16>, vector<128x128xf32> -> vector<128x128xf32>
    %cst_32 = arith.constant 0xFF800000 : f32
    %107 = vector.broadcast %cst_32 : f32 to vector<128x128xf32>
    %108 = arith.select %40, %107, %106 : vector<128x128xi1>, vector<128x128xf32>
    %cst_33 = arith.constant dense<0xFF800000> : vector<128xf32>
    %109 = vector.multi_reduction <maximumf>, %108, %cst_33 [1] : vector<128x128xf32> to vector<128xf32>
    %110 = vector.shape_cast %109 : vector<128xf32> to vector<128x1xf32>
    %111 = vector.broadcast %110 : vector<128x1xf32> to vector<128x128xf32>
    %112 = arith.subf %108, %111 : vector<128x128xf32>
    %113 = math.exp %112 : vector<128x128xf32>
    %cst_34 = arith.constant dense<0.000000e+00> : vector<128xf32>
    %114 = vector.multi_reduction <add>, %113, %cst_34 [1] : vector<128x128xf32> to vector<128xf32>
    %115 = vector.shape_cast %114 : vector<128xf32> to vector<128x1xf32>
    %116 = tpu.reciprocal %115 {approx = true} : vector<128x1xf32> -> vector<128x1xf32>
    %117 = vector.broadcast %116 : vector<128x1xf32> to vector<128x128xf32>
    %118 = arith.mulf %113, %117 : vector<128x128xf32>
    %119 = arith.truncf %118 : vector<128x128xf32> to vector<128x128xbf16>
    %cst_35 = arith.constant dense<0.000000e+00> : vector<128x8xf32>
    %120 = tpu.matmul %119, %105, %cst_35 {dimension_numbers = #tpu.dot_dimension_numbers<[1], [0], [0], [1], [0, 0, 1, 1], [], []>} : vector<128x128xbf16>, vector<128x8xbf16>, vector<128x8xf32> -> vector<128x8xf32>
    %121 = tpu.concatenate %66, %84, %102, %120 in 1 : vector<128x8xf32>, vector<128x8xf32>, vector<128x8xf32>, vector<128x8xf32> -> vector<128x32xf32>
    %122 = arith.truncf %121 : vector<128x32xf32> to vector<128x32xbf16>
    %c0_36 = arith.constant 0 : index
    %c0_37 = arith.constant 0 : index
    %123 = vector.load %arg6[%c0_36, %c0_37] : memref<32x32xbf16, #tpu.memory_space<vmem>>, vector<32x32xbf16>
    %cst_38 = arith.constant dense<0.000000e+00> : vector<128x32xf32>
    %124 = tpu.matmul %122, %123, %cst_38 {dimension_numbers = #tpu.dot_dimension_numbers<[1], [0], [0], [1], [0, 0, 1, 1], [], []>} : vector<128x32xbf16>, vector<32x32xbf16>, vector<128x32xf32> -> vector<128x32xf32>
    %c0_39 = arith.constant 0 : index
    %c0_40 = arith.constant 0 : index
    %125 = vector.load %arg7[%c0_39, %c0_40] : memref<1x32xf32, #tpu.memory_space<vmem>>, vector<1x32xf32>
    %126 = vector.shape_cast %125 : vector<1x32xf32> to vector<32xf32>
    %127 = vector.shape_cast %126 : vector<32xf32> to vector<1x32xf32>
    %128 = vector.broadcast %127 : vector<1x32xf32> to vector<128x32xf32>
    %129 = arith.addf %124, %128 : vector<128x32xf32>
    %130 = arith.addf %1, %129 : vector<128x32xf32>
    %cst_41 = arith.constant dense<0.000000e+00> : vector<128xf32>
    %131 = vector.multi_reduction <add>, %130, %cst_41 [1] : vector<128x32xf32> to vector<128xf32>
    %132 = vector.shape_cast %131 : vector<128xf32> to vector<128x1xf32>
    %cst_42 = arith.constant 3.200000e+01 : f32
    %133 = vector.broadcast %cst_42 : f32 to vector<128x1xf32>
    %134 = arith.divf %132, %133 : vector<128x1xf32>
    %135 = vector.broadcast %134 : vector<128x1xf32> to vector<128x32xf32>
    %136 = arith.subf %130, %135 : vector<128x32xf32>
    %137 = arith.mulf %136, %136 : vector<128x32xf32>
    %cst_43 = arith.constant dense<0.000000e+00> : vector<128xf32>
    %138 = vector.multi_reduction <add>, %137, %cst_43 [1] : vector<128x32xf32> to vector<128xf32>
    %139 = vector.shape_cast %138 : vector<128xf32> to vector<128x1xf32>
    %cst_44 = arith.constant 3.200000e+01 : f32
    %140 = vector.broadcast %cst_44 : f32 to vector<128x1xf32>
    %141 = arith.divf %139, %140 : vector<128x1xf32>
    %142 = vector.broadcast %134 : vector<128x1xf32> to vector<128x32xf32>
    %143 = arith.subf %130, %142 : vector<128x32xf32>
    %cst_45 = arith.constant 9.99999974E-6 : f32
    %144 = vector.broadcast %cst_45 : f32 to vector<128x1xf32>
    %145 = arith.addf %141, %144 : vector<128x1xf32>
    %146 = math.rsqrt %145 : vector<128x1xf32>
    %147 = vector.broadcast %146 : vector<128x1xf32> to vector<128x32xf32>
    %148 = arith.mulf %143, %147 : vector<128x32xf32>
    %c0_46 = arith.constant 0 : index
    %c0_47 = arith.constant 0 : index
    %149 = vector.load %arg8[%c0_46, %c0_47] : memref<1x32xf32, #tpu.memory_space<vmem>>, vector<1x32xf32>
    %150 = vector.shape_cast %149 : vector<1x32xf32> to vector<32xf32>
    %151 = vector.shape_cast %150 : vector<32xf32> to vector<1x32xf32>
    %152 = vector.broadcast %151 : vector<1x32xf32> to vector<128x32xf32>
    %153 = arith.mulf %148, %152 : vector<128x32xf32>
    %c0_48 = arith.constant 0 : index
    %c0_49 = arith.constant 0 : index
    %154 = vector.load %arg9[%c0_48, %c0_49] : memref<1x32xf32, #tpu.memory_space<vmem>>, vector<1x32xf32>
    %155 = vector.shape_cast %154 : vector<1x32xf32> to vector<32xf32>
    %156 = vector.shape_cast %155 : vector<32xf32> to vector<1x32xf32>
    %157 = vector.broadcast %156 : vector<1x32xf32> to vector<128x32xf32>
    %158 = arith.addf %153, %157 : vector<128x32xf32>
    %159 = arith.truncf %158 : vector<128x32xf32> to vector<128x32xbf16>
    %c0_50 = arith.constant 0 : index
    %c0_51 = arith.constant 0 : index
    %160 = vector.load %arg10[%c0_50, %c0_51] : memref<32x128xbf16, #tpu.memory_space<vmem>>, vector<32x128xbf16>
    %cst_52 = arith.constant dense<0.000000e+00> : vector<128x128xf32>
    %161 = tpu.matmul %159, %160, %cst_52 {dimension_numbers = #tpu.dot_dimension_numbers<[1], [0], [0], [1], [0, 0, 1, 1], [], []>} : vector<128x32xbf16>, vector<32x128xbf16>, vector<128x128xf32> -> vector<128x128xf32>
    %c0_53 = arith.constant 0 : index
    %c0_54 = arith.constant 0 : index
    %162 = vector.load %arg11[%c0_53, %c0_54] : memref<1x128xf32, #tpu.memory_space<vmem>>, vector<1x128xf32>
    %163 = vector.shape_cast %162 : vector<1x128xf32> to vector<128xf32>
    %164 = vector.shape_cast %163 : vector<128xf32> to vector<1x128xf32>
    %165 = vector.broadcast %164 : vector<1x128xf32> to vector<128x128xf32>
    %166 = arith.addf %161, %165 : vector<128x128xf32>
    %cst_55 = arith.constant 1.702000e+00 : f32
    %167 = vector.broadcast %cst_55 : f32 to vector<128x128xf32>
    %168 = arith.mulf %167, %166 : vector<128x128xf32>
    %169 = arith.negf %168 : vector<128x128xf32>
    %170 = math.exp %169 : vector<128x128xf32>
    %cst_56 = arith.constant 1.000000e+00 : f32
    %171 = vector.broadcast %cst_56 : f32 to vector<128x128xf32>
    %172 = arith.addf %171, %170 : vector<128x128xf32>
    %173 = arith.divf %171, %172 : vector<128x128xf32>
    %174 = arith.mulf %166, %173 : vector<128x128xf32>
    %175 = arith.truncf %174 : vector<128x128xf32> to vector<128x128xbf16>
    %c0_57 = arith.constant 0 : index
    %c0_58 = arith.constant 0 : index
    %176 = vector.load %arg12[%c0_57, %c0_58] : memref<128x32xbf16, #tpu.memory_space<vmem>>, vector<128x32xbf16>
    %cst_59 = arith.constant dense<0.000000e+00> : vector<128x32xf32>
    %177 = tpu.matmul %175, %176, %cst_59 {dimension_numbers = #tpu.dot_dimension_numbers<[1], [0], [0], [1], [0, 0, 1, 1], [], []>} : vector<128x128xbf16>, vector<128x32xbf16>, vector<128x32xf32> -> vector<128x32xf32>
    %c0_60 = arith.constant 0 : index
    %c0_61 = arith.constant 0 : index
    %178 = vector.load %arg13[%c0_60, %c0_61] : memref<1x32xf32, #tpu.memory_space<vmem>>, vector<1x32xf32>
    %179 = vector.shape_cast %178 : vector<1x32xf32> to vector<32xf32>
    %180 = vector.shape_cast %179 : vector<32xf32> to vector<1x32xf32>
    %181 = vector.broadcast %180 : vector<1x32xf32> to vector<128x32xf32>
    %182 = arith.addf %177, %181 : vector<128x32xf32>
    %183 = arith.addf %130, %182 : vector<128x32xf32>
    %c0_62 = arith.constant 0 : index
    %c0_63 = arith.constant 0 : index
    %c0_64 = arith.constant 0 : index
    %184 = vector.load %arg14[%c0_62, %c0_63, %c0_64] : memref<1x128x32xf32, #tpu.memory_space<vmem>>, vector<1x128x32xf32>
    %185 = vector.shape_cast %184 : vector<1x128x32xf32> to vector<128x32xf32>
    %186 = vector.shape_cast %183 : vector<128x32xf32> to vector<1x128x32xf32>
    tpu.vector_store %arg14[%c0_62, %c0_63, %c0_64], %186 {strides = array<i32>} : memref<1x128x32xf32, #tpu.memory_space<vmem>>, vector<1x128x32xf32>,
    return
  }
  func.func @transform_0(%arg0: i32) -> (i32, i32, i32) {
    %c0_i32 = arith.constant 0 : i32
    %c0_i32_0 = arith.constant 0 : i32
    %c0_i32_1 = arith.constant 0 : i32
    return %arg0, %c0_i32, %c0_i32_0 : i32, i32, i32
  }
  func.func @transform_1(%arg0: i32) -> (i32, i32) {
    %c0_i32 = arith.constant 0 : i32
    %c0_i32_0 = arith.constant 0 : i32
    %c0_i32_1 = arith.constant 0 : i32
    return %c0_i32, %c0_i32_0 : i32, i32
  }
  func.func @transform_2(%arg0: i32) -> (i32, i32) {
    %c0_i32 = arith.constant 0 : i32
    %c0_i32_0 = arith.constant 0 : i32
    %c0_i32_1 = arith.constant 0 : i32
    return %c0_i32, %c0_i32_0 : i32, i32
  }
  func.func @transform_3(%arg0: i32) -> (i32, i32) {
    %c0_i32 = arith.constant 0 : i32
    %c0_i32_0 = arith.constant 0 : i32
    %c0_i32_1 = arith.constant 0 : i32
    return %c0_i32, %c0_i32_0 : i32, i32
  }
  func.func @transform_4(%arg0: i32) -> (i32, i32) {
    %c0_i32 = arith.constant 0 : i32
    %c0_i32_0 = arith.constant 0 : i32
    %c0_i32_1 = arith.constant 0 : i32
    return %c0_i32, %c0_i32_0 : i32, i32
  }
  func.func @transform_5(%arg0: i32) -> (i32, i32) {
    %c0_i32 = arith.constant 0 : i32
    %c0_i32_0 = arith.constant 0 : i32
    %c0_i32_1 = arith.constant 0 : i32
    return %c0_i32, %c0_i32_0 : i32, i32
  }
  func.func @transform_6(%arg0: i32) -> (i32, i32) {
    %c0_i32 = arith.constant 0 : i32
    %c0_i32_0 = arith.constant 0 : i32
    %c0_i32_1 = arith.constant 0 : i32
    return %c0_i32, %c0_i32_0 : i32, i32
  }
  func.func @transform_7(%arg0: i32) -> (i32, i32) {
    %c0_i32 = arith.constant 0 : i32
    %c0_i32_0 = arith.constant 0 : i32
    %c0_i32_1 = arith.constant 0 : i32
    return %c0_i32, %c0_i32_0 : i32, i32
  }
  func.func @transform_8(%arg0: i32) -> (i32, i32) {
    %c0_i32 = arith.constant 0 : i32
    %c0_i32_0 = arith.constant 0 : i32
    %c0_i32_1 = arith.constant 0 : i32
    return %c0_i32, %c0_i32_0 : i32, i32
  }
  func.func @transform_9(%arg0: i32) -> (i32, i32) {
    %c0_i32 = arith.constant 0 : i32
    %c0_i32_0 = arith.constant 0 : i32
    %c0_i32_1 = arith.constant 0 : i32
    return %c0_i32, %c0_i32_0 : i32, i32
  }
  func.func @transform_10(%arg0: i32) -> (i32, i32) {
    %c0_i32 = arith.constant 0 : i32
    %c0_i32_0 = arith.constant 0 : i32
    %c0_i32_1 = arith.constant 0 : i32
    return %c0_i32, %c0_i32_0 : i32, i32
  }
  func.func @transform_11(%arg0: i32) -> (i32, i32) {
    %c0_i32 = arith.constant 0 : i32
    %c0_i32_0 = arith.constant 0 : i32
    %c0_i32_1 = arith.constant 0 : i32
    return %c0_i32, %c0_i32_0 : i32, i32
  }
  func.func @transform_12(%arg0: i32) -> (i32, i32) {
    %c0_i32 = arith.constant 0 : i32
    %c0_i32_0 = arith.constant 0 : i32
    %c0_i32_1 = arith.constant 0 : i32
    return %c0_i32, %c0_i32_0 : i32, i32
  }
  func.func @transform_13(%arg0: i32) -> (i32, i32, i32) {
    %c0_i32 = arith.constant 0 : i32
    %c0_i32_0 = arith.constant 0 : i32
    %c0_i32_1 = arith.constant 0 : i32
    return %arg0, %c0_i32, %c0_i32_0 : i32, i32, i32
  }
}

</mosaic_0001>

<bundles_post_ra>
// kernel: tpu_custom_call.1
= control target key start
LH: loop header
LB: loop body
LE: loop exit
PB: predicated region body
PF: predicated region fallthrough
CT: control target
= control target key end

     0   :  { %s5330_s25 = smov 0   ;;  %s7319_s0 = inlined_call_operand.vmem [shape: f32[2,128,32], index: 0, kind: input, shape index: {}]   ;;  %s7320_s1 = inlined_call_operand.vmem [shape: f32[1,32], index: 1, kind: input, shape index: {}]   ;;  %s7321_s2 = inlined_call_operand.vmem [shape: f32[1,32], index: 2, kind: input, shape index: {}]   ;;  %s7322_s3 = inlined_call_operand.vmem [shape: bf16[32,96], index: 3, kind: input, shape index: {}]   ;;  %s7323_s4 = inlined_call_operand.vmem [shape: f32[1,96], index: 4, kind: input, shape index: {}]   ;;  %s7324_s5 = inlined_call_operand.vmem [shape: bf16[32,32], index: 5, kind: input, shape index: {}]   ;;  %s7325_s6 = inlined_call_operand.vmem [shape: f32[1,32], index: 6, kind: input, shape index: {}]   ;;  %s7326_s7 = inlined_call_operand.vmem [shape: f32[1,32], index: 7, kind: input, shape index: {}]   ;;  %s7327_s8 = inlined_call_operand.vmem [shape: f32[1,32], index: 8, kind: input, shape index: {}]   ;;  %s7328_s9 = inlined_call_operand.vmem [shape: bf16[32,128], index: 9, kind: input, shape index: {}]   ;;  %s7329_s10 = inlined_call_operand.vmem [shape: f32[1,128], index: 10, kind: input, shape index: {}]   ;;  %s7330_s11 = inlined_call_operand.vmem [shape: bf16[128,32], index: 11, kind: input, shape index: {}]   ;;  %s7331_s12 = inlined_call_operand.vmem [shape: f32[1,32], index: 12, kind: input, shape index: {}]   ;;  %s7332_s13 = inlined_call_operand.vmem [shape: f32[2,128,32], index: 13, kind: output, shape index: {}]  }
   0x1 LB: > { %s4005_s26 = sadd.s32 4294967295, %s5244_s25   ;;  %p4009_p0 = scmp.ge.s32.totalorder %s5244_s25, 1  ;;  %s5244_s25 = sphi %s5330_s25, %s23_s25  }
   0x2   : > { %p387_p1 = scmp.lt.s32.totalorder %s5244_s25, 3 }
   0x4   : > { %p388_p2 = pnand %p4009_p0, %p387_p1 }
   0x6   : > { %391 = sbr.rel (%p388_p2) target bundleno = 4565 (0x11d5), region = 72 }
   0xd   : > { %p431_p3 = scmp.lt.s32.totalorder %s4005_s26, 1  ;;  %vm7333_vm0 = vcmask 261120   ;;  %s5246_s24 = smov 96   ;;  %vm957_vm1 = vcmask 64512  }
   0xe   : > { %s5247_s28 = smov 64   ;;  %s5248_s29 = smov 88  }
   0xf   : > { %s7527_s26 = smov (!%p431_p3, %s4005_s26), 1  ;;  %s5249_s14 = smov 120  }
  0x10   : > { %s4110_s27 = sshll.u32 %s7527_s26, 7  ;;  %s5250_s15 = smov 56  }
  0x11   : > { %s5346_s30 = scalar_lea.vmem %s7319_s0, %s4110_s27  ;;  %s5251_s16 = smov 80  }
  0x12   : > { %v442_v0 = vld [vmem:[%s5346_s30] sm:$0xff]  ;;  %v444_v1 = vld [vmem:[%s5346_s30 + $0x10] sm:$0xff]  ;;  %v443_v2 = vld [vmem:[%s5346_s30 + $0x8] sm:$0xff]  ;;  %s5252_s17 = smov 112   ;;  %s5253_s18 = smov 48  }
  0x13   : > { %v459_v3 = vsel %vm7333_vm0, %v442_v0, 0.0  ;;  %v465_v4 = vsel %vm7333_vm0, %v444_v1, 0.0  ;;  %v445_v5 = vld [vmem:[%s5346_s30 + $0x18] sm:$0xff]  ;;  %v5355_v6 = vld [vmem:[%s5346_s30 + $0x20] sm:$0xff]  ;;  %v462_v7 = vsel %vm7333_vm0, %v443_v2, 0.0  ;;  %v447_v9 = vld [vmem:[%s5346_s30 + $0x28] sm:$0xff] }
  0x14   : > { %460 = vadd.xlane.f32.xlu0 %v459_v3  ;;  %466 = vadd.xlane.f32.xlu1 %v465_v4  ;;  %v468_v8 = vsel %vm7333_vm0, %v445_v5, 0.0  ;;  %v471_v10 = vsel %vm7333_vm0, %v5355_v6, 0.0  ;;  %v474_v11 = vsel %vm7333_vm0, %v447_v9, 0.0  ;;  %v5364_v12 = vld [vmem:[%s5346_s30 + $0x30] sm:$0xff]  ;;  %v5367_v13 = vld [vmem:[%s5346_s30 + $0x38] sm:$0xff]  ;;  %v5374_v16 = vld [vmem:[%s5346_s30 + $0x40] sm:$0xff] }
  0x15   : > { %v477_v14 = vsel %vm7333_vm0, %v5364_v12, 0.0  ;;  %v480_v15 = vsel %vm7333_vm0, %v5367_v13, 0.0  ;;  %v5377_v17 = vld [vmem:[%s5346_s30 + $0x48] sm:$0xff]  ;;  %v483_v18 = vsel %vm7333_vm0, %v5374_v16, 0.0  ;;  %v5384_v20 = vld [vmem:[%s5346_s30 + $0x50] sm:$0xff]  ;;  %v5387_v21 = vld [vmem:[%s5346_s30 + $0x58] sm:$0xff] }
  0x16   : > { %v486_v19 = vsel %vm7333_vm0, %v5377_v17, 0.0  ;;  %v489_v22 = vsel %vm7333_vm0, %v5384_v20, 0.0  ;;  %v492_v23 = vsel %vm7333_vm0, %v5387_v21, 0.0  ;;  %v5394_v24 = vld [vmem:[%s5346_s30 + $0x60] sm:$0xff]  ;;  %v5397_v25 = vld [vmem:[%s5346_s30 + $0x68] sm:$0xff]  ;;  %v5404_v28 = vld [vmem:[%s5346_s30 + $0x70] sm:$0xff] }
  0x17   : > { %v495_v26 = vsel %vm7333_vm0, %v5394_v24, 0.0  ;;  %v498_v27 = vsel %vm7333_vm0, %v5397_v25, 0.0  ;;  %v5407_v29 = vld [vmem:[%s5346_s30 + $0x78] sm:$0xff]  ;;  %v501_v30 = vsel %vm7333_vm0, %v5404_v28, 0.0  ;;  %s5254_s19 = smov 72   ;;  %s5255_s20 = smov 104  }
  0x18   : > { %463 = vadd.xlane.f32.xlu0 %v462_v7  ;;  %469 = vadd.xlane.f32.xlu1 %v468_v8  ;;  %v504_v31 = vsel %vm7333_vm0, %v5407_v29, 0.0  ;;  %s5256_s21 = smov 40   ;;  %s5257_s22 = smov 8  }
  0x19   : > { %s5258_s23 = smov 16  }
  0x1c   : > { %472 = vadd.xlane.f32.xlu0 %v471_v10  ;;  %475 = vadd.xlane.f32.xlu1 %v474_v11 }
  0x20   : > { %478 = vadd.xlane.f32.xlu0 %v477_v14  ;;  %481 = vadd.xlane.f32.xlu1 %v480_v15 }
  0x24   : > { %484 = vadd.xlane.f32.xlu0 %v483_v18  ;;  %487 = vadd.xlane.f32.xlu1 %v486_v19 }
  0x28   : > { %490 = vadd.xlane.f32.xlu0 %v489_v22  ;;  %493 = vadd.xlane.f32.xlu1 %v492_v23 }
  0x2c   : > { %496 = vadd.xlane.f32.xlu0 %v495_v26  ;;  %499 = vadd.xlane.f32.xlu1 %v498_v27 }
  0x30   : > { %502 = vadd.xlane.f32.xlu0 %v501_v30  ;;  %505 = vadd.xlane.f32.xlu1 %v504_v31 }
  0xa1   : > { %v461_v32 = vpop.xlane.xlu0 %460  ;;  %v467_v33 = vpop.xlane.xlu1 %466 }
  0xa2   : > { %v508_v34 = vmul.f32 0.03125, %v461_v32  ;;  %v510_v35 = vmul.f32 0.03125, %v467_v33 }
  0xa4   : > { %v5413_v36 = vsub.f32 %v442_v0, %v508_v34  ;;  %v5415_v37 = vsub.f32 %v444_v1, %v510_v35 }
  0xa5   : > { %v464_v38 = vpop.xlane.xlu0 %463  ;;  %v470_v39 = vpop.xlane.xlu1 %469 }
  0xa6   : > { %v509_v40 = vmul.f32 0.03125, %v464_v38  ;;  %v511_v41 = vmul.f32 0.03125, %v470_v39  ;;  %v540_v42 = vmul.f32 %v5413_v36, %v5413_v36  ;;  %v542_v43 = vmul.f32 %v5415_v37, %v5415_v37 }
  0xa8   : > { %v5421_v44 = vsub.f32 %v443_v2, %v509_v40  ;;  %v5423_v45 = vsub.f32 %v445_v5, %v511_v41  ;;  %v556_v46 = vsel %vm7333_vm0, %v540_v42, 0.0  ;;  %v562_v49 = vsel %vm7333_vm0, %v542_v43, 0.0 }
  0xa9   : > { %557 = vadd.xlane.f32.xlu0 %v556_v46  ;;  %v473_v47 = vpop.xlane.xlu0 %472  ;;  %v476_v48 = vpop.xlane.xlu1 %475 }
  0xaa   : > { %v512_v50 = vmul.f32 0.03125, %v473_v47  ;;  %v513_v51 = vmul.f32 0.03125, %v476_v48  ;;  %v541_v52 = vmul.f32 %v5421_v44, %v5421_v44  ;;  %v543_v53 = vmul.f32 %v5423_v45, %v5423_v45 }
  0xac   : > { %v5432_v54 = vsub.f32 %v5355_v6, %v512_v50  ;;  %v5434_v55 = vsub.f32 %v447_v9, %v513_v51  ;;  %v559_v56 = vsel %vm7333_vm0, %v541_v52, 0.0  ;;  %v565_v59 = vsel %vm7333_vm0, %v543_v53, 0.0  ;;  %v4825_v53 = vld [vmem:[%s7322_s3 + $0x8] sm:$0xff]  }
  0xad   : > { %563 = vadd.xlane.f32.xlu0 %v562_v49  ;;  %560 = vadd.xlane.f32.xlu1 %v559_v56  ;;  %v479_v57 = vpop.xlane.xlu0 %478  ;;  %v482_v58 = vpop.xlane.xlu1 %481 }
  0xae   : > { %v514_v60 = vmul.f32 0.03125, %v479_v57  ;;  %v515_v61 = vmul.f32 0.03125, %v482_v58  ;;  %v544_v62 = vmul.f32 %v5432_v54, %v5432_v54  ;;  %v545_v63 = vmul.f32 %v5434_v55, %v5434_v55 }
  0xb0   : > { %v5443_v0 = vsub.f32 %v5364_v12, %v514_v60  ;;  %v5446_v1 = vsub.f32 %v5367_v13, %v515_v61  ;;  %v568_v2 = vsel %vm7333_vm0, %v544_v62, 0.0  ;;  %v571_v5 = vsel %vm7333_vm0, %v545_v63, 0.0 }
  0xb1   : > { %566 = vadd.xlane.f32.xlu1 %v565_v59  ;;  %569 = vadd.xlane.f32.xlu0 %v568_v2  ;;  %v485_v3 = vpop.xlane.xlu0 %484  ;;  %v488_v4 = vpop.xlane.xlu1 %487 }
  0xb2   : > { %v516_v6 = vmul.f32 0.03125, %v485_v3  ;;  %v517_v7 = vmul.f32 0.03125, %v488_v4  ;;  %v546_v8 = vmul.f32 %v5443_v0, %v5443_v0  ;;  %v547_v9 = vmul.f32 %v5446_v1, %v5446_v1 }
  0xb4   : > { %v5455_v10 = vsub.f32 %v5374_v16, %v516_v6  ;;  %v5458_v11 = vsub.f32 %v5377_v17, %v517_v7  ;;  %v574_v12 = vsel %vm7333_vm0, %v546_v8, 0.0  ;;  %v577_v15 = vsel %vm7333_vm0, %v547_v9, 0.0 }
  0xb5   : > { %572 = vadd.xlane.f32.xlu1 %v571_v5  ;;  %575 = vadd.xlane.f32.xlu0 %v574_v12  ;;  %v491_v13 = vpop.xlane.xlu0 %490  ;;  %v494_v14 = vpop.xlane.xlu1 %493 }
  0xb6   : > { %v518_v18 = vmul.f32 0.03125, %v491_v13  ;;  %v519_v19 = vmul.f32 0.03125, %v494_v14  ;;  %v548_v22 = vmul.f32 %v5455_v10, %v5455_v10  ;;  %v549_v16 = vmul.f32 %v5458_v11, %v5458_v11 }
  0xb8   : > { %v5467_v23 = vsub.f32 %v5384_v20, %v518_v18  ;;  %v5470_v17 = vsub.f32 %v5387_v21, %v519_v19  ;;  %v580_v26 = vsel %vm7333_vm0, %v548_v22, 0.0  ;;  %v583_v31 = vsel %vm7333_vm0, %v549_v16, 0.0 }
  0xb9   : > { %578 = vadd.xlane.f32.xlu1 %v577_v15  ;;  %581 = vadd.xlane.f32.xlu0 %v580_v26  ;;  %v497_v27 = vpop.xlane.xlu0 %496  ;;  %v500_v30 = vpop.xlane.xlu1 %499 }
  0xba   : > { %v520_v32 = vmul.f32 0.03125, %v497_v27  ;;  %v521_v33 = vmul.f32 0.03125, %v500_v30  ;;  %v550_v34 = vmul.f32 %v5467_v23, %v5467_v23  ;;  %v551_v20 = vmul.f32 %v5470_v17, %v5470_v17 }
  0xbc   : > { %v5479_v35 = vsub.f32 %v5394_v24, %v520_v32  ;;  %v5482_v21 = vsub.f32 %v5397_v25, %v521_v33  ;;  %v586_v38 = vsel %vm7333_vm0, %v550_v34, 0.0  ;;  %v589_v41 = vsel %vm7333_vm0, %v551_v20, 0.0 }
  0xbd   : > { %584 = vadd.xlane.f32.xlu1 %v583_v31  ;;  %587 = vadd.xlane.f32.xlu0 %v586_v38  ;;  %v503_v39 = vpop.xlane.xlu0 %502  ;;  %v506_v40 = vpop.xlane.xlu1 %505  ;;  %v5514_v31 = vld [vmem:[%s7320_s1] ss:$0 sm:$0xff] }
  0xbe   : > { %v522_v42 = vmul.f32 0.03125, %v503_v39  ;;  %v523_v43 = vmul.f32 0.03125, %v506_v40  ;;  %v552_v46 = vmul.f32 %v5479_v35, %v5479_v35  ;;  %v553_v24 = vmul.f32 %v5482_v21, %v5482_v21 }
  0xc0   : > { %v5491_v47 = vsub.f32 %v5404_v28, %v522_v42  ;;  %v5494_v25 = vsub.f32 %v5407_v29, %v523_v43  ;;  %v592_v48 = vsel %vm7333_vm0, %v552_v46, 0.0  ;;  %v595_v49 = vsel %vm7333_vm0, %v553_v24, 0.0  ;;  %v4824_v29 = vld [vmem:[%s7322_s3] sm:$0xff]  }
  0xc1   : > { %590 = vadd.xlane.f32.xlu1 %v589_v41  ;;  %593 = vadd.xlane.f32.xlu0 %v592_v48  ;;  %v5521_v43 = vld [vmem:[%s7321_s2] ss:$0 sm:$0xff] }
  0xc2   : > { %v554_v50 = vmul.f32 %v5491_v47, %v5491_v47  ;;  %v555_v51 = vmul.f32 %v5494_v25, %v5494_v25  ;;  %4286 = vmatprep.subr.bf16.mxu0 %v4824_v29 }
  0xc3   : > { %4287 = vmatpush3.bf16.msra.mxu0 %v4824_v29 }
  0xc4   : > { %v598_v52 = vsel %vm7333_vm0, %v554_v50, 0.0  ;;  %v601_v28 = vsel %vm7333_vm0, %v555_v51, 0.0  ;;  %4288 = vmatprep.subr.bf16.mxu0 %v4825_v53 }
  0xc5   : > { %596 = vadd.xlane.f32.xlu1 %v595_v49  ;;  %599 = vadd.xlane.f32.xlu0 %v598_v52 }
  0xc7   : > { %4289 = vmatpush3.bf16.msra.mxu0 %v4825_v53 }
  0xc9   : > { %602 = vadd.xlane.f32.xlu1 %v601_v28 }
 0x136   : > { %v558_v56 = vpop.xlane.xlu0 %557 }
 0x137   : > { %v604_v57 = vmul.f32 0.03125, %v558_v56 }
 0x139   : > { %v620_v58 = vadd.f32 1e-05, %v604_v57 }
 0x13a   : > { %v561_v59 = vpop.xlane.xlu1 %560  ;;  %v564_v60 = vpop.xlane.xlu0 %563 }
 0x13b   : > { %4838 = vrsqrt.f32 %v620_v58  ;;  %v605_v61 = vmul.f32 0.03125, %v561_v59  ;;  %v606_v62 = vmul.f32 0.03125, %v564_v60 }
 0x13d   : > { %v621_v63 = vadd.f32 1e-05, %v605_v61  ;;  %v622_v2 = vadd.f32 1e-05, %v606_v62 }
 0x13e   : > { %v567_v3 = vpop.xlane.xlu1 %566  ;;  %v570_v4 = vpop.xlane.xlu0 %569 }
 0x13f   : > { %4840 = vrsqrt.f32 %v621_v63  ;;  %v607_v5 = vmul.f32 0.03125, %v567_v3  ;;  %v608_v6 = vmul.f32 0.03125, %v570_v4 }
 0x140   : > { %4842 = vrsqrt.f32 %v622_v2 }
 0x141   : > { %v623_v7 = vadd.f32 1e-05, %v607_v5  ;;  %v624_v8 = vadd.f32 1e-05, %v608_v6 }
 0x142   : > { %v573_v9 = vpop.xlane.xlu1 %572  ;;  %v576_v12 = vpop.xlane.xlu0 %575 }
 0x143   : > { %4844 = vrsqrt.f32 %v623_v7  ;;  %v609_v13 = vmul.f32 0.03125, %v573_v9  ;;  %v610_v14 = vmul.f32 0.03125, %v576_v12 }
 0x144   : > { %4846 = vrsqrt.f32 %v624_v8 }
 0x145   : > { %v4839_v15 = vpop.eup %4838  ;;  %v625_v18 = vadd.f32 1e-05, %v609_v13  ;;  %v626_v19 = vadd.f32 1e-05, %v610_v14 }
 0x146   : > { %v579_v22 = vpop.xlane.xlu1 %578  ;;  %v582_v16 = vpop.xlane.xlu0 %581  ;;  %v652_v26 = vmul.f32 %v4839_v15, %v5413_v36 }
 0x147   : > { %4848 = vrsqrt.f32 %v625_v18  ;;  %v611_v27 = vmul.f32 0.03125, %v579_v22  ;;  %v612_v30 = vmul.f32 0.03125, %v582_v16 }
 0x148   : > { %4850 = vrsqrt.f32 %v626_v19  ;;  %v675_v41 = vmul.f32 %v5514_v31, %v652_v26 }
 0x149   : > { %v4841_v32 = vpop.eup %4840  ;;  %v627_v33 = vadd.f32 1e-05, %v611_v27  ;;  %v628_v34 = vadd.f32 1e-05, %v612_v30 }
 0x14a   : > { %v4843_v20 = vpop.eup %4842  ;;  %v585_v38 = vpop.xlane.xlu1 %584  ;;  %v653_v40 = vmul.f32 %v4841_v32, %v5421_v44  ;;  %v698_v28 = vadd.f32 %v5521_v43, %v675_v41 }
 0x14b   : > { %v588_v39 = vpop.xlane.xlu0 %587  ;;  %4852 = vrsqrt.f32 %v627_v33  ;;  %v613_v36 = vmul.f32 0.03125, %v585_v38  ;;  %v654_v46 = vmul.f32 %v4843_v20, %v5415_v37 }
 0x14c   : > { %v614_v42 = vmul.f32 0.03125, %v588_v39  ;;  %4854 = vrsqrt.f32 %v628_v34  ;;  %v676_v24 = vmul.f32 %v5514_v31, %v653_v40 }
 0x14d   : > { %v4845_v48 = vpop.eup %4844  ;;  %v629_v49 = vadd.f32 1e-05, %v613_v36  ;;  %v677_v56 = vmul.f32 %v5514_v31, %v654_v46 }
 0x14e   : > { %v630_v50 = vadd.f32 1e-05, %v614_v42  ;;  %v4847_v51 = vpop.eup %4846  ;;  %v591_v44 = vpop.xlane.xlu1 %590  ;;  %v699_v29 = vadd.f32 %v5521_v43, %v676_v24  ;;  %v655_v53 = vmul.f32 %v4845_v48, %v5423_v45 }
 0x14f   : > { %v594_v52 = vpop.xlane.xlu0 %593  ;;  %4856 = vrsqrt.f32 %v629_v49  ;;  %v615_v57 = vmul.f32 0.03125, %v591_v44  ;;  %v656_v60 = vmul.f32 %v4847_v51, %v5432_v54  ;;  %v700_v45 = vadd.f32 %v5521_v43, %v677_v56 }
 0x150   : > { %v616_v37 = vmul.f32 0.03125, %v594_v52  ;;  %4858 = vrsqrt.f32 %v630_v50  ;;  %v714_v58 = vpack.c.bf16 %v699_v29, %v698_v28  ;;  %v678_v59 = vmul.f32 %v5514_v31, %v655_v53 }
 0x151   : > { %v4849_v61 = vpop.eup %4848  ;;  %v631_v62 = vadd.f32 1e-05, %v615_v57  ;;  %v679_v7 = vmul.f32 %v5514_v31, %v656_v60 }
 0x152   : > { %v632_v63 = vadd.f32 1e-05, %v616_v37  ;;  %v4851_v2 = vpop.eup %4850  ;;  %v597_v3 = vpop.xlane.xlu1 %596  ;;  %4290 = vmatprep.mubr.msk.bf16.mxu0 %vm7333_vm0, %v714_v58  ;;  %v701_v5 = vadd.f32 %v5521_v43, %v678_v59  ;;  %v657_v6 = vmul.f32 %v4849_v61, %v5434_v55 }
 0x153   : > { %v600_v4 = vpop.xlane.xlu0 %599  ;;  %4860 = vrsqrt.f32 %v631_v62  ;;  %v617_v8 = vmul.f32 0.03125, %v597_v3  ;;  %v658_v54 = vmul.f32 %v4851_v2, %v5443_v0  ;;  %v702_v55 = vadd.f32 %v5521_v43, %v679_v7 }
 0x154   : > { %v618_v9 = vmul.f32 0.03125, %v600_v4  ;;  %4862 = vrsqrt.f32 %v632_v63  ;;  %v715_v12 = vpack.c.bf16 %v701_v5, %v700_v45  ;;  %v680_v13 = vmul.f32 %v5514_v31, %v657_v6  ;;  %v5579_v4 = vld [vmem:[%s7323_s4] ss:$0 sm:$0xff] }
 0x155   : > { %v4853_v14 = vpop.eup %4852  ;;  %v633_v15 = vadd.f32 1e-05, %v617_v8  ;;  %v681_v27 = vmul.f32 %v5514_v31, %v658_v54 }
 0x156   : > { %v634_v18 = vadd.f32 1e-05, %v618_v9  ;;  %v4855_v19 = vpop.eup %4854  ;;  %v603_v22 = vpop.xlane.xlu1 %602  ;;  %4291 = vmatmul.mubr.msk.bf16.vlgmr.msra.gmra.mrb[0].mxu0 %vm7333_vm0, %v715_v12  ;;  %v703_v16 = vadd.f32 %v5521_v43, %v680_v13  ;;  %v659_v26 = vmul.f32 %v4853_v14, %v5446_v1 }
 0x157   : > { %4864 = vrsqrt.f32 %v633_v15  ;;  %v619_v0 = vmul.f32 0.03125, %v603_v22  ;;  %v660_v30 = vmul.f32 %v4855_v19, %v5455_v10  ;;  %v704_v39 = vadd.f32 %v5521_v43, %v681_v27 }
 0x158   : > { %4866 = vrsqrt.f32 %v634_v18  ;;  %v716_v32 = vpack.c.bf16 %v703_v16, %v702_v55  ;;  %v682_v33 = vmul.f32 %v5514_v31, %v659_v26 }
 0x159   : > { %v4857_v34 = vpop.eup %4856  ;;  %v635_v20 = vadd.f32 1e-05, %v619_v0  ;;  %v683_v41 = vmul.f32 %v5514_v31, %v660_v30 }
 0x15a   : > { %v4859_v38 = vpop.eup %4858  ;;  %4294 = vmatprep.mubr.msk.bf16.mxu0 %vm7333_vm0, %v716_v32  ;;  %v705_v40 = vadd.f32 %v5521_v43, %v682_v33  ;;  %v661_v1 = vmul.f32 %v4857_v34, %v5458_v11 }
 0x15b   : > { %4868 = vrsqrt.f32 %v635_v20  ;;  %v662_v10 = vmul.f32 %v4859_v38, %v5467_v23  ;;  %v706_v48 = vadd.f32 %v5521_v43, %v683_v41 }
 0x15c   : > { %v717_v36 = vpack.c.bf16 %v705_v40, %v704_v39  ;;  %v684_v42 = vmul.f32 %v5514_v31, %v661_v1 }
 0x15d   : > { %v4861_v46 = vpop.eup %4860  ;;  %v685_v11 = vmul.f32 %v5514_v31, %v662_v10 }
 0x15e   : > { %v4863_v24 = vpop.eup %4862  ;;  %4295 = vmatmul.mubr.msk.bf16.gmra.mrb[4].mxu0 %vm7333_vm0, %v717_v36  ;;  %v707_v49 = vadd.f32 %v5521_v43, %v684_v42  ;;  %v663_v50 = vmul.f32 %v4861_v46, %v5470_v17 }
 0x15f   : > { %v664_v51 = vmul.f32 %v4863_v24, %v5479_v35  ;;  %v708_v29 = vadd.f32 %v5521_v43, %v685_v11 }
 0x160   : > { %v718_v44 = vpack.c.bf16 %v707_v49, %v706_v48  ;;  %v686_v23 = vmul.f32 %v5514_v31, %v663_v50 }
 0x161   : > { %v4865_v52 = vpop.eup %4864  ;;  %v687_v57 = vmul.f32 %v5514_v31, %v664_v51 }
 0x162   : > { %v4867_v28 = vpop.eup %4866  ;;  %4298 = vmatprep.mubr.msk.bf16.mxu0 %vm7333_vm0, %v718_v44  ;;  %v709_v53 = vadd.f32 %v5521_v43, %v686_v23  ;;  %v665_v56 = vmul.f32 %v4865_v52, %v5482_v21 }
 0x163   : > { %v666_v17 = vmul.f32 %v4867_v28, %v5491_v47  ;;  %v710_v59 = vadd.f32 %v5521_v43, %v687_v57 }
 0x164   : > { %v719_v37 = vpack.c.bf16 %v709_v53, %v708_v29  ;;  %v688_v35 = vmul.f32 %v5514_v31, %v665_v56 }
 0x165   : > { %v4869_v58 = vpop.eup %4868  ;;  %v689_v62 = vmul.f32 %v5514_v31, %v666_v17 }
 0x166   : > { %4299 = vmatmul.mubr.msk.bf16.gmra.mrb[8].mxu0 %vm7333_vm0, %v719_v37  ;;  %v711_v60 = vadd.f32 %v5521_v43, %v688_v35  ;;  %v667_v61 = vmul.f32 %v4869_v58, %v5494_v25 }
 0x167   : > { %v712_v47 = vadd.f32 %v5521_v43, %v689_v62 }
 0x168   : > { %v720_v63 = vpack.c.bf16 %v711_v60, %v710_v59  ;;  %v690_v21 = vmul.f32 %v5514_v31, %v667_v61 }
 0x16a   : > { %4302 = vmatprep.mubr.msk.bf16.mxu0 %vm7333_vm0, %v720_v63  ;;  %v713_v2 = vadd.f32 %v5521_v43, %v690_v21 }
 0x16c   : > { %v721_v3 = vpack.c.bf16 %v713_v2, %v712_v47 }
 0x16e   : > { %4303 = vmatmul.mubr.msk.bf16.gmra.mrb[12].mxu0 %vm7333_vm0, %v721_v3 }
 0x229   : > { %v4292_v25 = vpop.f32.mrb[0].mxu0 }
 0x22a   : > { %v812_v45 = vadd.f32 %v4292_v25, %v5579_v4  ;;  %v803_v5 = vpop.f32.mrb[1].mxu0 }
 0x22b   : > { %v804_v31 = vadd.f32 %v5579_v4, %v803_v5  ;;  %v4293_v6 = vpop.f32.mrb[2].mxu0 }
 0x22c   : > { %v815_v7 = vadd.f32 %v4293_v6, %v5579_v4  ;;  %v806_v8 = vpop.f32.mrb[3].mxu0  ;;  %v903_v9 = vmul.f32 0.35355338, %v812_v45 }
 0x22d   : > { %v807_v43 = vadd.f32 %v5579_v4, %v806_v8  ;;  %v901_v13 = vmul.f32 0.35355338, %v804_v31 }
 0x22e   : > { %v904_v54 = vmul.f32 0.35355338, %v815_v7  ;;  %v5585_v12 = vpack.c.bf16 %v815_v7, %v812_v45 }
 0x22f   : > { %v902_v14 = vmul.f32 0.35355338, %v807_v43  ;;  %v5587_v15 = vpack.c.bf16 %v807_v43, %v804_v31 }
 0x230   : > { %v5589_v18 = vpack.c.bf16 %v904_v54, %v903_v9  ;;  %943 = vrot.lane.b32.xlu1 %v5585_v12, %s5246_s24 }
 0x231   : > { %v5593_v19 = vpack.c.bf16 %v902_v14, %v901_v13  ;;  %941 = vrot.lane.b32.xlu0 %v5587_v15, %s5246_s24  ;;  %v4296_v22 = vpop.f32.mrb[4].mxu0 }
 0x232   : > { %v828_v55 = vadd.f32 %v4296_v22, %v5579_v4  ;;  %v819_v16 = vpop.f32.mrb[5].mxu0 }
 0x233   : > { %v820_v26 = vadd.f32 %v5579_v4, %v819_v16  ;;  %v4297_v27 = vpop.f32.mrb[6].mxu0  ;;  %4322 = vmatprep.mubr.msk.bf16.mxu1 %vm957_vm1, %v5593_v19 }
 0x234   : > { %v831_v0 = vadd.f32 %v4297_v27, %v5579_v4  ;;  %v822_v30 = vpop.f32.mrb[7].mxu0  ;;  %v907_v33 = vmul.f32 0.35355338, %v828_v55 }
 0x235   : > { %v823_v32 = vadd.f32 %v5579_v4, %v822_v30  ;;  %v905_v38 = vmul.f32 0.35355338, %v820_v26 }
 0x236   : > { %v908_v34 = vmul.f32 0.35355338, %v831_v0  ;;  %v5603_v20 = vpack.c.bf16 %v831_v0, %v828_v55 }
 0x237   : > { %v906_v39 = vmul.f32 0.35355338, %v823_v32  ;;  %v5605_v40 = vpack.c.bf16 %v823_v32, %v820_v26 }
 0x238   : > { %7365 = vst [vmem:[#allocation2_spill] sm:$0xff] %v5603_v20  ;;  %v5607_v1 = vpack.c.bf16 %v908_v34, %v907_v33 }
 0x239   : > { %v5609_v41 = vpack.c.bf16 %v906_v39, %v905_v38  ;;  %945 = vrot.lane.b32.xlu1 %v5605_v40, %s5246_s24  ;;  %v4300_v10 = vpop.f32.mrb[8].mxu0 }
 0x23a   : > { %v844_v36 = vadd.f32 %v4300_v10, %v5579_v4  ;;  %v835_v42 = vpop.f32.mrb[9].mxu0 }
 0x23b   : > { %v836_v46 = vadd.f32 %v5579_v4, %v835_v42  ;;  %v4301_v24 = vpop.f32.mrb[10].mxu0 }
 0x23c   : > { %v847_v48 = vadd.f32 %v4301_v24, %v5579_v4  ;;  %v838_v49 = vpop.f32.mrb[11].mxu0  ;;  %v911_v11 = vmul.f32 0.35355338, %v844_v36 }
 0x23d   : > { %v839_v50 = vadd.f32 %v5579_v4, %v838_v49  ;;  %947 = vrot.lane.b32.xlu1 %v5603_v20, %s5246_s24  ;;  %v909_v23 = vmul.f32 0.35355338, %v836_v46 }
 0x23e   : > { %v912_v51 = vmul.f32 0.35355338, %v847_v48  ;;  %v5619_v44 = vpack.c.bf16 %v847_v48, %v844_v36  ;;  %v866_v36 = vlaneseq }
 0x23f   : > { %v910_v52 = vmul.f32 0.35355338, %v839_v50  ;;  %v5621_v28 = vpack.c.bf16 %v839_v50, %v836_v46 }
 0x240   : > { %7366 = vst [vmem:[#allocation3_spill] sm:$0xff] %v5619_v44  ;;  %v5623_v29 = vpack.c.bf16 %v912_v51, %v911_v11  ;;  %v5693_v42 = vshrl.u32 %v866_v36, 7  ;;  %v5695_v46 = vand.u32 127, %v866_v36 }
 0x241   : > { %7367 = vst [vmem:[#allocation4_spill] sm:$0xff] %v5621_v28  ;;  %v5625_v53 = vpack.c.bf16 %v910_v52, %v909_v23  ;;  %951 = vrot.lane.b32.xlu1 %v5619_v44, %s5246_s24  ;;  %949 = vrot.lane.b32.xlu0 %v5621_v28, %s5246_s24  ;;  %v4304_v56 = vpop.f32.mrb[12].mxu0 }
 0x242   : > { %v860_v57 = vadd.f32 %v4304_v56, %v5579_v4  ;;  %v851_v17 = vpop.f32.mrb[13].mxu0  ;;  %v5698_v24 = vadd.s32 120, %v5693_v42  ;;  %v5701_v48 = vadd.s32 104, %v5693_v42  ;;  %v5708_v49 = vadd.s32 16, %v5693_v42 }
 0x243   : > { %v852_v37 = vadd.f32 %v5579_v4, %v851_v17  ;;  %v4305_v35 = vpop.f32.mrb[14].mxu0  ;;  %v5711_v50 = vadd.s32 8, %v5693_v42  ;;  %vm885_vm6 = vcmp.gt.s32.totalorder %v5695_v46, %v5693_v42  ;;  %v5726_v56 = vadd.s32 24, %v5693_v42 }
 0x244   : > { %v863_v58 = vadd.f32 %v4305_v35, %v5579_v4  ;;  %v854_v59 = vpop.f32.mrb[15].mxu0  ;;  %v915_v61 = vmul.f32 0.35355338, %v860_v57  ;;  %7368 = vst [vmem:[#allocation5_spill] sm:$0xff] %v5698_v24  ;;  %7369 = vst [vmem:[#allocation6_spill] sm:$0xff] %v5701_v48  ;;  %vm900_vm2 = vcmp.gt.s32.totalorder %v5695_v46, %v5698_v24  ;;  %vm898_vm3 = vcmp.gt.s32.totalorder %v5695_v46, %v5701_v48 }
 0x245   : > { %v855_v60 = vadd.f32 %v5579_v4, %v854_v59  ;;  %v913_v21 = vmul.f32 0.35355338, %v852_v37  ;;  %vm887_vm4 = vcmp.gt.s32.totalorder %v5695_v46, %v5708_v49  ;;  %vm886_vm5 = vcmp.gt.s32.totalorder %v5695_v46, %v5711_v50 }
 0x246   : > { %v916_v62 = vmul.f32 0.35355338, %v863_v58  ;;  %v5635_v63 = vpack.c.bf16 %v863_v58, %v860_v57  ;;  %vm888_vm7 = vcmp.gt.s32.totalorder %v5695_v46, %v5726_v56  ;;  %v5746_v58 = vadd.s32 48, %v5693_v42 }
 0x247   : > { %v914_v47 = vmul.f32 0.35355338, %v855_v60  ;;  %v5637_v2 = vpack.c.bf16 %v855_v60, %v852_v37  ;;  %v5734_v37 = vadd.s32 56, %v5693_v42  ;;  %v5751_v60 = vadd.s32 40, %v5693_v42 }
 0x248   : > { %v5639_v3 = vpack.c.bf16 %v916_v62, %v915_v61  ;;  %955 = vrot.lane.b32.xlu1 %v5635_v63, %s5246_s24  ;;  %vm891_vm9 = vcmp.gt.s32.totalorder %v5695_v46, %v5746_v58 }
 0x249   : > { %v5643_v25 = vpack.c.bf16 %v914_v47, %v913_v21  ;;  %953 = vrot.lane.b32.xlu0 %v5637_v2, %s5246_s24  ;;  %vm892_vm8 = vcmp.gt.s32.totalorder %v5695_v46, %v5734_v37  ;;  %v5762_v47 = vadd.s32 32, %v5693_v42  ;;  %vm890_vm10 = vcmp.gt.s32.totalorder %v5695_v46, %v5751_v60 }
 0x24b   : > { %vm889_vm11 = vcmp.gt.s32.totalorder %v5695_v46, %v5762_v47 }
 0x24c   : > { %1273 = vrot.lane.b32.xlu1 %v5585_v12, %s5247_s28 }
 0x24d   : > { %1271 = vrot.lane.b32.xlu0 %v5587_v15, %s5247_s28 }
 0x250   : > { %1277 = vrot.lane.b32.xlu1 %v5603_v20, %s5247_s28 }
 0x251   : > { %1275 = vrot.lane.b32.xlu0 %v5605_v40, %s5247_s28 }
 0x254   : > { %1281 = vrot.lane.b32.xlu1 %v5619_v44, %s5247_s28 }
 0x255   : > { %1279 = vrot.lane.b32.xlu0 %v5621_v28, %s5247_s28 }
 0x258   : > { %1285 = vrot.lane.b32.xlu1 %v5635_v63, %s5247_s28 }
 0x259   : > { %1416 = vrot.lane.b32.xlu0 %v5587_v15, %s5248_s29 }
 0x25c   : > { %1418 = vrot.lane.b32.xlu1 %v5585_v12, %s5248_s29 }
 0x25d   : > { %1283 = vrot.lane.b32.xlu0 %v5637_v2, %s5247_s28 }
 0x2a2   : > { %v944_v5 = vpop.permute.xlu1 %943 }
 0x2a3   : > { %v942_v4 = vpop.permute.xlu0 %941  ;;  %v986_v6 = vsel %vm957_vm1, %v944_v5, 0 }
 0x2a4   : > { %4650 = vmatprep.subr.msk.bf16.mxu1 %vm957_vm1, %v942_v4  ;;  %v983_v45 = vsel %vm957_vm1, %v942_v4, 0 }
 0x2a5   : > { %4307 = vmatpush3.bf16.xpose.msra.mxu1 %v983_v45 }
 0x2a6   : > { %4651 = vmatprep.subr.msk.bf16.mxu1 %vm957_vm1, %v944_v5  ;;  %v5773_v5 = vadd.s32 88, %v5693_v42 }
 0x2a8   : > { %vm7345_vm12 = vcmp.gt.s32.totalorder %v5695_v46, %v5773_v5 }
 0x2ab   : > { %v946_v31 = vpop.permute.xlu1 %945 }
 0x2ac   : > { %v989_v8 = vsel %vm957_vm1, %v946_v31, 0 }
 0x2ad   : > { %4309 = vmatpush3.bf16.xpose.msra.mxu1 %v986_v6  ;;  %v5784_v6 = vadd.s32 80, %v5693_v42 }
 0x2ae   : > { %4652 = vmatprep.subr.msk.bf16.mxu1 %vm957_vm1, %v946_v31 }
 0x2af   : > { %v948_v7 = vpop.permute.xlu1 %947  ;;  %vm895_vm13 = vcmp.gt.s32.totalorder %v5695_v46, %v5784_v6 }
 0x2b0   : > { %v992_v14 = vsel %vm957_vm1, %v948_v7, 0 }
 0x2b3   : > { %v952_v43 = vpop.permute.xlu1 %951  ;;  %v950_v9 = vpop.permute.xlu0 %949 }
 0x2b4   : > { %v995_v26 = vsel %vm957_vm1, %v950_v9, 0  ;;  %v998_v30 = vsel %vm957_vm1, %v952_v43, 0 }
 0x2b5   : > { %4311 = vmatpush3.bf16.xpose.msra.mxu1 %v989_v8 }
 0x2b6   : > { %4653 = vmatprep.subr.msk.bf16.mxu1 %vm957_vm1, %v948_v7 }
 0x2ba   : > { %v956_v54 = vpop.permute.xlu1 %955 }
 0x2bb   : > { %v954_v13 = vpop.permute.xlu0 %953  ;;  %v1004_v10 = vsel %vm957_vm1, %v956_v54, 0 }
 0x2bc   : > { %v1001_v34 = vsel %vm957_vm1, %v954_v13, 0 }
 0x2bd   : > { %4313 = vmatpush3.bf16.xpose.msra.mxu1 %v992_v14  ;;  %v5806_v14 = vadd.s32 64, %v5693_v42 }
 0x2be   : > { %4654 = vmatprep.subr.msk.bf16.mxu1 %vm957_vm1, %v950_v9  ;;  %v1274_v55 = vpop.permute.xlu1 %1273 }
 0x2bf   : > { %v1272_v22 = vpop.permute.xlu0 %1271  ;;  %7370 = vst [vmem:[#allocation7_spill] sm:$0xff] %v5806_v14  ;;  %vm7334_vm15 = vcmp.gt.s32.totalorder %v5695_v46, %v5806_v14 }
 0x2c0   : > { %4338 = vmatprep.subr.bf16.mxu0 %v1272_v22 }
 0x2c1   : > { %4339 = vmatpush3.bf16.msra.mxu0 %v1272_v22 }
 0x2c2   : > { %4340 = vmatprep.subr.bf16.mxu0 %v1274_v55  ;;  %v1278_v27 = vpop.permute.xlu1 %1277 }
 0x2c3   : > { %v1276_v16 = vpop.permute.xlu0 %1275 }
 0x2c5   : > { %4315 = vmatpush3.bf16.xpose.msra.mxu1 %v995_v26  ;;  %4341 = vmatpush3.bf16.msra.mxu0 %v1274_v55  ;;  %v5825_v26 = vadd.s32 112, %v5693_v42 }
 0x2c6   : > { %4655 = vmatprep.subr.msk.bf16.mxu1 %vm957_vm1, %v952_v43  ;;  %4342 = vmatprep.subr.bf16.mxu0 %v1276_v16  ;;  %v1282_v33 = vpop.permute.xlu1 %1281  ;;  %v5795_v43 = vadd.s32 72, %v5693_v42 }
 0x2c7   : > { %v1280_v0 = vpop.permute.xlu0 %1279  ;;  %7371 = vst [vmem:[#allocation8_spill] sm:$0xff] %v5825_v26  ;;  %vm899_vm0 = vcmp.gt.s32.totalorder %v5695_v46, %v5825_v26 }
 0x2c8   : > { %vm894_vm14 = vcmp.gt.s32.totalorder %v5695_v46, %v5795_v43 }
 0x2c9   : > { %4343 = vmatpush3.bf16.msra.mxu0 %v1276_v16 }
 0x2ca   : > { %4344 = vmatprep.subr.bf16.mxu0 %v1278_v27  ;;  %v1286_v39 = vpop.permute.xlu1 %1285 }
 0x2cb   : > { %v5672_v32 = vpop.permute.xlu0 %1416 }
 0x2cd   : > { %4317 = vmatpush3.bf16.xpose.msra.mxu1 %v998_v30  ;;  %4345 = vmatpush3.bf16.msra.mxu0 %v1278_v27 }
 0x2ce   : > { %4656 = vmatprep.subr.msk.bf16.mxu1 %vm957_vm1, %v954_v13  ;;  %4346 = vmatprep.subr.bf16.mxu0 %v1280_v0 }
 0x2cf   : > { %v1284_v38 = vpop.permute.xlu0 %1283 }
 0x2d1   : > { %4347 = vmatpush3.bf16.msra.mxu0 %v1280_v0 }
 0x2d2   : > { %4348 = vmatprep.subr.bf16.mxu0 %v1282_v33 }
 0x2d5   : > { %4319 = vmatpush3.bf16.xpose.msra.mxu1 %v1001_v34  ;;  %4349 = vmatpush3.bf16.msra.mxu0 %v1282_v33 }
 0x2d6   : > { %4657 = vmatprep.subr.msk.bf16.mxu1 %vm957_vm1, %v956_v54  ;;  %4350 = vmatprep.subr.bf16.mxu0 %v1284_v38 }
 0x2d9   : > { %4351 = vmatpush3.bf16.msra.mxu0 %v1284_v38  ;;  %v5842_v38 = vadd.s32 96, %v5693_v42 }
 0x2da   : > { %4352 = vmatprep.subr.bf16.mxu0 %v1286_v39 }
 0x2db   : > { %7372 = vst [vmem:[#allocation9_spill] sm:$0xff] %v5842_v38 }
 0x2dd   : > { %4321 = vmatpush3.bf16.xpose.msra.mxu1 %v1004_v10  ;;  %4353 = vmatpush3.bf16.msra.mxu0 %v1286_v39 }
 0x2de   : > { %4658 = vmatprep.subr.msk.bf16.mxu0 %vm957_vm1, %v5672_v32 }
 0x2e4   : > { %4323 = vmatmul.mubr.msk.bf16.vlgmr.msra.gmra.mrb[0].mxu1 %vm957_vm1, %v5589_v18 }
 0x2e5   : > { %4326 = vmatprep.mubr.msk.bf16.mxu1 %vm957_vm1, %v5609_v41 }
 0x2ec   : > { %4327 = vmatmul.mubr.msk.bf16.gmra.mrb[4].mxu1 %vm957_vm1, %v5607_v1 }
 0x2ed   : > { %4330 = vmatprep.mubr.msk.bf16.mxu1 %vm957_vm1, %v5625_v53 }
 0x2f4   : > { %4331 = vmatmul.mubr.msk.bf16.gmra.mrb[8].mxu1 %vm957_vm1, %v5623_v29 }
 0x2f5   : > { %4334 = vmatprep.mubr.msk.bf16.mxu1 %vm957_vm1, %v5643_v25 }
 0x2fc   : > { %4335 = vmatmul.mubr.msk.bf16.gmra.mrb[12].mxu1 %vm957_vm1, %v5639_v3 }
 0x3b7   : > { %v4324_v11 = vpop.f32.mrb[0].mxu1 }
 0x3b8   : > { %v1040_v51 = vpop.f32.mrb[1].mxu1  ;;  %v5718_v23 = vsel %vm887_vm4, -inf, %v4324_v11 }
 0x3b9   : > { %1123 = vmax.xlane.f32.xlu0 %v5718_v23  ;;  %v4325_v52 = vpop.f32.mrb[2].mxu1  ;;  %v5740_v35 = vsel %vm885_vm6, -inf, %v1040_v51 }
 0x3ba   : > { %v1043_v57 = vpop.f32.mrb[3].mxu1  ;;  %v5756_v62 = vsel %vm888_vm7, -inf, %v4325_v52  ;;  %v5874_v52 = vpop.permute.xlu1 %1418 }
 0x3bb   : > { %v5731_v17 = vsel %vm886_vm5, -inf, %v1043_v57 }
 0x3bc   : > { %1121 = vmax.xlane.f32.xlu1 %v5731_v17 }
 0x3bd   : > { %1119 = vmax.xlane.f32.xlu0 %v5740_v35 }
 0x3bf   : > { %v4328_v59 = vpop.f32.mrb[4].mxu1 }
 0x3c0   : > { %v1056_v61 = vpop.f32.mrb[5].mxu1  ;;  %v5778_v31 = vsel %vm891_vm9, -inf, %v4328_v59 }
 0x3c1   : > { %1125 = vmax.xlane.f32.xlu0 %v5756_v62  ;;  %v4329_v21 = vpop.f32.mrb[6].mxu1  ;;  %v5800_v54 = vsel %vm889_vm11, -inf, %v1056_v61 }
 0x3c2   : > { %v1059_v4 = vpop.f32.mrb[7].mxu1  ;;  %v5767_v45 = vsel %vm892_vm8, -inf, %v4329_v21 }
 0x3c3   : > { %1133 = vmax.xlane.f32.xlu1 %v5767_v45  ;;  %v5789_v7 = vsel %vm890_vm10, -inf, %v1059_v4 }
 0x3c5   : > { %1131 = vmax.xlane.f32.xlu0 %v5778_v31 }
 0x3c7   : > { %1129 = vmax.xlane.f32.xlu1 %v5789_v7  ;;  %v4332_v8 = vpop.f32.mrb[8].mxu1 }
 0x3c8   : > { %v1072_v9 = vpop.f32.mrb[9].mxu1  ;;  %v5819_v16 = vsel %vm895_vm13, -inf, %v4332_v8 }
 0x3c9   : > { %1127 = vmax.xlane.f32.xlu0 %v5800_v54  ;;  %v4333_v13 = vpop.f32.mrb[10].mxu1  ;;  %v5836_v33 = vsel %vm7334_vm15, -inf, %v1072_v9  ;;  %vm897_vm15 = vcmp.gt.s32.totalorder %v5695_v46, %v5842_v38 }
 0x3ca   : > { %v1075_v22 = vpop.f32.mrb[11].mxu1  ;;  %v5811_v55 = vsel %vm7345_vm12, -inf, %v4333_v13 }
 0x3cb   : > { %1141 = vmax.xlane.f32.xlu1 %v5811_v55  ;;  %v5830_v27 = vsel %vm894_vm14, -inf, %v1075_v22 }
 0x3cd   : > { %1139 = vmax.xlane.f32.xlu0 %v5819_v16 }
 0x3cf   : > { %1137 = vmax.xlane.f32.xlu1 %v5830_v27  ;;  %v4336_v0 = vpop.f32.mrb[12].mxu1 }
 0x3d0   : > { %v1088_v30 = vpop.f32.mrb[13].mxu1  ;;  %v5847_v10 = vsel %vm899_vm0, -inf, %v4336_v0 }
 0x3d1   : > { %1135 = vmax.xlane.f32.xlu0 %v5836_v33  ;;  %v4337_v34 = vpop.f32.mrb[14].mxu1  ;;  %v5855_v36 = vsel %vm897_vm15, -inf, %v1088_v30 }
 0x3d2   : > { %v1091_v39 = vpop.f32.mrb[15].mxu1  ;;  %v5865_v11 = vsel %vm900_vm2, -inf, %v4337_v34 }
 0x3d3   : > { %v5871_v51 = vsel %vm898_vm3, -inf, %v1091_v39 }
 0x3d5   : > { %1147 = vmax.xlane.f32.xlu0 %v5847_v10 }
 0x3d9   : > { %1143 = vmax.xlane.f32.xlu0 %v5855_v36 }
 0x3e0   : > { %1422 = vrot.lane.b32.xlu1 %v5603_v20, %s5248_s29 }
 0x3ef   : > { %1420 = vrot.lane.b32.xlu0 %v5605_v40, %s5248_s29 }
 0x404   : > { %1149 = vmax.xlane.f32.xlu1 %v5865_v11 }
 0x408   : > { %1145 = vmax.xlane.f32.xlu1 %v5871_v51 }
 0x446   : > { %v1124_v57 = vpop.xlane.xlu0 %1123 }
 0x447   : > { %v1153_v59 = vsub.f32 %v5718_v23, %v1124_v57 }
 0x449   : > { %v1171_v61 = vmul.f32 1.442695, %v1153_v59  ;;  %v1122_v21 = vpop.xlane.xlu1 %1121 }
 0x44a   : > { %v1152_v4 = vsub.f32 %v5731_v17, %v1122_v21  ;;  %v1120_v8 = vpop.xlane.xlu0 %1119 }
 0x44b   : > { %4870 = vpow2.f32 %v1171_v61  ;;  %v1151_v9 = vsub.f32 %v5740_v35, %v1120_v8 }
 0x44c   : > { %v1169_v13 = vmul.f32 1.442695, %v1152_v4 }
 0x44d   : > { %v1167_v22 = vmul.f32 1.442695, %v1151_v9 }
 0x44e   : > { %4872 = vpow2.f32 %v1169_v13  ;;  %v1126_v0 = vpop.xlane.xlu0 %1125 }
 0x44f   : > { %4874 = vpow2.f32 %v1167_v22  ;;  %v1154_v30 = vsub.f32 %v5756_v62, %v1126_v0 }
 0x450   : > { %v1134_v59 = vpop.xlane.xlu1 %1133 }
 0x451   : > { %v1173_v34 = vmul.f32 1.442695, %v1154_v30 }
 0x452   : > { %v1132_v57 = vpop.xlane.xlu0 %1131 }
 0x453   : > { %4876 = vpow2.f32 %v1173_v34  ;;  %v1157_v21 = vsub.f32 %v5778_v31, %v1132_v57  ;;  %v1158_v34 = vsub.f32 %v5767_v45, %v1134_v59 }
 0x454   : > { %v1130_v4 = vpop.xlane.xlu1 %1129 }
 0x455   : > { %v5880_v39 = vpop.eup %4870  ;;  %v1179_v9 = vmul.f32 1.442695, %v1157_v21  ;;  %v1156_v22 = vsub.f32 %v5789_v7, %v1130_v4  ;;  %v1181_v26 = vmul.f32 1.442695, %v1158_v34 }
 0x456   : > { %1203 = vadd.xlane.f32.xlu1 %v5880_v39  ;;  %v1128_v62 = vpop.xlane.xlu0 %1127 }
 0x457   : > { %v1155_v13 = vsub.f32 %v5800_v54, %v1128_v62  ;;  %4878 = vpow2.f32 %v1179_v9  ;;  %v1177_v24 = vmul.f32 1.442695, %v1156_v22 }
 0x458   : > { %v5883_v23 = vpop.eup %4872  ;;  %v1142_v0 = vpop.xlane.xlu1 %1141 }
 0x459   : > { %v5885_v17 = vpop.eup %4874  ;;  %1201 = vadd.xlane.f32.xlu0 %v5883_v23  ;;  %v1175_v48 = vmul.f32 1.442695, %v1155_v13  ;;  %v1162_v45 = vsub.f32 %v5811_v55, %v1142_v0 }
 0x45a   : > { %1199 = vadd.xlane.f32.xlu1 %v5885_v17  ;;  %v1140_v61 = vpop.xlane.xlu0 %1139 }
 0x45b   : > { %v1161_v38 = vsub.f32 %v5819_v16, %v1140_v61  ;;  %4880 = vpow2.f32 %v1175_v48  ;;  %v1189_v48 = vmul.f32 1.442695, %v1162_v45 }
 0x45c   : > { %v1138_v14 = vpop.xlane.xlu1 %1137  ;;  %4882 = vpow2.f32 %v1177_v24 }
 0x45d   : > { %v5889_v35 = vpop.eup %4876  ;;  %v1187_v57 = vmul.f32 1.442695, %v1161_v38  ;;  %4884 = vpow2.f32 %v1181_v26 }
 0x45e   : > { %1205 = vadd.xlane.f32.xlu1 %v5889_v35  ;;  %v1136_v8 = vpop.xlane.xlu0 %1135 }
 0x45f   : > { %v1159_v54 = vsub.f32 %v5836_v33, %v1136_v8  ;;  %4886 = vpow2.f32 %v1187_v57  ;;  %v1160_v33 = vsub.f32 %v5830_v27, %v1138_v14 }
 0x460   : > { %v5907_v16 = vpop.permute.xlu1 %1422 }
 0x461   : > { %v1183_v59 = vmul.f32 1.442695, %v1159_v54  ;;  %v5905_v4 = vpop.eup %4878 }
 0x462   : > { %v1148_v30 = vpop.xlane.xlu0 %1147 }
 0x463   : > { %v1165_v31 = vsub.f32 %v5847_v10, %v1148_v30 }
 0x465   : > { %v1195_v7 = vmul.f32 1.442695, %v1165_v31  ;;  %v5911_v26 = vpop.eup %4880 }
 0x466   : > { %v1144_v62 = vpop.xlane.xlu0 %1143  ;;  %v5913_v10 = vpop.eup %4882 }
 0x467   : > { %v1163_v21 = vsub.f32 %v5855_v36, %v1144_v62  ;;  %4888 = vpow2.f32 %v1195_v7  ;;  %v1185_v36 = vmul.f32 1.442695, %v1160_v33  ;;  %v5918_v8 = vpop.eup %4884 }
 0x468   : > { %4890 = vpow2.f32 %v1183_v59 }
 0x469   : > { %v1191_v24 = vmul.f32 1.442695, %v1163_v21  ;;  %v5920_v14 = vpop.eup %4886 }
 0x46a   : > { %v1421_v57 = vpop.permute.xlu0 %1420 }
 0x46b   : > { %4892 = vpow2.f32 %v1191_v24 }
 0x46c   : > { %4894 = vpow2.f32 %v1189_v48 }
 0x46f   : > { %1424 = vrot.lane.b32.xlu0 %v5621_v28, %s5248_s29  ;;  %1426 = vrot.lane.b32.xlu1 %v5619_v44, %s5248_s29 }
 0x471   : > { %v5925_v13 = vpop.eup %4888 }
 0x472   : > { %v5927_v22 = vpop.eup %4890 }
 0x475   : > { %v5931_v0 = vpop.eup %4892 }
 0x476   : > { %v5933_v30 = vpop.eup %4894 }
 0x48e   : > { %1211 = vadd.xlane.f32.xlu0 %v5905_v4 }
 0x491   : > { %v1150_v38 = vpop.xlane.xlu1 %1149 }
 0x492   : > { %v1166_v55 = vsub.f32 %v5865_v11, %v1150_v38  ;;  %1207 = vadd.xlane.f32.xlu0 %v5911_v26 }
 0x493   : > { %1209 = vadd.xlane.f32.xlu1 %v5913_v10 }
 0x494   : > { %v1197_v61 = vmul.f32 1.442695, %v1166_v55 }
 0x495   : > { %v1146_v9 = vpop.xlane.xlu1 %1145 }
 0x496   : > { %4896 = vpow2.f32 %v1197_v61  ;;  %v1164_v27 = vsub.f32 %v5871_v51, %v1146_v9  ;;  %1213 = vadd.xlane.f32.xlu0 %v5918_v8 }
 0x497   : > { %1219 = vadd.xlane.f32.xlu1 %v5920_v14  ;;  %4898 = vpow2.f32 %v1185_v36 }
 0x498   : > { %v1193_v11 = vmul.f32 1.442695, %v1164_v27  ;;  %v1457_v27 = vsel %vm957_vm1, %v5672_v32, 0 }
 0x49a   : > { %1227 = vadd.xlane.f32.xlu0 %v5925_v13  ;;  %4900 = vpow2.f32 %v1193_v11 }
 0x49b   : > { %1215 = vadd.xlane.f32.xlu1 %v5927_v22 }
 0x49e   : > { %1223 = vadd.xlane.f32.xlu0 %v5931_v0 }
 0x49f   : > { %1221 = vadd.xlane.f32.xlu1 %v5933_v30 }
 0x4a0   : > { %v5937_v51 = vpop.eup %4896 }
 0x4a1   : > { %v5939_v34 = vpop.eup %4898 }
 0x4a2   : > { %1229 = vadd.xlane.f32.xlu0 %v5937_v51 }
 0x4a3   : > { %1217 = vadd.xlane.f32.xlu1 %v5939_v34 }
 0x4a4   : > { %v5943_v31 = vpop.eup %4900 }
 0x4a7   : > { %1225 = vadd.xlane.f32.xlu1 %v5943_v31 }
 0x4b8   : > { %1430 = vrot.lane.b32.xlu1 %v5635_v63, %s5248_s29  ;;  %1428 = vrot.lane.b32.xlu0 %v5637_v2, %s5248_s29 }
 0x4bc   : > { %1402 = vrot.lane.b32.xlu1 %v5589_v18, %s5249_s14  ;;  %1400 = vrot.lane.b32.xlu0 %v5593_v19, %s5249_s14 }
 0x4c0   : > { %1406 = vrot.lane.b32.xlu1 %v5607_v1, %s5249_s14  ;;  %1404 = vrot.lane.b32.xlu0 %v5609_v41, %s5249_s14 }
 0x4c4   : > { %1410 = vrot.lane.b32.xlu1 %v5623_v29, %s5249_s14  ;;  %1408 = vrot.lane.b32.xlu0 %v5625_v53, %s5249_s14 }
 0x4c8   : > { %1414 = vrot.lane.b32.xlu1 %v5639_v3, %s5249_s14  ;;  %1412 = vrot.lane.b32.xlu0 %v5643_v25, %s5249_s14 }
 0x4cc   : > { %1747 = vrot.lane.b32.xlu1 %v5585_v12, %s5250_s15  ;;  %1745 = vrot.lane.b32.xlu0 %v5587_v15, %s5250_s15 }
 0x4d0   : > { %1751 = vrot.lane.b32.xlu1 %v5603_v20, %s5250_s15  ;;  %1749 = vrot.lane.b32.xlu0 %v5605_v40, %s5250_s15 }
 0x4d4   : > { %1755 = vrot.lane.b32.xlu1 %v5619_v44, %s5250_s15  ;;  %1753 = vrot.lane.b32.xlu0 %v5621_v28, %s5250_s15 }
 0x4d8   : > { %1759 = vrot.lane.b32.xlu1 %v5635_v63, %s5250_s15  ;;  %1757 = vrot.lane.b32.xlu0 %v5637_v2, %s5250_s15  ;;  %s5259_s15 = smov 24  }
 0x4dc   : > { %1884 = vrot.lane.b32.xlu1 %v5585_v12, %s5251_s16  ;;  %1882 = vrot.lane.b32.xlu0 %v5587_v15, %s5251_s16 }
 0x4e3   : > { %v1204_v54 = vpop.xlane.xlu1 %1203 }
 0x4e6   : > { %v1202_v62 = vpop.xlane.xlu0 %1201 }
 0x4e7   : > { %4902 = vrcp.f32 %v1202_v62  ;;  %v1200_v7 = vpop.xlane.xlu1 %1199 }
 0x4e8   : > { %4904 = vrcp.f32 %v1200_v7 }
 0x4e9   : > { %4906 = vrcp.f32 %v1204_v54 }
 0x4ea   : > { %v1425_v32 = vpop.permute.xlu0 %1424 }
 0x4eb   : > { %v1206_v21 = vpop.xlane.xlu1 %1205 }
 0x4ec   : > { %4908 = vrcp.f32 %v1206_v21 }
 0x4f1   : > { %v4903_v45 = vpop.eup %4902 }
 0x4f2   : > { %v4905_v59 = vpop.eup %4904  ;;  %v1248_v24 = vmul.f32 %v4903_v45, %v5883_v23  ;;  %v1460_v23 = vsel %vm957_vm1, %v5874_v52, 0 }
 0x4f3   : > { %v1247_v48 = vmul.f32 %v4905_v59, %v5885_v17  ;;  %v4907_v33 = vpop.eup %4906  ;;  %v1466_v17 = vsel %vm957_vm1, %v5907_v16, 0 }
 0x4f4   : > { %v1249_v36 = vmul.f32 %v4907_v33, %v5880_v39  ;;  %v1463_v39 = vsel %vm957_vm1, %v1421_v57, 0 }
 0x4f5   : > { %v1263_v38 = vpack.c.bf16 %v1248_v24, %v1247_v48 }
 0x4f6   : > { %v4909_v55 = vpop.eup %4908 }
 0x4f7   : > { %v1250_v61 = vmul.f32 %v4909_v55, %v5889_v35  ;;  %4354 = vmatprep.mubr.bf16.mxu0 %v1263_v38  ;;  %v1469_v35 = vsel %vm957_vm1, %v1425_v32, 0 }
 0x4f9   : > { %v1264_v9 = vpack.c.bf16 %v1250_v61, %v1249_v36 }
 0x4fb   : > { %4355 = vmatmul.mubr.bf16.vlgmr.msra.gmra.mrb[16].mxu0 %v1264_v9 }
 0x4fc   : > { %4371 = vmatpush3.bf16.xpose.msra.mxu0 %v1457_v27 }
 0x4fd   : > { %4659 = vmatprep.subr.msk.bf16.mxu0 %vm957_vm1, %v5874_v52  ;;  %v1427_v52 = vpop.permute.xlu1 %1426 }
 0x4fe   : > { %v1472_v62 = vsel %vm957_vm1, %v1427_v52, 0 }
 0x504   : > { %4373 = vmatpush3.bf16.xpose.msra.mxu0 %v1460_v23 }
 0x505   : > { %4660 = vmatprep.subr.msk.bf16.mxu0 %vm957_vm1, %v1421_v57 }
 0x50c   : > { %4375 = vmatpush3.bf16.xpose.msra.mxu0 %v1463_v39 }
 0x50d   : > { %4661 = vmatprep.subr.msk.bf16.mxu0 %vm957_vm1, %v5907_v16 }
 0x514   : > { %4377 = vmatpush3.bf16.xpose.msra.mxu0 %v1466_v17 }
 0x515   : > { %4662 = vmatprep.subr.msk.bf16.mxu0 %vm957_vm1, %v1425_v32 }
 0x51b   : > { %v1212_v11 = vpop.xlane.xlu0 %1211 }
 0x51c   : > { %4379 = vmatpush3.bf16.xpose.msra.mxu0 %v1469_v35 }
 0x51d   : > { %4663 = vmatprep.subr.msk.bf16.mxu0 %vm957_vm1, %v1427_v52 }
 0x51f   : > { %v1208_v54 = vpop.xlane.xlu0 %1207 }
 0x520   : > { %4910 = vrcp.f32 %v1208_v54  ;;  %v1210_v57 = vpop.xlane.xlu1 %1209 }
 0x521   : > { %4912 = vrcp.f32 %v1210_v57 }
 0x522   : > { %4914 = vrcp.f32 %v1212_v11 }
 0x523   : > { %v1214_v7 = vpop.xlane.xlu0 %1213 }
 0x524   : > { %4381 = vmatpush3.bf16.xpose.msra.mxu0 %v1472_v62  ;;  %4916 = vrcp.f32 %v1214_v7  ;;  %v1220_v16 = vpop.xlane.xlu1 %1219 }
 0x527   : > { %v1228_v21 = vpop.xlane.xlu0 %1227 }
 0x528   : > { %v1216_v45 = vpop.xlane.xlu1 %1215 }
 0x52a   : > { %v4911_v59 = vpop.eup %4910 }
 0x52b   : > { %v4913_v24 = vpop.eup %4912  ;;  %v1224_v48 = vpop.xlane.xlu0 %1223  ;;  %v1251_v33 = vmul.f32 %v4911_v59, %v5911_v26 }
 0x52c   : > { %v4915_v38 = vpop.eup %4914  ;;  %v1222_v55 = vpop.xlane.xlu1 %1221  ;;  %v1252_v36 = vmul.f32 %v4913_v24, %v5913_v10 }
 0x52d   : > { %4918 = vrcp.f32 %v1222_v55  ;;  %v1253_v23 = vmul.f32 %v4915_v38, %v5905_v4 }
 0x52e   : > { %v4917_v61 = vpop.eup %4916  ;;  %v1265_v9 = vpack.c.bf16 %v1252_v36, %v1251_v33  ;;  %4920 = vrcp.f32 %v1216_v45 }
 0x52f   : > { %v1230_v27 = vpop.xlane.xlu0 %1229  ;;  %v1254_v39 = vmul.f32 %v4917_v61, %v5918_v8  ;;  %4922 = vrcp.f32 %v1220_v16 }
 0x530   : > { %v1218_v17 = vpop.xlane.xlu1 %1217  ;;  %4358 = vmatprep.mubr.bf16.mxu0 %v1265_v9 }
 0x531   : > { %4924 = vrcp.f32 %v1218_v17  ;;  %v1266_v32 = vpack.c.bf16 %v1254_v39, %v1253_v23 }
 0x532   : > { %4926 = vrcp.f32 %v1224_v48 }
 0x533   : > { %4359 = vmatmul.mubr.bf16.gmra.mrb[20].mxu0 %v1266_v32  ;;  %v1429_v26 = vpop.permute.xlu0 %1428 }
 0x534   : > { %v1226_v35 = vpop.xlane.xlu1 %1225  ;;  %4664 = vmatprep.subr.msk.bf16.mxu0 %vm957_vm1, %v1429_v26  ;;  %v1475_v10 = vsel %vm957_vm1, %v1429_v26, 0 }
 0x535   : > { %4928 = vrcp.f32 %v1226_v35  ;;  %4383 = vmatpush3.bf16.xpose.msra.mxu0 %v1475_v10 }
 0x536   : > { %4930 = vrcp.f32 %v1230_v27 }
 0x537   : > { %v1401_v11 = vpop.permute.xlu0 %1400  ;;  %v4919_v4 = vpop.eup %4918  ;;  %4932 = vrcp.f32 %v1228_v21 }
 0x538   : > { %v1431_v8 = vpop.permute.xlu1 %1430  ;;  %v4921_v52 = vpop.eup %4920  ;;  %v1258_v7 = vmul.f32 %v4919_v4, %v5933_v30 }
 0x539   : > { %4665 = vmatprep.subr.msk.bf16.mxu0 %vm957_vm1, %v1431_v8  ;;  %v4923_v54 = vpop.eup %4922  ;;  %v1478_v45 = vsel %vm957_vm1, %v1431_v8, 0  ;;  %v1255_v59 = vmul.f32 %v4921_v52, %v5927_v22 }
 0x53a   : > { %v1257_v21 = vmul.f32 %v4923_v54, %v5920_v14 }
 0x53b   : > { %v4925_v57 = vpop.eup %4924  ;;  %v1405_v62 = vpop.permute.xlu0 %1404 }
 0x53c   : > { %v1403_v16 = vpop.permute.xlu1 %1402  ;;  %v1256_v24 = vmul.f32 %v4925_v57, %v5939_v34  ;;  %v4927_v48 = vpop.eup %4926  ;;  %v1268_v36 = vpack.c.bf16 %v1258_v7, %v1257_v21 }
 0x53d   : > { %4385 = vmatpush3.bf16.xpose.msra.mxu0 %v1478_v45  ;;  %v1259_v30 = vmul.f32 %v4927_v48, %v5931_v0 }
 0x53e   : > { %v1267_v33 = vpack.c.bf16 %v1256_v24, %v1255_v59 }
 0x53f   : > { %v4929_v38 = vpop.eup %4928  ;;  %v1409_v55 = vpop.permute.xlu0 %1408 }
 0x540   : > { %v4931_v61 = vpop.eup %4930  ;;  %v1407_v9 = vpop.permute.xlu1 %1406  ;;  %4362 = vmatprep.mubr.bf16.mxu0 %v1267_v33  ;;  %v1260_v27 = vmul.f32 %v4929_v38, %v5943_v31 }
 0x541   : > { %4363 = vmatmul.mubr.bf16.gmra.mrb[24].mxu0 %v1268_v36  ;;  %v4933_v23 = vpop.eup %4932  ;;  %v1262_v34 = vmul.f32 %v4931_v61, %v5937_v51 }
 0x542   : > { %v1269_v22 = vpack.c.bf16 %v1260_v27, %v1259_v30  ;;  %v1261_v14 = vmul.f32 %v4933_v23, %v5925_v13 }
 0x543   : > { %v1413_v39 = vpop.permute.xlu0 %1412 }
 0x544   : > { %v1411_v17 = vpop.permute.xlu1 %1410  ;;  %4366 = vmatprep.mubr.bf16.mxu0 %v1269_v22  ;;  %v1270_v26 = vpack.c.bf16 %v1262_v34, %v1261_v14 }
 0x547   : > { %v1746_v32 = vpop.permute.xlu0 %1745 }
 0x548   : > { %v1415_v35 = vpop.permute.xlu1 %1414  ;;  %4402 = vmatprep.subr.bf16.mxu1 %v1746_v32 }
 0x549   : > { %4367 = vmatmul.mubr.bf16.gmra.mrb[28].mxu0 %v1270_v26  ;;  %4403 = vmatpush3.bf16.msra.mxu1 %v1746_v32 }
 0x54a   : > { %4386 = vmatprep.mubr.msk.bf16.mxu0 %vm957_vm1, %v1401_v11 }
 0x54b   : > { %v1750_v31 = vpop.permute.xlu0 %1749 }
 0x54c   : > { %v1748_v0 = vpop.permute.xlu1 %1747 }
 0x54d   : > { %4404 = vmatprep.subr.bf16.mxu1 %v1748_v0 }
 0x54e   : > { %4405 = vmatpush3.bf16.msra.mxu1 %v1748_v0 }
 0x54f   : > { %4406 = vmatprep.subr.bf16.mxu1 %v1750_v31  ;;  %v1754_v13 = vpop.permute.xlu0 %1753 }
 0x550   : > { %v1752_v51 = vpop.permute.xlu1 %1751 }
 0x551   : > { %4387 = vmatmul.mubr.msk.bf16.vlgmr.msra.gmra.mrb[32].mxu0 %vm957_vm1, %v1403_v16 }
 0x552   : > { %4390 = vmatprep.mubr.msk.bf16.mxu0 %vm957_vm1, %v1405_v62  ;;  %4407 = vmatpush3.bf16.msra.mxu1 %v1750_v31 }
 0x553   : > { %4408 = vmatprep.subr.bf16.mxu1 %v1752_v51  ;;  %v1758_v11 = vpop.permute.xlu0 %1757 }
 0x554   : > { %v1756_v10 = vpop.permute.xlu1 %1755 }
 0x556   : > { %4409 = vmatpush3.bf16.msra.mxu1 %v1752_v51 }
 0x557   : > { %4410 = vmatprep.subr.bf16.mxu1 %v1754_v13  ;;  %v6013_v8 = vpop.permute.xlu0 %1882 }
 0x558   : > { %v1760_v4 = vpop.permute.xlu1 %1759 }
 0x559   : > { %4391 = vmatmul.mubr.msk.bf16.gmra.mrb[36].mxu0 %vm957_vm1, %v1407_v9 }
 0x55a   : > { %4394 = vmatprep.mubr.msk.bf16.mxu0 %vm957_vm1, %v1409_v55  ;;  %4411 = vmatpush3.bf16.msra.mxu1 %v1754_v13 }
 0x55b   : > { %4412 = vmatprep.subr.bf16.mxu1 %v1756_v10 }
 0x55e   : > { %4413 = vmatpush3.bf16.msra.mxu1 %v1756_v10 }
 0x55f   : > { %4414 = vmatprep.subr.bf16.mxu1 %v1758_v11 }
 0x561   : > { %4395 = vmatmul.mubr.msk.bf16.gmra.mrb[40].mxu0 %vm957_vm1, %v1411_v17 }
 0x562   : > { %4398 = vmatprep.mubr.msk.bf16.mxu0 %vm957_vm1, %v1413_v39  ;;  %4415 = vmatpush3.bf16.msra.mxu1 %v1758_v11 }
 0x563   : > { %4416 = vmatprep.subr.bf16.mxu1 %v1760_v4 }
 0x566   : > { %4417 = vmatpush3.bf16.msra.mxu1 %v1760_v4 }
 0x567   : > { %4666 = vmatprep.subr.msk.bf16.mxu1 %vm957_vm1, %v6013_v8 }
 0x569   : > { %4399 = vmatmul.mubr.msk.bf16.gmra.mrb[44].mxu0 %vm957_vm1, %v1415_v35 }
 0x5ce   : > { %v6018_v52 = vpop.f32.mrb[16].mxu0 }
 0x5cf   : > { %7373 = vst [vmem:[#allocation10_spill] sm:$0xff] %v6018_v52  ;;  %v6020_v54 = vpop.f32.mrb[17].mxu0 }
 0x5d0   : > { %7374 = vst [vmem:[#allocation11_spill] sm:$0xff] %v6020_v54  ;;  %v6022_v57 = vpop.f32.mrb[18].mxu0 }
 0x5d1   : > { %7375 = vst [vmem:[#allocation12_spill] sm:$0xff] %v6022_v57  ;;  %v6024_v62 = vpop.f32.mrb[19].mxu0 }
 0x5d2   : > { %7376 = vst [vmem:[#allocation13_spill] sm:$0xff] %v6024_v62 }
 0x606   : > { %v6026_v7 = vpop.f32.mrb[20].mxu0 }
 0x607   : > { %7377 = vst [vmem:[#allocation14_spill] sm:$0xff] %v6026_v7  ;;  %v6028_v16 = vpop.f32.mrb[21].mxu0 }
 0x608   : > { %7378 = vst [vmem:[#allocation15_spill] sm:$0xff] %v6028_v16  ;;  %v6030_v45 = vpop.f32.mrb[22].mxu0 }
 0x609   : > { %7379 = vst [vmem:[#allocation16_spill] sm:$0xff] %v6030_v45  ;;  %v6032_v59 = vpop.f32.mrb[23].mxu0 }
 0x60a   : > { %7380 = vst [vmem:[#allocation17_spill] sm:$0xff] %v6032_v59 }
 0x614   : > { %v6034_v24 = vpop.f32.mrb[24].mxu0 }
 0x615   : > { %7381 = vst [vmem:[#allocation18_spill] sm:$0xff] %v6034_v24  ;;  %v6036_v48 = vpop.f32.mrb[25].mxu0 }
 0x616   : > { %7382 = vst [vmem:[#allocation19_spill] sm:$0xff] %v6036_v48  ;;  %v6038_v21 = vpop.f32.mrb[26].mxu0  ;;  %v6138_v48 = vpop.permute.xlu1 %1884 }
 0x617   : > { %7383 = vst [vmem:[#allocation20_spill] sm:$0xff] %v6038_v21  ;;  %v6040_v33 = vpop.f32.mrb[27].mxu0 }
 0x618   : > { %7384 = vst [vmem:[#allocation21_spill] sm:$0xff] %v6040_v33 }
 0x61c   : > { %v6042_v38 = vpop.f32.mrb[28].mxu0 }
 0x61d   : > { %7385 = vst [vmem:[#allocation22_spill] sm:$0xff] %v6042_v38  ;;  %v6044_v55 = vpop.f32.mrb[29].mxu0 }
 0x61e   : > { %7386 = vst [vmem:[#allocation23_spill] sm:$0xff] %v6044_v55  ;;  %v6046_v36 = vpop.f32.mrb[30].mxu0 }
 0x61f   : > { %7387 = vst [vmem:[#allocation24_spill] sm:$0xff] %v6046_v36  ;;  %v6048_v61 = vpop.f32.mrb[31].mxu0 }
 0x620   : > { %7388 = vst [vmem:[#allocation25_spill] sm:$0xff] %v6048_v61 }
 0x624   : > { %v4388_v9 = vpop.f32.mrb[32].mxu0 }
 0x625   : > { %v1579_v30 = vsel %vm887_vm4, -inf, %v4388_v9  ;;  %v1514_v27 = vpop.f32.mrb[33].mxu0 }
 0x626   : > { %1597 = vmax.xlane.f32.xlu0 %v1579_v30  ;;  %v4389_v23 = vpop.f32.mrb[34].mxu0  ;;  %v1577_v34 = vsel %vm885_vm6, -inf, %v1514_v27 }
 0x627   : > { %v1517_v22 = vpop.f32.mrb[35].mxu0  ;;  %v1580_v14 = vsel %vm888_vm7, -inf, %v4389_v23 }
 0x628   : > { %v1578_v39 = vsel %vm886_vm5, -inf, %v1517_v22 }
 0x629   : > { %1595 = vmax.xlane.f32.xlu1 %v1578_v39 }
 0x62a   : > { %1593 = vmax.xlane.f32.xlu0 %v1577_v34 }
 0x62c   : > { %v4392_v17 = vpop.f32.mrb[36].mxu0 }
 0x62d   : > { %v1530_v32 = vpop.f32.mrb[37].mxu0  ;;  %v6071_v31 = vsel %vm891_vm9, -inf, %v4392_v17 }
 0x62e   : > { %1599 = vmax.xlane.f32.xlu0 %v1580_v14  ;;  %v4393_v26 = vpop.f32.mrb[38].mxu0  ;;  %v6083_v10 = vsel %vm889_vm11, -inf, %v1530_v32  ;;  %v7389_v32 = vld [vmem:[#allocation7_spill] sm:$0xff] }
 0x62f   : > { %v6065_v35 = vsel %vm892_vm8, -inf, %v4393_v26  ;;  %v1533_v0 = vpop.f32.mrb[39].mxu0 }
 0x630   : > { %1607 = vmax.xlane.f32.xlu1 %v6065_v35  ;;  %v6077_v51 = vsel %vm890_vm10, -inf, %v1533_v0 }
 0x632   : > { %1605 = vmax.xlane.f32.xlu0 %v6071_v31 }
 0x634   : > { %1603 = vmax.xlane.f32.xlu1 %v6077_v51  ;;  %v4396_v13 = vpop.f32.mrb[40].mxu0 }
 0x635   : > { %v1546_v11 = vpop.f32.mrb[41].mxu0  ;;  %v6095_v23 = vsel %vm895_vm13, -inf, %v4396_v13 }
 0x636   : > { %1601 = vmax.xlane.f32.xlu0 %v6083_v10  ;;  %v4397_v4 = vpop.f32.mrb[42].mxu0 }
 0x637   : > { %v6089_v9 = vsel %vm7345_vm12, -inf, %v4397_v4  ;;  %v1549_v27 = vpop.f32.mrb[43].mxu0  ;;  %vm7390_vm12 = vcmp.gt.s32.totalorder %v5695_v46, %v7389_v32 }
 0x638   : > { %1615 = vmax.xlane.f32.xlu1 %v6089_v9  ;;  %v6101_v22 = vsel %vm894_vm14, -inf, %v1549_v27  ;;  %v6107_v26 = vsel %vm7390_vm12, -inf, %v1546_v11  ;;  %vm7411_vm12 = vcmp.gt.s32.totalorder %v5695_v46, %v5773_v5 }
 0x63a   : > { %1613 = vmax.xlane.f32.xlu0 %v6095_v23 }
 0x63c   : > { %1611 = vmax.xlane.f32.xlu1 %v6101_v22  ;;  %v4400_v17 = vpop.f32.mrb[44].mxu0 }
 0x63d   : > { %v1562_v0 = vpop.f32.mrb[45].mxu0  ;;  %v6113_v61 = vsel %vm899_vm0, -inf, %v4400_v17 }
 0x63e   : > { %1609 = vmax.xlane.f32.xlu0 %v6107_v26  ;;  %v4401_v13 = vpop.f32.mrb[46].mxu0  ;;  %v6119_v38 = vsel %vm897_vm15, -inf, %v1562_v0 }
 0x63f   : > { %v1565_v4 = vpop.f32.mrb[47].mxu0  ;;  %v6129_v17 = vsel %vm900_vm2, -inf, %v4401_v13 }
 0x640   : > { %v6135_v0 = vsel %vm898_vm3, -inf, %v1565_v4 }
 0x642   : > { %1621 = vmax.xlane.f32.xlu0 %v6113_v61 }
 0x646   : > { %1617 = vmax.xlane.f32.xlu0 %v6119_v38 }
 0x64d   : > { %1888 = vrot.lane.b32.xlu1 %v5603_v20, %s5251_s16 }
 0x65c   : > { %1886 = vrot.lane.b32.xlu0 %v5605_v40, %s5251_s16 }
 0x671   : > { %1623 = vmax.xlane.f32.xlu1 %v6129_v17 }
 0x675   : > { %1619 = vmax.xlane.f32.xlu1 %v6135_v0 }
 0x6b3   : > { %v1598_v33 = vpop.xlane.xlu0 %1597 }
 0x6b4   : > { %v1627_v24 = vsub.f32 %v1579_v30, %v1598_v33 }
 0x6b6   : > { %v1645_v21 = vmul.f32 1.442695, %v1627_v24  ;;  %v1596_v16 = vpop.xlane.xlu1 %1595 }
 0x6b7   : > { %v1626_v59 = vsub.f32 %v1578_v39, %v1596_v16  ;;  %v1594_v45 = vpop.xlane.xlu0 %1593 }
 0x6b8   : > { %4934 = vpow2.f32 %v1645_v21  ;;  %v1625_v13 = vsub.f32 %v1577_v34, %v1594_v45 }
 0x6b9   : > { %v1643_v7 = vmul.f32 1.442695, %v1626_v59 }
 0x6ba   : > { %v1641_v54 = vmul.f32 1.442695, %v1625_v13 }
 0x6bb   : > { %4936 = vpow2.f32 %v1643_v7  ;;  %v1600_v62 = vpop.xlane.xlu0 %1599 }
 0x6bc   : > { %4938 = vpow2.f32 %v1641_v54  ;;  %v1628_v52 = vsub.f32 %v1580_v14, %v1600_v62 }
 0x6bd   : > { %v1608_v62 = vpop.xlane.xlu1 %1607 }
 0x6be   : > { %v1647_v4 = vmul.f32 1.442695, %v1628_v52  ;;  %v1632_v13 = vsub.f32 %v6065_v35, %v1608_v62 }
 0x6bf   : > { %v1606_v54 = vpop.xlane.xlu0 %1605 }
 0x6c0   : > { %4940 = vpow2.f32 %v1647_v4  ;;  %v1631_v45 = vsub.f32 %v6071_v31, %v1606_v54  ;;  %v1655_v55 = vmul.f32 1.442695, %v1632_v13 }
 0x6c1   : > { %v1604_v59 = vpop.xlane.xlu1 %1603 }
 0x6c2   : > { %v6140_v57 = vpop.eup %4934  ;;  %v1653_v33 = vmul.f32 1.442695, %v1631_v45  ;;  %v1630_v39 = vsub.f32 %v6077_v51, %v1604_v59 }
 0x6c3   : > { %1677 = vadd.xlane.f32.xlu1 %v6140_v57  ;;  %v1602_v52 = vpop.xlane.xlu0 %1601 }
 0x6c4   : > { %v1629_v30 = vsub.f32 %v6083_v10, %v1602_v52  ;;  %4942 = vpow2.f32 %v1653_v33  ;;  %v1651_v11 = vmul.f32 1.442695, %v1630_v39 }
 0x6c5   : > { %v6143_v36 = vpop.eup %4936  ;;  %v1616_v34 = vpop.xlane.xlu1 %1615 }
 0x6c6   : > { %v6145_v24 = vpop.eup %4938  ;;  %1675 = vadd.xlane.f32.xlu0 %v6143_v36  ;;  %v1649_v4 = vmul.f32 1.442695, %v1629_v30  ;;  %v1636_v35 = vsub.f32 %v6089_v9, %v1616_v34 }
 0x6c7   : > { %1673 = vadd.xlane.f32.xlu1 %v6145_v24  ;;  %v1614_v7 = vpop.xlane.xlu0 %1613 }
 0x6c8   : > { %v1635_v27 = vsub.f32 %v6095_v23, %v1614_v7  ;;  %4944 = vpow2.f32 %v1649_v4 }
 0x6c9   : > { %v1612_v32 = vpop.xlane.xlu1 %1611  ;;  %4946 = vpow2.f32 %v1651_v11 }
 0x6ca   : > { %v6149_v16 = vpop.eup %4940  ;;  %v1661_v54 = vmul.f32 1.442695, %v1635_v27  ;;  %4948 = vpow2.f32 %v1655_v55  ;;  %v1663_v27 = vmul.f32 1.442695, %v1636_v35 }
 0x6cb   : > { %1679 = vadd.xlane.f32.xlu1 %v6149_v16  ;;  %v1610_v21 = vpop.xlane.xlu0 %1609 }
 0x6cc   : > { %v1633_v10 = vsub.f32 %v6107_v26, %v1610_v21  ;;  %4950 = vpow2.f32 %v1661_v54  ;;  %v1634_v26 = vsub.f32 %v6101_v22, %v1612_v32 }
 0x6cd   : > { %v6167_v23 = vpop.permute.xlu1 %1888 }
 0x6ce   : > { %v1657_v62 = vmul.f32 1.442695, %v1633_v10  ;;  %v6165_v59 = vpop.eup %4942  ;;  %v1659_v7 = vmul.f32 1.442695, %v1634_v26 }
 0x6cf   : > { %v1622_v14 = vpop.xlane.xlu0 %1621 }
 0x6d0   : > { %v1639_v31 = vsub.f32 %v6113_v61, %v1622_v14 }
 0x6d2   : > { %v1669_v51 = vmul.f32 1.442695, %v1639_v31  ;;  %v6171_v55 = vpop.eup %4944 }
 0x6d3   : > { %v1618_v52 = vpop.xlane.xlu0 %1617 }
 0x6d4   : > { %v1637_v45 = vsub.f32 %v6119_v38, %v1618_v52  ;;  %4952 = vpow2.f32 %v1669_v51  ;;  %v6173_v38 = vpop.eup %4946 }
 0x6d5   : > { %4954 = vpow2.f32 %v1657_v62  ;;  %v6178_v33 = vpop.eup %4948 }
 0x6d6   : > { %v1665_v61 = vmul.f32 1.442695, %v1637_v45  ;;  %v6180_v22 = vpop.eup %4950 }
 0x6d7   : > { %v1887_v54 = vpop.permute.xlu0 %1886 }
 0x6d8   : > { %4956 = vpow2.f32 %v1665_v61 }
 0x6d9   : > { %4958 = vpow2.f32 %v1663_v27 }
 0x6dc   : > { %1890 = vrot.lane.b32.xlu0 %v5621_v28, %s5251_s16  ;;  %1892 = vrot.lane.b32.xlu1 %v5619_v44, %s5251_s16 }
 0x6de   : > { %v6185_v39 = vpop.eup %4952 }
 0x6df   : > { %v6187_v34 = vpop.eup %4954 }
 0x6e2   : > { %v6191_v14 = vpop.eup %4956 }
 0x6e3   : > { %v6193_v13 = vpop.eup %4958 }
 0x6fb   : > { %1685 = vadd.xlane.f32.xlu0 %v6165_v59 }
 0x6fe   : > { %v1624_v11 = vpop.xlane.xlu1 %1623 }
 0x6ff   : > { %v1640_v9 = vsub.f32 %v6129_v17, %v1624_v11  ;;  %1681 = vadd.xlane.f32.xlu0 %v6171_v55 }
 0x700   : > { %1683 = vadd.xlane.f32.xlu1 %v6173_v38 }
 0x701   : > { %v1671_v21 = vmul.f32 1.442695, %v1640_v9 }
 0x702   : > { %v1620_v30 = vpop.xlane.xlu1 %1619 }
 0x703   : > { %4960 = vpow2.f32 %v1671_v21  ;;  %v1638_v32 = vsub.f32 %v6135_v0, %v1620_v30  ;;  %1687 = vadd.xlane.f32.xlu0 %v6178_v33 }
 0x704   : > { %1693 = vadd.xlane.f32.xlu1 %v6180_v22  ;;  %4962 = vpow2.f32 %v1659_v7 }
 0x705   : > { %v1667_v17 = vmul.f32 1.442695, %v1638_v32  ;;  %v1923_v32 = vsel %vm957_vm1, %v6013_v8, 0 }
 0x707   : > { %1701 = vadd.xlane.f32.xlu0 %v6185_v39  ;;  %4964 = vpow2.f32 %v1667_v17 }
 0x708   : > { %1689 = vadd.xlane.f32.xlu1 %v6187_v34 }
 0x70b   : > { %1697 = vadd.xlane.f32.xlu0 %v6191_v14 }
 0x70c   : > { %1695 = vadd.xlane.f32.xlu1 %v6193_v13 }
 0x70d   : > { %v6197_v0 = vpop.eup %4960 }
 0x70e   : > { %v6199_v4 = vpop.eup %4962 }
 0x70f   : > { %1703 = vadd.xlane.f32.xlu0 %v6197_v0 }
 0x710   : > { %1691 = vadd.xlane.f32.xlu1 %v6199_v4 }
 0x711   : > { %v6203_v31 = vpop.eup %4964 }
 0x714   : > { %1699 = vadd.xlane.f32.xlu1 %v6203_v31 }
 0x725   : > { %1896 = vrot.lane.b32.xlu1 %v5635_v63, %s5251_s16  ;;  %1894 = vrot.lane.b32.xlu0 %v5637_v2, %s5251_s16 }
 0x729   : > { %1868 = vrot.lane.b32.xlu1 %v5589_v18, %s5252_s17  ;;  %1866 = vrot.lane.b32.xlu0 %v5593_v19, %s5252_s17 }
 0x72d   : > { %1872 = vrot.lane.b32.xlu1 %v5607_v1, %s5252_s17  ;;  %1870 = vrot.lane.b32.xlu0 %v5609_v41, %s5252_s17 }
 0x731   : > { %1876 = vrot.lane.b32.xlu1 %v5623_v29, %s5252_s17  ;;  %1874 = vrot.lane.b32.xlu0 %v5625_v53, %s5252_s17 }
 0x735   : > { %1880 = vrot.lane.b32.xlu1 %v5639_v3, %s5252_s17  ;;  %1878 = vrot.lane.b32.xlu0 %v5643_v25, %s5252_s17 }
 0x739   : > { %2213 = vrot.lane.b32.xlu1 %v5585_v12, %s5253_s18  ;;  %2211 = vrot.lane.b32.xlu0 %v5587_v15, %s5253_s18 }
 0x73d   : > { %2217 = vrot.lane.b32.xlu1 %v5603_v20, %s5253_s18  ;;  %2215 = vrot.lane.b32.xlu0 %v5605_v40, %s5253_s18 }
 0x741   : > { %2221 = vrot.lane.b32.xlu1 %v5619_v44, %s5253_s18  ;;  %2219 = vrot.lane.b32.xlu0 %v5621_v28, %s5253_s18 }
 0x745   : > { %2225 = vrot.lane.b32.xlu1 %v5635_v63, %s5253_s18  ;;  %2223 = vrot.lane.b32.xlu0 %v5637_v2, %s5253_s18 }
 0x749   : > { %2350 = vrot.lane.b32.xlu1 %v5585_v12, %s5254_s19  ;;  %2348 = vrot.lane.b32.xlu0 %v5587_v15, %s5254_s19 }
 0x750   : > { %v1678_v10 = vpop.xlane.xlu1 %1677 }
 0x753   : > { %v1676_v52 = vpop.xlane.xlu0 %1675 }
 0x754   : > { %4966 = vrcp.f32 %v1676_v52  ;;  %v1674_v51 = vpop.xlane.xlu1 %1673 }
 0x755   : > { %4968 = vrcp.f32 %v1674_v51 }
 0x756   : > { %4970 = vrcp.f32 %v1678_v10 }
 0x757   : > { %v1891_v8 = vpop.permute.xlu0 %1890 }
 0x758   : > { %v1680_v45 = vpop.xlane.xlu1 %1679 }
 0x759   : > { %4972 = vrcp.f32 %v1680_v45 }
 0x75e   : > { %v4967_v35 = vpop.eup %4966 }
 0x75f   : > { %v4969_v62 = vpop.eup %4968  ;;  %v1722_v61 = vmul.f32 %v4967_v35, %v6143_v36  ;;  %v1926_v36 = vsel %vm957_vm1, %v6138_v48, 0 }
 0x760   : > { %v1721_v27 = vmul.f32 %v4969_v62, %v6145_v24  ;;  %v4971_v26 = vpop.eup %4970  ;;  %v1932_v24 = vsel %vm957_vm1, %v6167_v23, 0 }
 0x761   : > { %v1723_v7 = vmul.f32 %v4971_v26, %v6140_v57  ;;  %v1929_v57 = vsel %vm957_vm1, %v1887_v54, 0 }
 0x762   : > { %v1737_v11 = vpack.c.bf16 %v1722_v61, %v1721_v27 }
 0x763   : > { %v4973_v9 = vpop.eup %4972 }
 0x764   : > { %v1724_v21 = vmul.f32 %v4973_v9, %v6149_v16  ;;  %4418 = vmatprep.mubr.bf16.mxu1 %v1737_v11  ;;  %v1935_v16 = vsel %vm957_vm1, %v1891_v8, 0 }
 0x766   : > { %v1738_v30 = vpack.c.bf16 %v1724_v21, %v1723_v7 }
 0x768   : > { %4419 = vmatmul.mubr.bf16.vlgmr.msra.gmra.mrb[16].mxu1 %v1738_v30 }
 0x769   : > { %4435 = vmatpush3.bf16.xpose.msra.mxu1 %v1923_v32 }
 0x76a   : > { %4667 = vmatprep.subr.msk.bf16.mxu1 %vm957_vm1, %v6138_v48  ;;  %v1893_v48 = vpop.permute.xlu1 %1892 }
 0x76b   : > { %v1938_v52 = vsel %vm957_vm1, %v1893_v48, 0 }
 0x771   : > { %4437 = vmatpush3.bf16.xpose.msra.mxu1 %v1926_v36 }
 0x772   : > { %4668 = vmatprep.subr.msk.bf16.mxu1 %vm957_vm1, %v1887_v54 }
 0x779   : > { %4439 = vmatpush3.bf16.xpose.msra.mxu1 %v1929_v57 }
 0x77a   : > { %4669 = vmatprep.subr.msk.bf16.mxu1 %vm957_vm1, %v6167_v23 }
 0x781   : > { %4441 = vmatpush3.bf16.xpose.msra.mxu1 %v1932_v24 }
 0x782   : > { %4670 = vmatprep.subr.msk.bf16.mxu1 %vm957_vm1, %v1891_v8 }
 0x788   : > { %v1686_v17 = vpop.xlane.xlu0 %1685 }
 0x789   : > { %4443 = vmatpush3.bf16.xpose.msra.mxu1 %v1935_v16 }
 0x78a   : > { %4671 = vmatprep.subr.msk.bf16.mxu1 %vm957_vm1, %v1893_v48 }
 0x78c   : > { %v1682_v10 = vpop.xlane.xlu0 %1681 }
 0x78d   : > { %4974 = vrcp.f32 %v1682_v10  ;;  %v1684_v54 = vpop.xlane.xlu1 %1683 }
 0x78e   : > { %4976 = vrcp.f32 %v1684_v54 }
 0x78f   : > { %4978 = vrcp.f32 %v1686_v17 }
 0x790   : > { %v1688_v51 = vpop.xlane.xlu0 %1687 }
 0x791   : > { %4445 = vmatpush3.bf16.xpose.msra.mxu1 %v1938_v52  ;;  %4980 = vrcp.f32 %v1688_v51  ;;  %v1694_v23 = vpop.xlane.xlu1 %1693 }
 0x794   : > { %v1702_v45 = vpop.xlane.xlu0 %1701 }
 0x795   : > { %v1690_v35 = vpop.xlane.xlu1 %1689 }
 0x797   : > { %v4975_v62 = vpop.eup %4974 }
 0x798   : > { %v4977_v61 = vpop.eup %4976  ;;  %v1698_v27 = vpop.xlane.xlu0 %1697  ;;  %v1725_v26 = vmul.f32 %v4975_v62, %v6171_v55 }
 0x799   : > { %v4979_v11 = vpop.eup %4978  ;;  %v1696_v9 = vpop.xlane.xlu1 %1695  ;;  %v1726_v7 = vmul.f32 %v4977_v61, %v6173_v38 }
 0x79a   : > { %4982 = vrcp.f32 %v1696_v9  ;;  %v1727_v36 = vmul.f32 %v4979_v11, %v6165_v59 }
 0x79b   : > { %v4981_v21 = vpop.eup %4980  ;;  %v1739_v30 = vpack.c.bf16 %v1726_v7, %v1725_v26  ;;  %4984 = vrcp.f32 %v1690_v35 }
 0x79c   : > { %v1704_v32 = vpop.xlane.xlu0 %1703  ;;  %v1728_v57 = vmul.f32 %v4981_v21, %v6178_v33  ;;  %4986 = vrcp.f32 %v1694_v23 }
 0x79d   : > { %v1692_v24 = vpop.xlane.xlu1 %1691  ;;  %4422 = vmatprep.mubr.bf16.mxu1 %v1739_v30 }
 0x79e   : > { %4988 = vrcp.f32 %v1692_v24  ;;  %v1740_v8 = vpack.c.bf16 %v1728_v57, %v1727_v36 }
 0x79f   : > { %4990 = vrcp.f32 %v1698_v27 }
 0x7a0   : > { %4423 = vmatmul.mubr.bf16.gmra.mrb[20].mxu1 %v1740_v8  ;;  %v1895_v55 = vpop.permute.xlu0 %1894 }
 0x7a1   : > { %v1700_v16 = vpop.xlane.xlu1 %1699  ;;  %4672 = vmatprep.subr.msk.bf16.mxu1 %vm957_vm1, %v1895_v55  ;;  %v1941_v38 = vsel %vm957_vm1, %v1895_v55, 0 }
 0x7a2   : > { %4992 = vrcp.f32 %v1700_v16  ;;  %4447 = vmatpush3.bf16.xpose.msra.mxu1 %v1941_v38 }
 0x7a3   : > { %4994 = vrcp.f32 %v1704_v32 }
 0x7a4   : > { %v1867_v17 = vpop.permute.xlu0 %1866  ;;  %v4983_v59 = vpop.eup %4982  ;;  %4996 = vrcp.f32 %v1702_v45 }
 0x7a5   : > { %v1897_v33 = vpop.permute.xlu1 %1896  ;;  %v4985_v48 = vpop.eup %4984  ;;  %v1732_v51 = vmul.f32 %v4983_v59, %v6193_v13 }
 0x7a6   : > { %4673 = vmatprep.subr.msk.bf16.mxu1 %vm957_vm1, %v1897_v33  ;;  %v4987_v10 = vpop.eup %4986  ;;  %v1944_v35 = vsel %vm957_vm1, %v1897_v33, 0  ;;  %v1729_v62 = vmul.f32 %v4985_v48, %v6187_v34 }
 0x7a7   : > { %v1731_v45 = vmul.f32 %v4987_v10, %v6180_v22 }
 0x7a8   : > { %v4989_v54 = vpop.eup %4988  ;;  %v1871_v52 = vpop.permute.xlu0 %1870 }
 0x7a9   : > { %v1869_v23 = vpop.permute.xlu1 %1868  ;;  %v1730_v61 = vmul.f32 %v4989_v54, %v6199_v4  ;;  %v4991_v27 = vpop.eup %4990  ;;  %v1742_v7 = vpack.c.bf16 %v1732_v51, %v1731_v45 }
 0x7aa   : > { %4449 = vmatpush3.bf16.xpose.msra.mxu1 %v1944_v35  ;;  %v1733_v13 = vmul.f32 %v4991_v27, %v6191_v14 }
 0x7ab   : > { %v1741_v26 = vpack.c.bf16 %v1730_v61, %v1729_v62 }
 0x7ac   : > { %v4993_v11 = vpop.eup %4992  ;;  %v1875_v9 = vpop.permute.xlu0 %1874 }
 0x7ad   : > { %v4995_v21 = vpop.eup %4994  ;;  %v1873_v30 = vpop.permute.xlu1 %1872  ;;  %4426 = vmatprep.mubr.bf16.mxu1 %v1741_v26  ;;  %v1734_v32 = vmul.f32 %v4993_v11, %v6203_v31 }
 0x7ae   : > { %4427 = vmatmul.mubr.bf16.gmra.mrb[24].mxu1 %v1742_v7  ;;  %v4997_v36 = vpop.eup %4996  ;;  %v1736_v4 = vmul.f32 %v4995_v21, %v6197_v0 }
 0x7af   : > { %v1743_v34 = vpack.c.bf16 %v1734_v32, %v1733_v13  ;;  %v1735_v22 = vmul.f32 %v4997_v36, %v6185_v39 }
 0x7b0   : > { %v1879_v57 = vpop.permute.xlu0 %1878 }
 0x7b1   : > { %v1877_v24 = vpop.permute.xlu1 %1876  ;;  %4430 = vmatprep.mubr.bf16.mxu1 %v1743_v34  ;;  %v1744_v55 = vpack.c.bf16 %v1736_v4, %v1735_v22 }
 0x7b4   : > { %v2212_v8 = vpop.permute.xlu0 %2211 }
 0x7b5   : > { %v1881_v16 = vpop.permute.xlu1 %1880  ;;  %4466 = vmatprep.subr.bf16.mxu0 %v2212_v8 }
 0x7b6   : > { %4431 = vmatmul.mubr.bf16.gmra.mrb[28].mxu1 %v1744_v55  ;;  %4467 = vmatpush3.bf16.msra.mxu0 %v2212_v8 }
 0x7b7   : > { %4450 = vmatprep.mubr.msk.bf16.mxu1 %vm957_vm1, %v1867_v17 }
 0x7b8   : > { %v2216_v31 = vpop.permute.xlu0 %2215 }
 0x7b9   : > { %v2214_v14 = vpop.permute.xlu1 %2213 }
 0x7ba   : > { %4468 = vmatprep.subr.bf16.mxu0 %v2214_v14 }
 0x7bb   : > { %4469 = vmatpush3.bf16.msra.mxu0 %v2214_v14 }
 0x7bc   : > { %4470 = vmatprep.subr.bf16.mxu0 %v2216_v31  ;;  %v2220_v39 = vpop.permute.xlu0 %2219 }
 0x7bd   : > { %v2218_v0 = vpop.permute.xlu1 %2217 }
 0x7be   : > { %4451 = vmatmul.mubr.msk.bf16.vlgmr.msra.gmra.mrb[32].mxu1 %vm957_vm1, %v1869_v23 }
 0x7bf   : > { %4454 = vmatprep.mubr.msk.bf16.mxu1 %vm957_vm1, %v1871_v52  ;;  %4471 = vmatpush3.bf16.msra.mxu0 %v2216_v31 }
 0x7c0   : > { %4472 = vmatprep.subr.bf16.mxu0 %v2218_v0  ;;  %v2224_v17 = vpop.permute.xlu0 %2223 }
 0x7c1   : > { %v2222_v38 = vpop.permute.xlu1 %2221 }
 0x7c3   : > { %4473 = vmatpush3.bf16.msra.mxu0 %v2218_v0 }
 0x7c4   : > { %4474 = vmatprep.subr.bf16.mxu0 %v2220_v39  ;;  %v6273_v33 = vpop.permute.xlu0 %2348 }
 0x7c5   : > { %v2226_v59 = vpop.permute.xlu1 %2225 }
 0x7c6   : > { %4455 = vmatmul.mubr.msk.bf16.gmra.mrb[36].mxu1 %vm957_vm1, %v1873_v30 }
 0x7c7   : > { %4458 = vmatprep.mubr.msk.bf16.mxu1 %vm957_vm1, %v1875_v9  ;;  %4475 = vmatpush3.bf16.msra.mxu0 %v2220_v39 }
 0x7c8   : > { %4476 = vmatprep.subr.bf16.mxu0 %v2222_v38 }
 0x7cb   : > { %4477 = vmatpush3.bf16.msra.mxu0 %v2222_v38 }
 0x7cc   : > { %4478 = vmatprep.subr.bf16.mxu0 %v2224_v17 }
 0x7ce   : > { %4459 = vmatmul.mubr.msk.bf16.gmra.mrb[40].mxu1 %vm957_vm1, %v1877_v24 }
 0x7cf   : > { %4462 = vmatprep.mubr.msk.bf16.mxu1 %vm957_vm1, %v1879_v57  ;;  %4479 = vmatpush3.bf16.msra.mxu0 %v2224_v17 }
 0x7d0   : > { %4480 = vmatprep.subr.bf16.mxu0 %v2226_v59 }
 0x7d3   : > { %4481 = vmatpush3.bf16.msra.mxu0 %v2226_v59 }
 0x7d4   : > { %4674 = vmatprep.subr.msk.bf16.mxu0 %vm957_vm1, %v6273_v33 }
 0x7d6   : > { %4463 = vmatmul.mubr.msk.bf16.gmra.mrb[44].mxu1 %vm957_vm1, %v1881_v16 }
 0x83b   : > { %v6278_v48 = vpop.f32.mrb[16].mxu1 }
 0x83c   : > { %7395 = vst [vmem:[#allocation26_spill] sm:$0xff] %v6278_v48  ;;  %v6280_v10 = vpop.f32.mrb[17].mxu1 }
 0x83d   : > { %7396 = vst [vmem:[#allocation27_spill] sm:$0xff] %v6280_v10  ;;  %v6282_v54 = vpop.f32.mrb[18].mxu1 }
 0x83e   : > { %7397 = vst [vmem:[#allocation28_spill] sm:$0xff] %v6282_v54  ;;  %v6286_v51 = vpop.f32.mrb[19].mxu1 }
 0x83f   : > { %7398 = vst [vmem:[#allocation29_spill] sm:$0xff] %v6286_v51 }
 0x873   : > { %v6290_v35 = vpop.f32.mrb[20].mxu1 }
 0x874   : > { %7399 = vst [vmem:[#allocation30_spill] sm:$0xff] %v6290_v35  ;;  %v6292_v62 = vpop.f32.mrb[21].mxu1 }
 0x875   : > { %7400 = vst [vmem:[#allocation31_spill] sm:$0xff] %v6292_v62  ;;  %v6294_v61 = vpop.f32.mrb[22].mxu1 }
 0x876   : > { %7401 = vst [vmem:[#allocation32_spill] sm:$0xff] %v6294_v61  ;;  %v6298_v45 = vpop.f32.mrb[23].mxu1 }
 0x877   : > { %7402 = vst [vmem:[#allocation33_spill] sm:$0xff] %v6298_v45 }
 0x881   : > { %v6302_v11 = vpop.f32.mrb[24].mxu1 }
 0x882   : > { %7403 = vst [vmem:[#allocation34_spill] sm:$0xff] %v6302_v11  ;;  %v6304_v9 = vpop.f32.mrb[25].mxu1 }
 0x883   : > { %7404 = vst [vmem:[#allocation35_spill] sm:$0xff] %v6304_v9  ;;  %v6306_v7 = vpop.f32.mrb[26].mxu1  ;;  %v6414_v9 = vpop.permute.xlu1 %2350 }
 0x884   : > { %7405 = vst [vmem:[#allocation36_spill] sm:$0xff] %v6306_v7  ;;  %v6310_v30 = vpop.f32.mrb[27].mxu1 }
 0x885   : > { %7406 = vst [vmem:[#allocation37_spill] sm:$0xff] %v6310_v30 }
 0x889   : > { %v6314_v32 = vpop.f32.mrb[28].mxu1 }
 0x88a   : > { %7407 = vst [vmem:[#allocation38_spill] sm:$0xff] %v6314_v32  ;;  %v6316_v36 = vpop.f32.mrb[29].mxu1 }
 0x88b   : > { %7408 = vst [vmem:[#allocation39_spill] sm:$0xff] %v6316_v36  ;;  %v6318_v34 = vpop.f32.mrb[30].mxu1 }
 0x88c   : > { %7409 = vst [vmem:[#allocation40_spill] sm:$0xff] %v6318_v34  ;;  %v6322_v4 = vpop.f32.mrb[31].mxu1 }
 0x88d   : > { %7410 = vst [vmem:[#allocation41_spill] sm:$0xff] %v6322_v4 }
 0x891   : > { %v4452_v22 = vpop.f32.mrb[32].mxu1 }
 0x892   : > { %v2045_v8 = vsel %vm887_vm4, -inf, %v4452_v22  ;;  %v1980_v55 = vpop.f32.mrb[33].mxu1 }
 0x893   : > { %2063 = vmax.xlane.f32.xlu0 %v2045_v8  ;;  %v4453_v16 = vpop.f32.mrb[34].mxu1  ;;  %v2043_v0 = vsel %vm885_vm6, -inf, %v1980_v55 }
 0x894   : > { %v1983_v14 = vpop.f32.mrb[35].mxu1  ;;  %v2046_v38 = vsel %vm888_vm7, -inf, %v4453_v16 }
 0x895   : > { %v2044_v31 = vsel %vm886_vm5, -inf, %v1983_v14 }
 0x896   : > { %2061 = vmax.xlane.f32.xlu1 %v2044_v31 }
 0x897   : > { %2059 = vmax.xlane.f32.xlu0 %v2043_v0 }
 0x899   : > { %v4456_v39 = vpop.f32.mrb[36].mxu1 }
 0x89a   : > { %v1996_v17 = vpop.f32.mrb[37].mxu1  ;;  %v6347_v55 = vsel %vm891_vm9, -inf, %v4456_v39 }
 0x89b   : > { %2065 = vmax.xlane.f32.xlu0 %v2046_v38  ;;  %v4457_v59 = vpop.f32.mrb[38].mxu1 }
 0x89c   : > { %v6341_v22 = vsel %vm892_vm8, -inf, %v4457_v59  ;;  %v1999_v14 = vpop.f32.mrb[39].mxu1  ;;  %v6359_v59 = vsel %vm889_vm11, -inf, %v1996_v17 }
 0x89d   : > { %2073 = vmax.xlane.f32.xlu1 %v6341_v22  ;;  %v6353_v16 = vsel %vm890_vm10, -inf, %v1999_v14 }
 0x89f   : > { %2071 = vmax.xlane.f32.xlu0 %v6347_v55 }
 0x8a1   : > { %2069 = vmax.xlane.f32.xlu1 %v6353_v16  ;;  %v4460_v24 = vpop.f32.mrb[40].mxu1 }
 0x8a2   : > { %v2012_v57 = vpop.f32.mrb[41].mxu1  ;;  %v6371_v14 = vsel %vm895_vm13, -inf, %v4460_v24 }
 0x8a3   : > { %2067 = vmax.xlane.f32.xlu0 %v6359_v59  ;;  %v4461_v39 = vpop.f32.mrb[42].mxu1 }
 0x8a4   : > { %v6365_v13 = vsel %vm7411_vm12, -inf, %v4461_v39  ;;  %v2015_v26 = vpop.f32.mrb[43].mxu1  ;;  %v7412_v39 = vld [vmem:[#allocation7_spill] sm:$0xff] }
 0x8a5   : > { %2081 = vmax.xlane.f32.xlu1 %v6365_v13  ;;  %v6377_v17 = vsel %vm894_vm14, -inf, %v2015_v26  ;;  %vm7413_vm12 = vcmp.gt.s32.totalorder %v5695_v46, %v7412_v39  ;;  %v7420_v39 = vld [vmem:[#allocation4_spill] sm:$0xff] }
 0x8a6   : > { %v6383_v21 = vsel %vm7413_vm12, -inf, %v2012_v57 }
 0x8a7   : > { %2079 = vmax.xlane.f32.xlu0 %v6371_v14 }
 0x8a9   : > { %2077 = vmax.xlane.f32.xlu1 %v6377_v17  ;;  %v4464_v23 = vpop.f32.mrb[44].mxu1 }
 0x8aa   : > { %v2028_v27 = vpop.f32.mrb[45].mxu1  ;;  %v6389_v4 = vsel %vm899_vm0, -inf, %v4464_v23 }
 0x8ab   : > { %2075 = vmax.xlane.f32.xlu0 %v6383_v21  ;;  %v4465_v24 = vpop.f32.mrb[46].mxu1  ;;  %v6395_v32 = vsel %vm897_vm15, -inf, %v2028_v27 }
 0x8ac   : > { %v2031_v52 = vpop.f32.mrb[47].mxu1  ;;  %v6405_v23 = vsel %vm900_vm2, -inf, %v4465_v24 }
 0x8ad   : > { %v6411_v27 = vsel %vm898_vm3, -inf, %v2031_v52 }
 0x8af   : > { %2087 = vmax.xlane.f32.xlu0 %v6389_v4 }
 0x8b3   : > { %2083 = vmax.xlane.f32.xlu0 %v6395_v32 }
 0x8ba   : > { %2354 = vrot.lane.b32.xlu1 %v5603_v20, %s5254_s19 }
 0x8c9   : > { %2352 = vrot.lane.b32.xlu0 %v5605_v40, %s5254_s19 }
 0x8de   : > { %2089 = vmax.xlane.f32.xlu1 %v6405_v23 }
 0x8e2   : > { %2085 = vmax.xlane.f32.xlu1 %v6411_v27 }
 0x920   : > { %v2064_v30 = vpop.xlane.xlu0 %2063 }
 0x921   : > { %v2093_v62 = vsub.f32 %v2045_v8, %v2064_v30 }
 0x923   : > { %v2111_v45 = vmul.f32 1.442695, %v2093_v62  ;;  %v2062_v10 = vpop.xlane.xlu1 %2061 }
 0x924   : > { %v2092_v51 = vsub.f32 %v2044_v31, %v2062_v10  ;;  %v2060_v11 = vpop.xlane.xlu0 %2059 }
 0x925   : > { %4998 = vpow2.f32 %v2111_v45  ;;  %v2091_v24 = vsub.f32 %v2043_v0, %v2060_v11 }
 0x926   : > { %v2109_v7 = vmul.f32 1.442695, %v2092_v51 }
 0x927   : > { %v2107_v35 = vmul.f32 1.442695, %v2091_v24 }
 0x928   : > { %5000 = vpow2.f32 %v2109_v7  ;;  %v2066_v61 = vpop.xlane.xlu0 %2065 }
 0x929   : > { %5002 = vpow2.f32 %v2107_v35  ;;  %v2094_v48 = vsub.f32 %v2046_v38, %v2066_v61 }
 0x92a   : > { %v2074_v35 = vpop.xlane.xlu1 %2073 }
 0x92b   : > { %v2113_v52 = vmul.f32 1.442695, %v2094_v48  ;;  %v2098_v24 = vsub.f32 %v6341_v22, %v2074_v35 }
 0x92c   : > { %v2072_v51 = vpop.xlane.xlu0 %2071 }
 0x92d   : > { %5004 = vpow2.f32 %v2113_v52  ;;  %v2097_v45 = vsub.f32 %v6347_v55, %v2072_v51  ;;  %v2121_v20 = vmul.f32 1.442695, %v2098_v24 }
 0x92e   : > { %v2070_v11 = vpop.xlane.xlu1 %2069 }
 0x92f   : > { %v6416_v54 = vpop.eup %4998  ;;  %v2119_v30 = vmul.f32 1.442695, %v2097_v45  ;;  %v2096_v31 = vsub.f32 %v6353_v16, %v2070_v11 }
 0x930   : > { %2143 = vadd.xlane.f32.xlu1 %v6416_v54  ;;  %v2068_v48 = vpop.xlane.xlu0 %2067 }
 0x931   : > { %v2095_v8 = vsub.f32 %v6359_v59, %v2068_v48  ;;  %5006 = vpow2.f32 %v2119_v30  ;;  %v2117_v57 = vmul.f32 1.442695, %v2096_v31 }
 0x932   : > { %v6419_v34 = vpop.eup %5000  ;;  %v2082_v0 = vpop.xlane.xlu1 %2081 }
 0x933   : > { %v6421_v62 = vpop.eup %5002  ;;  %2141 = vadd.xlane.f32.xlu0 %v6419_v34  ;;  %v2115_v52 = vmul.f32 1.442695, %v2095_v8  ;;  %v2102_v22 = vsub.f32 %v6365_v13, %v2082_v0 }
 0x934   : > { %2139 = vadd.xlane.f32.xlu1 %v6421_v62  ;;  %v2080_v61 = vpop.xlane.xlu0 %2079 }
 0x935   : > { %5008 = vpow2.f32 %v2115_v52 }
 0x936   : > { %5010 = vpow2.f32 %v2117_v57 }
 0x937   : > { %v6425_v10 = vpop.eup %5004  ;;  %5012 = vpow2.f32 %v2121_v20 }
 0x938   : > { %2145 = vadd.xlane.f32.xlu1 %v6425_v10  ;;  %v2076_v7 = vpop.xlane.xlu0 %2075 }
 0x939   : > { %v2099_v59 = vsub.f32 %v6383_v21, %v2076_v7 }
 0x93b   : > { %v2123_v35 = vmul.f32 1.442695, %v2099_v59  ;;  %v6441_v11 = vpop.eup %5006 }
 0x93c   : > { %v2088_v38 = vpop.xlane.xlu0 %2087 }
 0x93d   : > { %v2105_v55 = vsub.f32 %v6389_v4, %v2088_v38 }
 0x93f   : > { %v2135_v16 = vmul.f32 1.442695, %v2105_v55  ;;  %v6447_v20 = vpop.eup %5008 }
 0x940   : > { %v2084_v48 = vpop.xlane.xlu0 %2083 }
 0x941   : > { %v2103_v45 = vsub.f32 %v6395_v32, %v2084_v48  ;;  %v6449_v32 = vpop.eup %5010 }
 0x942   : > { %v6454_v30 = vpop.eup %5012 }
 0x943   : > { %v2131_v4 = vmul.f32 1.442695, %v2103_v45  ;;  %v2389_v45 = vsel %vm957_vm1, %v6273_v33, 0 }
 0x949   : > { %2356 = vrot.lane.b32.xlu0 %v5621_v28, %s5254_s19  ;;  %2358 = vrot.lane.b32.xlu1 %v5619_v44, %s5254_s19  ;;  %v2101_v44 = vsub.f32 %v6371_v14, %v2080_v61  ;;  %v2078_v28 = vpop.xlane.xlu1 %2077 }
 0x94a   : > { %v2100_v21 = vsub.f32 %v6377_v17, %v2078_v28 }
 0x94b   : > { %v2127_v51 = vmul.f32 1.442695, %v2101_v44  ;;  %v2129_v44 = vmul.f32 1.442695, %v2102_v22 }
 0x94c   : > { %v2125_v61 = vmul.f32 1.442695, %v2100_v21 }
 0x94d   : > { %5014 = vpow2.f32 %v2127_v51  ;;  %v6443_v14 = vpop.permute.xlu1 %2354 }
 0x94e   : > { %5016 = vpow2.f32 %v2135_v16 }
 0x94f   : > { %5018 = vpow2.f32 %v2123_v35 }
 0x950   : > { %5020 = vpow2.f32 %v2131_v4 }
 0x951   : > { %5022 = vpow2.f32 %v2129_v44 }
 0x957   : > { %v6456_v28 = vpop.eup %5014 }
 0x958   : > { %v6461_v31 = vpop.eup %5016 }
 0x959   : > { %v6463_v0 = vpop.eup %5018 }
 0x95a   : > { %v6467_v38 = vpop.eup %5020 }
 0x95b   : > { %v6469_v24 = vpop.eup %5022 }
 0x968   : > { %2151 = vadd.xlane.f32.xlu0 %v6441_v11 }
 0x96b   : > { %v2090_v57 = vpop.xlane.xlu1 %2089 }
 0x96c   : > { %v2106_v13 = vsub.f32 %v6405_v23, %v2090_v57  ;;  %2147 = vadd.xlane.f32.xlu0 %v6447_v20 }
 0x96d   : > { %2149 = vadd.xlane.f32.xlu1 %v6449_v32 }
 0x96e   : > { %v2137_v7 = vmul.f32 1.442695, %v2106_v13 }
 0x96f   : > { %v2086_v8 = vpop.xlane.xlu1 %2085 }
 0x970   : > { %5024 = vpow2.f32 %v2137_v7  ;;  %v2104_v17 = vsub.f32 %v6411_v27, %v2086_v8  ;;  %2153 = vadd.xlane.f32.xlu0 %v6454_v30 }
 0x971   : > { %2159 = vadd.xlane.f32.xlu1 %v6456_v28  ;;  %5026 = vpow2.f32 %v2125_v61 }
 0x972   : > { %v2133_v23 = vmul.f32 1.442695, %v2104_v17 }
 0x974   : > { %2167 = vadd.xlane.f32.xlu0 %v6461_v31  ;;  %5028 = vpow2.f32 %v2133_v23 }
 0x975   : > { %2155 = vadd.xlane.f32.xlu1 %v6463_v0 }
 0x978   : > { %2163 = vadd.xlane.f32.xlu0 %v6467_v38 }
 0x979   : > { %2161 = vadd.xlane.f32.xlu1 %v6469_v24 }
 0x97a   : > { %v6473_v27 = vpop.eup %5024 }
 0x97b   : > { %v6475_v52 = vpop.eup %5026 }
 0x97c   : > { %2169 = vadd.xlane.f32.xlu0 %v6473_v27 }
 0x97d   : > { %2157 = vadd.xlane.f32.xlu1 %v6475_v52 }
 0x97e   : > { %v6479_v55 = vpop.eup %5028 }
 0x981   : > { %2165 = vadd.xlane.f32.xlu1 %v6479_v55 }
 0x992   : > { %2362 = vrot.lane.b32.xlu1 %v5635_v63, %s5254_s19  ;;  %2360 = vrot.lane.b32.xlu0 %v5637_v2, %s5254_s19  ;;  %s7266_s19 = scalar_lea.vmem %s7332_s13, %s4110_s27 }
 0x996   : > { %2334 = vrot.lane.b32.xlu1 %v5589_v18, %s5255_s20  ;;  %2332 = vrot.lane.b32.xlu0 %v5593_v19, %s5255_s20  ;;  %v2353_v18 = vpop.permute.xlu0 %2352 }
 0x99a   : > { %2338 = vrot.lane.b32.xlu1 %v5607_v1, %s5255_s20  ;;  %2336 = vrot.lane.b32.xlu0 %v5609_v41, %s5255_s20 }
 0x99e   : > { %2342 = vrot.lane.b32.xlu1 %v5623_v29, %s5255_s20  ;;  %2340 = vrot.lane.b32.xlu0 %v5625_v53, %s5255_s20 }
 0x9a2   : > { %2346 = vrot.lane.b32.xlu1 %v5639_v3, %s5255_s20  ;;  %2344 = vrot.lane.b32.xlu0 %v5643_v25, %s5255_s20 }
 0x9a6   : > { %2679 = vrot.lane.b32.xlu1 %v5585_v12, %s5256_s21  ;;  %2677 = vrot.lane.b32.xlu0 %v5587_v15, %s5256_s21 }
 0x9aa   : > { %2681 = vrot.lane.b32.xlu0 %v5605_v40, %s5256_s21 }
 0x9bd   : > { %v2144_v19 = vpop.xlane.xlu1 %2143 }
 0x9c0   : > { %v2142_v1 = vpop.xlane.xlu0 %2141 }
 0x9c1   : > { %5030 = vrcp.f32 %v2142_v1  ;;  %v2140_v41 = vpop.xlane.xlu1 %2139 }
 0x9c2   : > { %5032 = vrcp.f32 %v2140_v41 }
 0x9c3   : > { %5034 = vrcp.f32 %v2144_v19 }
 0x9c4   : > { %v2357_v33 = vpop.permute.xlu0 %2356 }
 0x9c5   : > { %v2146_v29 = vpop.xlane.xlu1 %2145 }
 0x9c6   : > { %5036 = vrcp.f32 %v2146_v29 }
 0x9cb   : > { %v5031_v53 = vpop.eup %5030 }
 0x9cc   : > { %v5033_v3 = vpop.eup %5032  ;;  %v2188_v25 = vmul.f32 %v5031_v53, %v6419_v34  ;;  %v2392_v34 = vsel %vm957_vm1, %v6414_v9, 0 }
 0x9cd   : > { %v2187_v12 = vmul.f32 %v5033_v3, %v6421_v62  ;;  %v5035_v51 = vpop.eup %5034  ;;  %v2398_v62 = vsel %vm957_vm1, %v6443_v14, 0 }
 0x9ce   : > { %v2189_v40 = vmul.f32 %v5035_v51, %v6416_v54  ;;  %v2395_v54 = vsel %vm957_vm1, %v2353_v18, 0 }
 0x9cf   : > { %v2203_v15 = vpack.c.bf16 %v2188_v25, %v2187_v12 }
 0x9d0   : > { %v5037_v59 = vpop.eup %5036 }
 0x9d1   : > { %v2190_v48 = vmul.f32 %v5037_v59, %v6425_v10  ;;  %4482 = vmatprep.mubr.bf16.mxu0 %v2203_v15  ;;  %v2401_v10 = vsel %vm957_vm1, %v2357_v33, 0 }
 0x9d3   : > { %v2204_v16 = vpack.c.bf16 %v2190_v48, %v2189_v40 }
 0x9d5   : > { %4483 = vmatmul.mubr.bf16.vlgmr.msra.gmra.mrb[48].mxu0 %v2204_v16 }
 0x9d6   : > { %4499 = vmatpush3.bf16.xpose.msra.mxu0 %v2389_v45 }
 0x9d7   : > { %4675 = vmatprep.subr.msk.bf16.mxu0 %vm957_vm1, %v6414_v9  ;;  %v2359_v9 = vpop.permute.xlu1 %2358 }
 0x9d8   : > { %v2404_v44 = vsel %vm957_vm1, %v2359_v9, 0 }
 0x9de   : > { %4501 = vmatpush3.bf16.xpose.msra.mxu0 %v2392_v34 }
 0x9df   : > { %4676 = vmatprep.subr.msk.bf16.mxu0 %vm957_vm1, %v2353_v18 }
 0x9e6   : > { %4503 = vmatpush3.bf16.xpose.msra.mxu0 %v2395_v54 }
 0x9e7   : > { %4677 = vmatprep.subr.msk.bf16.mxu0 %vm957_vm1, %v6443_v14 }
 0x9ee   : > { %4505 = vmatpush3.bf16.xpose.msra.mxu0 %v2398_v62 }
 0x9ef   : > { %4678 = vmatprep.subr.msk.bf16.mxu0 %vm957_vm1, %v2357_v33 }
 0x9f5   : > { %v2152_v22 = vpop.xlane.xlu0 %2151 }
 0x9f6   : > { %4507 = vmatpush3.bf16.xpose.msra.mxu0 %v2401_v10 }
 0x9f7   : > { %4679 = vmatprep.subr.msk.bf16.mxu0 %vm957_vm1, %v2359_v9 }
 0x9f9   : > { %v2148_v35 = vpop.xlane.xlu0 %2147 }
 0x9fa   : > { %5038 = vrcp.f32 %v2148_v35  ;;  %v2150_v4 = vpop.xlane.xlu1 %2149 }
 0x9fb   : > { %5040 = vrcp.f32 %v2150_v4 }
 0x9fc   : > { %5042 = vrcp.f32 %v2152_v22 }
 0x9fd   : > { %v2154_v21 = vpop.xlane.xlu0 %2153 }
 0x9fe   : > { %4509 = vmatpush3.bf16.xpose.msra.mxu0 %v2404_v44  ;;  %5044 = vrcp.f32 %v2154_v21  ;;  %v2160_v14 = vpop.xlane.xlu1 %2159 }
 0xa01   : > { %v2168_v57 = vpop.xlane.xlu0 %2167 }
 0xa02   : > { %v2156_v13 = vpop.xlane.xlu1 %2155 }
 0xa04   : > { %v5039_v61 = vpop.eup %5038 }
 0xa05   : > { %v5041_v7 = vpop.eup %5040  ;;  %v2164_v8 = vpop.xlane.xlu0 %2163  ;;  %v2191_v17 = vmul.f32 %v5039_v61, %v6447_v20 }
 0xa06   : > { %v5043_v23 = vpop.eup %5042  ;;  %v2162_v18 = vpop.xlane.xlu1 %2161  ;;  %v2192_v19 = vmul.f32 %v5041_v7, %v6449_v32 }
 0xa07   : > { %5046 = vrcp.f32 %v2162_v18  ;;  %v2193_v53 = vmul.f32 %v5043_v23, %v6441_v11 }
 0xa08   : > { %v5045_v1 = vpop.eup %5044  ;;  %v2205_v41 = vpack.c.bf16 %v2192_v19, %v2191_v17  ;;  %5048 = vrcp.f32 %v2156_v13 }
 0xa09   : > { %v2170_v29 = vpop.xlane.xlu0 %2169  ;;  %v2194_v3 = vmul.f32 %v5045_v1, %v6454_v30  ;;  %5050 = vrcp.f32 %v2160_v14 }
 0xa0a   : > { %v2158_v25 = vpop.xlane.xlu1 %2157  ;;  %4486 = vmatprep.mubr.bf16.mxu0 %v2205_v41 }
 0xa0b   : > { %5052 = vrcp.f32 %v2158_v25  ;;  %v2206_v12 = vpack.c.bf16 %v2194_v3, %v2193_v53 }
 0xa0c   : > { %5054 = vrcp.f32 %v2164_v8 }
 0xa0d   : > { %4487 = vmatmul.mubr.bf16.gmra.mrb[52].mxu0 %v2206_v12  ;;  %v2361_v20 = vpop.permute.xlu0 %2360 }
 0xa0e   : > { %v2166_v51 = vpop.xlane.xlu1 %2165  ;;  %4680 = vmatprep.subr.msk.bf16.mxu0 %vm957_vm1, %v2361_v20  ;;  %v2407_v32 = vsel %vm957_vm1, %v2361_v20, 0 }
 0xa0f   : > { %5056 = vrcp.f32 %v2166_v51  ;;  %4511 = vmatpush3.bf16.xpose.msra.mxu0 %v2407_v32 }
 0xa10   : > { %5058 = vrcp.f32 %v2170_v29 }
 0xa11   : > { %v2333_v15 = vpop.permute.xlu0 %2332  ;;  %v5047_v11 = vpop.eup %5046  ;;  %5060 = vrcp.f32 %v2168_v57 }
 0xa12   : > { %v2363_v30 = vpop.permute.xlu1 %2362  ;;  %v5049_v59 = vpop.eup %5048  ;;  %v2198_v45 = vmul.f32 %v5047_v11, %v6469_v24 }
 0xa13   : > { %4681 = vmatprep.subr.msk.bf16.mxu0 %vm957_vm1, %v2363_v30  ;;  %v5051_v40 = vpop.eup %5050  ;;  %v2410_v54 = vsel %vm957_vm1, %v2363_v30, 0  ;;  %v2195_v62 = vmul.f32 %v5049_v59, %v6463_v0 }
 0xa14   : > { %v2197_v22 = vmul.f32 %v5051_v40, %v6456_v28 }
 0xa15   : > { %v5053_v48 = vpop.eup %5052  ;;  %v2337_v16 = vpop.permute.xlu0 %2336 }
 0xa16   : > { %v2335_v34 = vpop.permute.xlu1 %2334  ;;  %v2196_v33 = vmul.f32 %v5053_v48, %v6475_v52  ;;  %v5055_v10 = vpop.eup %5054  ;;  %v2208_v44 = vpack.c.bf16 %v2198_v45, %v2197_v22 }
 0xa17   : > { %4513 = vmatpush3.bf16.xpose.msra.mxu0 %v2410_v54  ;;  %v2199_v24 = vmul.f32 %v5055_v10, %v6467_v38 }
 0xa18   : > { %v2207_v9 = vpack.c.bf16 %v2196_v33, %v2195_v62 }
 0xa19   : > { %v5057_v35 = vpop.eup %5056  ;;  %v2341_v4 = vpop.permute.xlu0 %2340 }
 0xa1a   : > { %v5059_v21 = vpop.eup %5058  ;;  %v2339_v14 = vpop.permute.xlu1 %2338  ;;  %4490 = vmatprep.mubr.bf16.mxu0 %v2207_v9  ;;  %v2200_v57 = vmul.f32 %v5057_v35, %v6479_v55 }
 0xa1b   : > { %4491 = vmatmul.mubr.bf16.gmra.mrb[56].mxu0 %v2208_v44  ;;  %v5061_v13 = vpop.eup %5060  ;;  %v2202_v52 = vmul.f32 %v5059_v21, %v6473_v27 }
 0xa1c   : > { %v2209_v0 = vpack.c.bf16 %v2200_v57, %v2199_v24  ;;  %v2201_v28 = vmul.f32 %v5061_v13, %v6461_v31 }
 0xa1d   : > { %v2345_v61 = vpop.permute.xlu0 %2344 }
 0xa1e   : > { %v2343_v7 = vpop.permute.xlu1 %2342  ;;  %4494 = vmatprep.mubr.bf16.mxu0 %v2209_v0  ;;  %v2210_v17 = vpack.c.bf16 %v2202_v52, %v2201_v28 }
 0xa21   : > { %v2678_v8 = vpop.permute.xlu0 %2677 }
 0xa22   : > { %v2347_v23 = vpop.permute.xlu1 %2346  ;;  %4530 = vmatprep.subr.bf16.mxu0 %v2678_v8  ;;  %4634 = vmatprep.subr.bf16.mxu1 %v2678_v8 }
 0xa23   : > { %4495 = vmatmul.mubr.bf16.gmra.mrb[60].mxu0 %v2210_v17  ;;  %4642 = vmatpush3.bf16.msra.mxu1 %v2678_v8  ;;  %v7421_v17 = vld [vmem:[#allocation2_spill] sm:$0xff] }
 0xa24   : > { %4514 = vmatprep.mubr.msk.bf16.mxu0 %vm957_vm1, %v2333_v15 }
 0xa25   : > { %v2682_v55 = vpop.permute.xlu0 %2681 }
 0xa26   : > { %v2680_v38 = vpop.permute.xlu1 %2679 }
 0xa27   : > { %4635 = vmatprep.subr.bf16.mxu1 %v2680_v38 }
 0xa28   : > { %4643 = vmatpush3.bf16.msra.mxu1 %v2680_v38 }
 0xa29   : > { %4636 = vmatprep.subr.bf16.mxu1 %v2682_v55 }
 0xa2b   : > { %4515 = vmatmul.mubr.msk.bf16.vlgmr.msra.gmra.mrb[64].mxu0 %vm957_vm1, %v2335_v34 }
 0xa2c   : > { %4531 = vmatpush3.bf16.msra.mxu0 %v2678_v8  ;;  %4518 = vmatprep.mubr.msk.bf16.mxu0 %vm957_vm1, %v2337_v16 }
 0xa2d   : > { %4532 = vmatprep.subr.bf16.mxu0 %v2680_v38  ;;  %4644 = vmatpush3.bf16.msra.mxu1 %v2682_v55 }
 0xa30   : > { %4533 = vmatpush3.bf16.msra.mxu0 %v2680_v38 }
 0xa31   : > { %4534 = vmatprep.subr.bf16.mxu0 %v2682_v55 }
 0xa33   : > { %4519 = vmatmul.mubr.msk.bf16.gmra.mrb[68].mxu0 %vm957_vm1, %v2339_v14 }
 0xa34   : > { %4535 = vmatpush3.bf16.msra.mxu0 %v2682_v55  ;;  %4522 = vmatprep.mubr.msk.bf16.mxu0 %vm957_vm1, %v2341_v4  ;;  %v7424_v55 = vld [vmem:[#allocation3_spill] sm:$0xff] }
 0xa3b   : > { %4523 = vmatmul.mubr.msk.bf16.gmra.mrb[72].mxu0 %vm957_vm1, %v2343_v7 }
 0xa3c   : > { %4526 = vmatprep.mubr.msk.bf16.mxu0 %vm957_vm1, %v2345_v61 }
 0xa43   : > { %4527 = vmatmul.mubr.msk.bf16.gmra.mrb[76].mxu0 %vm957_vm1, %v2347_v23 }
 0xaa8   : > { %v6544_v31 = vpop.f32.mrb[48].mxu0 }
 0xaa9   : > { %v6546_v27 = vpop.f32.mrb[49].mxu0 }
 0xaaa   : > { %v6548_v18 = vpop.f32.mrb[50].mxu0 }
 0xaab   : > { %v4719_v19 = vpack.i.bf16 %v6548_v18, %v6544_v31  ;;  %v6552_v1 = vpop.f32.mrb[51].mxu0  ;;  %v7431_v18 = vld [vmem:[#allocation36_spill] sm:$0xff] }
 0xaac   : > { %v4714_v41 = vpack.i.bf16 %v6552_v1, %v6546_v27 }
 0xae0   : > { %v6556_v29 = vpop.f32.mrb[52].mxu0 }
 0xae1   : > { %v6558_v53 = vpop.f32.mrb[53].mxu0 }
 0xae2   : > { %v6560_v3 = vpop.f32.mrb[54].mxu0 }
 0xae3   : > { %v4739_v25 = vpack.i.bf16 %v6560_v3, %v6556_v29  ;;  %v6564_v12 = vpop.f32.mrb[55].mxu0  ;;  %v7434_v29 = vld [vmem:[#allocation29_spill] sm:$0xff]  ;;  %v7435_v3 = vld [vmem:[#allocation27_spill] sm:$0xff] }
 0xae4   : > { %v4734_v20 = vpack.i.bf16 %v6564_v12, %v6558_v53 }
 0xaee   : > { %v6568_v51 = vpop.f32.mrb[56].mxu0 }
 0xaef   : > { %v6570_v32 = vpop.f32.mrb[57].mxu0 }
 0xaf0   : > { %v6572_v15 = vpop.f32.mrb[58].mxu0 }
 0xaf1   : > { %v4769_v11 = vpack.i.bf16 %v6572_v15, %v6568_v51  ;;  %v6576_v30 = vpop.f32.mrb[59].mxu0  ;;  %v7447_v51 = vld [vmem:[#allocation39_spill] sm:$0xff] }
 0xaf2   : > { %v4764_v59 = vpack.i.bf16 %v6576_v30, %v6570_v32 }
 0xaf6   : > { %v6580_v40 = vpop.f32.mrb[60].mxu0 }
 0xaf7   : > { %v6582_v48 = vpop.f32.mrb[61].mxu0 }
 0xaf8   : > { %v6584_v16 = vpop.f32.mrb[62].mxu0 }
 0xaf9   : > { %v4809_v45 = vpack.i.bf16 %v6584_v16, %v6580_v40  ;;  %v6588_v34 = vpop.f32.mrb[63].mxu0 }
 0xafa   : > { %v4804_v54 = vpack.i.bf16 %v6588_v34, %v6582_v48 }
 0xafe   : > { %v4516_v62 = vpop.f32.mrb[64].mxu0 }
 0xaff   : > { %v2511_v33 = vsel %vm887_vm4, -inf, %v4516_v62  ;;  %v2446_v10 = vpop.f32.mrb[65].mxu0  ;;  %vm7418_vm4 = vcmp.gt.s32.totalorder %v5695_v46, %v5773_v5 }
 0xb00   : > { %2529 = vmax.xlane.f32.xlu0 %v2511_v33  ;;  %v4517_v22 = vpop.f32.mrb[66].mxu0  ;;  %v2509_v4 = vsel %vm885_vm6, -inf, %v2446_v10 }
 0xb01   : > { %v2449_v9 = vpop.f32.mrb[67].mxu0  ;;  %v2512_v49 = vsel %vm888_vm7, -inf, %v4517_v22 }
 0xb02   : > { %v2510_v35 = vsel %vm886_vm5, -inf, %v2449_v9  ;;  %vm7419_vm5 = vmmov %vm7413_vm12 }
 0xb03   : > { %2527 = vmax.xlane.f32.xlu1 %v2510_v35 }
 0xb04   : > { %2525 = vmax.xlane.f32.xlu0 %v2509_v4 }
 0xb06   : > { %v4520_v44 = vpop.f32.mrb[68].mxu0 }
 0xb07   : > { %v2462_v21 = vpop.f32.mrb[69].mxu0  ;;  %v2515_v42 = vsel %vm891_vm9, -inf, %v4520_v44 }
 0xb08   : > { %2531 = vmax.xlane.f32.xlu0 %v2512_v49  ;;  %v4521_v14 = vpop.f32.mrb[70].mxu0  ;;  %v2513_v37 = vsel %vm889_vm11, -inf, %v2462_v21 }
 0xb09   : > { %v6607_v24 = vsel %vm892_vm8, -inf, %v4521_v14  ;;  %v2465_v50 = vpop.f32.mrb[71].mxu0 }
 0xb0a   : > { %2539 = vmax.xlane.f32.xlu1 %v6607_v24  ;;  %v2514_v56 = vsel %vm890_vm10, -inf, %v2465_v50 }
 0xb0c   : > { %2537 = vmax.xlane.f32.xlu0 %v2515_v42 }
 0xb0e   : > { %2535 = vmax.xlane.f32.xlu1 %v2514_v56  ;;  %v4524_v57 = vpop.f32.mrb[72].mxu0 }
 0xb0f   : > { %v2478_v13 = vpop.f32.mrb[73].mxu0  ;;  %v2519_v60 = vsel %vm895_vm13, -inf, %v4524_v57 }
 0xb10   : > { %2533 = vmax.xlane.f32.xlu0 %v2513_v37  ;;  %v4525_v0 = vpop.f32.mrb[74].mxu0  ;;  %v6637_v5 = vsel %vm7419_vm5, -inf, %v2478_v13 }
 0xb11   : > { %v6622_v61 = vsel %vm7418_vm4, -inf, %v4525_v0  ;;  %v2481_v58 = vpop.f32.mrb[75].mxu0 }
 0xb12   : > { %2547 = vmax.xlane.f32.xlu1 %v6622_v61  ;;  %v6631_v47 = vsel %vm894_vm14, -inf, %v2481_v58 }
 0xb14   : > { %2545 = vmax.xlane.f32.xlu0 %v2519_v60 }
 0xb16   : > { %2543 = vmax.xlane.f32.xlu1 %v6631_v47  ;;  %v4528_v52 = vpop.f32.mrb[76].mxu0 }
 0xb17   : > { %v2494_v7 = vpop.f32.mrb[77].mxu0  ;;  %v6643_v8 = vsel %vm899_vm0, -inf, %v4528_v52  ;;  %vm3006_vm0 = vcmask 130048  }
 0xb18   : > { %2541 = vmax.xlane.f32.xlu0 %v6637_v5  ;;  %v4529_v28 = vpop.f32.mrb[78].mxu0  ;;  %v6649_v43 = vsel %vm897_vm15, -inf, %v2494_v7 }
 0xb19   : > { %v2497_v6 = vpop.f32.mrb[79].mxu0  ;;  %v6659_v36 = vsel %vm900_vm2, -inf, %v4529_v28  ;;  %vm3023_vm2 = vcmask 195584  }
 0xb1a   : > { %v6665_v26 = vsel %vm898_vm3, -inf, %v2497_v6  ;;  %vm7454_vm3 = vcmask 261120  }
 0xb1b   : > { %vm7456_vm6 = vmmov %vm7454_vm3 }
 0xb1c   : > { %2553 = vmax.xlane.f32.xlu0 %v6643_v8  ;;  %vm7459_vm7 = vmmov %vm7454_vm3 }
 0xb1d   : > { %vm7462_vm8 = vmmov %vm7454_vm3 }
 0xb1e   : > { %vm7465_vm9 = vmmov %vm7454_vm3 }
 0xb1f   : > { %vm7466_vm10 = vmmov %vm7454_vm3 }
 0xb20   : > { %2549 = vmax.xlane.f32.xlu0 %v6649_v43 }
 0xb27   : > { %2685 = vrot.lane.b32.xlu1 %v7420_v39, %s5256_s21 }
 0xb36   : > { %2683 = vrot.lane.b32.xlu0 %v7421_v17, %s5256_s21 }
 0xb4b   : > { %2555 = vmax.xlane.f32.xlu1 %v6659_v36 }
 0xb4f   : > { %2551 = vmax.xlane.f32.xlu1 %v6665_v26 }
 0xb60   : > { %2687 = vrot.lane.b32.xlu1 %v7424_v55, %s5256_s21 }
 0xb8d   : > { %v2530_v62 = vpop.xlane.xlu0 %2529 }
 0xb8e   : > { %v2559_v10 = vsub.f32 %v2511_v33, %v2530_v62 }
 0xb90   : > { %v2577_v22 = vmul.f32 1.442695, %v2559_v10  ;;  %v2528_v44 = vpop.xlane.xlu1 %2527 }
 0xb91   : > { %v2526_v9 = vpop.xlane.xlu0 %2525  ;;  %v2558_v50 = vsub.f32 %v2510_v35, %v2528_v44 }
 0xb92   : > { %5062 = vpow2.f32 %v2577_v22  ;;  %v2557_v21 = vsub.f32 %v2509_v4, %v2526_v9 }
 0xb93   : > { %v2575_v58 = vmul.f32 1.442695, %v2558_v50 }
 0xb94   : > { %v2573_v14 = vmul.f32 1.442695, %v2557_v21 }
 0xb95   : > { %v2532_v57 = vpop.xlane.xlu0 %2531 }
 0xb96   : > { %5064 = vpow2.f32 %v2573_v14  ;;  %v2560_v13 = vsub.f32 %v2512_v49, %v2532_v57 }
 0xb97   : > { %v2540_v46 = vpop.xlane.xlu1 %2539 }
 0xb98   : > { %v2579_v0 = vmul.f32 1.442695, %v2560_v13  ;;  %v2564_v35 = vsub.f32 %v6607_v24, %v2540_v46 }
 0xb99   : > { %v2538_v52 = vpop.xlane.xlu0 %2537 }
 0xb9a   : > { %5066 = vpow2.f32 %v2579_v0  ;;  %v2563_v7 = vsub.f32 %v2515_v42, %v2538_v52  ;;  %v2587_v62 = vmul.f32 1.442695, %v2564_v35 }
 0xb9b   : > { %v2536_v28 = vpop.xlane.xlu1 %2535  ;;  %5068 = vpow2.f32 %v2575_v58 }
 0xb9c   : > { %v6670_v6 = vpop.eup %5062  ;;  %v2585_v33 = vmul.f32 1.442695, %v2563_v7  ;;  %v2562_v39 = vsub.f32 %v2514_v56, %v2536_v28 }
 0xb9d   : > { %2609 = vadd.xlane.f32.xlu1 %v6670_v6  ;;  %v2534_v4 = vpop.xlane.xlu0 %2533 }
 0xb9e   : > { %5070 = vpow2.f32 %v2585_v33  ;;  %v2583_v17 = vmul.f32 1.442695, %v2562_v39  ;;  %v2561_v49 = vsub.f32 %v2513_v37, %v2534_v4 }
 0xb9f   : > { %v2548_v55 = vpop.xlane.xlu1 %2547 }
 0xba0   : > { %v6674_v23 = vpop.eup %5064  ;;  %v2581_v38 = vmul.f32 1.442695, %v2561_v49  ;;  %5072 = vpow2.f32 %v2583_v17  ;;  %v2568_v22 = vsub.f32 %v6622_v61, %v2548_v55  ;;  %v7426_v55 = vld [vmem:[#allocation26_spill] sm:$0xff] }
 0xba1   : > { %2605 = vadd.xlane.f32.xlu1 %v6674_v23  ;;  %v2546_v42 = vpop.xlane.xlu0 %2545 }
 0xba2   : > { %5074 = vpow2.f32 %v2581_v38  ;;  %v2567_v56 = vsub.f32 %v2519_v60, %v2546_v42  ;;  %v2595_v57 = vmul.f32 1.442695, %v2568_v22  ;;  %v7425_v38 = vld [vmem:[#allocation28_spill] sm:$0xff]  ;;  %v7429_v22 = vld [vmem:[#allocation30_spill] sm:$0xff] }
 0xba3   : > { %5076 = vpow2.f32 %v2587_v62  ;;  %v2544_v37 = vpop.xlane.xlu1 %2543  ;;  %v7427_v42 = vpack.i.bf16 %v7425_v38, %v7426_v55 }
 0xba4   : > { %v6677_v10 = vpop.eup %5066  ;;  %v2593_v9 = vmul.f32 1.442695, %v2567_v56  ;;  %v2566_v60 = vsub.f32 %v6631_v47, %v2544_v37  ;;  %v7428_v56 = vld [vmem:[#allocation32_spill] sm:$0xff] }
 0xba5   : > { %2611 = vadd.xlane.f32.xlu1 %v6677_v10  ;;  %v2542_v24 = vpop.xlane.xlu0 %2541  ;;  %v6682_v21 = vpop.eup %5068 }
 0xba6   : > { %v2565_v44 = vsub.f32 %v6637_v5, %v2542_v24  ;;  %5078 = vpow2.f32 %v2593_v9  ;;  %v2591_v58 = vmul.f32 1.442695, %v2566_v60  ;;  %v7430_v9 = vpack.i.bf16 %v7428_v56, %v7429_v22  ;;  %v7441_v60 = vld [vmem:[#allocation35_spill] sm:$0xff] }
 0xba7   : > { %v2686_v39 = vpop.permute.xlu1 %2685 }
 0xba8   : > { %v6684_v14 = vpop.eup %5070  ;;  %v2589_v50 = vmul.f32 1.442695, %v2565_v44  ;;  %v7438_v44 = vld [vmem:[#allocation31_spill] sm:$0xff] }
 0xba9   : > { %2607 = vadd.xlane.f32.xlu1 %v6682_v21  ;;  %2617 = vadd.xlane.f32.xlu0 %v6684_v14  ;;  %v2554_v61 = vpop.xlane.xlu0 %2553 }
 0xbaa   : > { %5080 = vpow2.f32 %v2589_v50  ;;  %v2571_v13 = vsub.f32 %v6643_v8, %v2554_v61  ;;  %v6690_v46 = vpop.eup %5072 }
 0xbab   : > { %5082 = vpow2.f32 %v2595_v57  ;;  %v7440_v57 = vld [vmem:[#allocation37_spill] sm:$0xff] }
 0xbac   : > { %v6692_v5 = vpop.eup %5074  ;;  %v2601_v0 = vmul.f32 1.442695, %v2571_v13  ;;  %v7442_v61 = vpack.i.bf16 %v7440_v57, %v7441_v60 }
 0xbad   : > { %2615 = vadd.xlane.f32.xlu1 %v6690_v46  ;;  %2613 = vadd.xlane.f32.xlu0 %v6692_v5  ;;  %v2550_v47 = vpop.xlane.xlu0 %2549  ;;  %v6697_v7 = vpop.eup %5076 }
 0xbae   : > { %5084 = vpow2.f32 %v2601_v0  ;;  %v2569_v52 = vsub.f32 %v6649_v43, %v2550_v47 }
 0xbaf   : > { %5086 = vpow2.f32 %v2591_v58 }
 0xbb0   : > { %v2597_v28 = vmul.f32 1.442695, %v2569_v52  ;;  %v6700_v33 = vpop.eup %5078 }
 0xbb1   : > { %2619 = vadd.xlane.f32.xlu0 %v6697_v7  ;;  %v2684_v8 = vpop.permute.xlu0 %2683 }
 0xbb2   : > { %5088 = vpow2.f32 %v2597_v28  ;;  %4536 = vmatprep.subr.bf16.mxu0 %v2684_v8  ;;  %4637 = vmatprep.subr.bf16.mxu1 %v2684_v8 }
 0xbb3   : > { %4537 = vmatpush3.bf16.msra.mxu0 %v2684_v8  ;;  %4645 = vmatpush3.bf16.msra.mxu1 %v2684_v8 }
 0xbb4   : > { %v6702_v4 = vpop.eup %5080  ;;  %4538 = vmatprep.subr.bf16.mxu0 %v2686_v39  ;;  %4638 = vmatprep.subr.bf16.mxu1 %v2686_v39 }
 0xbb5   : > { %2625 = vadd.xlane.f32.xlu0 %v6700_v33  ;;  %2621 = vadd.xlane.f32.xlu1 %v6702_v4  ;;  %v6706_v43 = vpop.eup %5082 }
 0xbb7   : > { %4539 = vmatpush3.bf16.msra.mxu0 %v2686_v39  ;;  %4646 = vmatpush3.bf16.msra.mxu1 %v2686_v39 }
 0xbb8   : > { %v6708_v35 = vpop.eup %5084 }
 0xbb9   : > { %2627 = vadd.xlane.f32.xlu0 %v6706_v43  ;;  %2633 = vadd.xlane.f32.xlu1 %v6708_v35  ;;  %v6712_v17 = vpop.eup %5086 }
 0xbbc   : > { %v6714_v49 = vpop.eup %5088 }
 0xbbd   : > { %2623 = vadd.xlane.f32.xlu0 %v6712_v17  ;;  %2629 = vadd.xlane.f32.xlu1 %v6714_v49 }
 0xbce   : > { %2691 = vrot.lane.b32.xlu1 %v5635_v63, %s5256_s21 }
 0xbd2   : > { %4710 = vrot.lane.b32.xlu1 %v7427_v42, %s5257_s22 }
 0xbd3   : > { %2689 = vrot.lane.b32.xlu0 %v5637_v2, %s5256_s21 }
 0xbd6   : > { %4715 = vrot.lane.b32.xlu1 %v4714_v41, %s5258_s23 }
 0xbd8   : > { %v2556_v62 = vpop.xlane.xlu1 %2555 }
 0xbd9   : > { %v2572_v31 = vsub.f32 %v6659_v36, %v2556_v62  ;;  %v7437_v36 = vld [vmem:[#allocation33_spill] sm:$0xff] }
 0xbda   : > { %4720 = vrot.lane.b32.xlu1 %v4719_v19, %s5258_s23  ;;  %v7432_v19 = vld [vmem:[#allocation34_spill] sm:$0xff]  ;;  %v7439_v50 = vpack.i.bf16 %v7437_v36, %v7438_v44 }
 0xbdb   : > { %v7433_v1 = vpack.i.bf16 %v7431_v18, %v7432_v19  ;;  %v2603_v41 = vmul.f32 1.442695, %v2572_v31 }
 0xbdc   : > { %v2552_v63 = vpop.xlane.xlu1 %2551 }
 0xbdd   : > { %v2570_v2 = vsub.f32 %v6665_v26, %v2552_v63 }
 0xbde   : > { %4730 = vrot.lane.b32.xlu1 %v7430_v9, %s5257_s22 }
 0xbdf   : > { %v2599_v27 = vmul.f32 1.442695, %v2570_v2 }
 0xbe0   : > { %v2688_v24 = vpop.permute.xlu1 %2687 }
 0xbe1   : > { %4540 = vmatprep.subr.bf16.mxu0 %v2688_v24  ;;  %4639 = vmatprep.subr.bf16.mxu1 %v2688_v24  ;;  %5090 = vpow2.f32 %v2599_v27 }
 0xbe2   : > { %4740 = vrot.lane.b32.xlu1 %v4739_v25, %s5258_s23  ;;  %4541 = vmatpush3.bf16.msra.mxu0 %v2688_v24  ;;  %5092 = vpow2.f32 %v2603_v41  ;;  %v7436_v25 = vpack.i.bf16 %v7434_v29, %v7435_v3 }
 0xbe3   : > { %4647 = vmatpush3.bf16.msra.mxu1 %v2688_v24 }
 0xbe6   : > { %4750 = vrot.lane.b32.xlu1 %v7433_v1, %s5257_s22 }
 0xbeb   : > { %v6748_v26 = vpop.eup %5090 }
 0xbec   : > { %v6751_v37 = vpop.eup %5092 }
 0xbf2   : > { %2631 = vadd.xlane.f32.xlu0 %v6748_v26 }
 0xbf6   : > { %2635 = vadd.xlane.f32.xlu0 %v6751_v37 }
 0xc0c   : > { %4705 = vrot.lane.b32.xlu0 %v7436_v25, %s5257_s22 }
 0xc10   : > { %4725 = vrot.lane.b32.xlu0 %v7439_v50, %s5257_s22 }
 0xc14   : > { %4735 = vrot.lane.b32.xlu0 %v4734_v20, %s5258_s23 }
 0xc18   : > { %4745 = vrot.lane.b32.xlu0 %v7442_v61, %s5257_s22 }
 0xc2a   : > { %v2610_v13 = vpop.xlane.xlu1 %2609 }
 0xc2e   : > { %v2606_v0 = vpop.xlane.xlu1 %2605 }
 0xc2f   : > { %5094 = vrcp.f32 %v2606_v0 }
 0xc32   : > { %v2612_v58 = vpop.xlane.xlu1 %2611 }
 0xc36   : > { %v2608_v47 = vpop.xlane.xlu1 %2607  ;;  %v2618_v52 = vpop.xlane.xlu0 %2617 }
 0xc37   : > { %5096 = vrcp.f32 %v2608_v47 }
 0xc39   : > { %v5095_v38 = vpop.eup %5094 }
 0xc3a   : > { %v2616_v28 = vpop.xlane.xlu1 %2615  ;;  %v2614_v8 = vpop.xlane.xlu0 %2613  ;;  %v2653_v55 = vmul.f32 %v5095_v38, %v6674_v23 }
 0xc3b   : > { %5098 = vrcp.f32 %v2616_v28 }
 0xc3c   : > { %5100 = vrcp.f32 %v2614_v8 }
 0xc3d   : > { %5102 = vrcp.f32 %v2612_v58 }
 0xc3e   : > { %v2620_v39 = vpop.xlane.xlu0 %2619 }
 0xc3f   : > { %5104 = vrcp.f32 %v2620_v39 }
 0xc40   : > { %5106 = vrcp.f32 %v2610_v13 }
 0xc41   : > { %v5097_v53 = vpop.eup %5096  ;;  %5108 = vrcp.f32 %v2618_v52 }
 0xc42   : > { %v2622_v12 = vpop.xlane.xlu1 %2621  ;;  %v2626_v20 = vpop.xlane.xlu0 %2625  ;;  %v2654_v42 = vmul.f32 %v5097_v53, %v6682_v21 }
 0xc43   : > { %5110 = vrcp.f32 %v2622_v12  ;;  %v4826_v12 = vld [vmem:[%s7324_s5] sm:$0xff]  }
 0xc44   : > { %v2669_v62 = vpack.c.bf16 %v2654_v42, %v2653_v55 }
 0xc45   : > { %v5099_v63 = vpop.eup %5098 }
 0xc46   : > { %v5101_v56 = vpop.eup %5100  ;;  %4546 = vmatprep.mubr.bf16.mxu0 %v2669_v62  ;;  %v2634_v22 = vpop.xlane.xlu1 %2633  ;;  %v2658_v2 = vmul.f32 %v5099_v63, %v6690_v46 }
 0xc47   : > { %v2628_v9 = vpop.xlane.xlu0 %2627  ;;  %v2657_v24 = vmul.f32 %v5101_v56, %v6692_v5  ;;  %v5103_v21 = vpop.eup %5102 }
 0xc48   : > { %5112 = vrcp.f32 %v2628_v9  ;;  %v2656_v46 = vmul.f32 %v5103_v21, %v6677_v10 }
 0xc49   : > { %v2671_v31 = vpack.c.bf16 %v2658_v2, %v2657_v24  ;;  %v5105_v18 = vpop.eup %5104 }
 0xc4a   : > { %v2630_v27 = vpop.xlane.xlu1 %2629  ;;  %v5107_v1 = vpop.eup %5106  ;;  %v2660_v5 = vmul.f32 %v5105_v18, %v6697_v7 }
 0xc4b   : > { %v2624_v23 = vpop.xlane.xlu0 %2623  ;;  %4550 = vmatprep.mubr.bf16.mxu1 %v2671_v31  ;;  %v5109_v41 = vpop.eup %5108  ;;  %v2655_v3 = vmul.f32 %v5107_v1, %v6670_v6  ;;  %v7444_v1 = vld [vmem:[#allocation38_spill] sm:$0xff] }
 0xc4c   : > { %5114 = vrcp.f32 %v2624_v23  ;;  %v2659_v25 = vmul.f32 %v5109_v41, %v6684_v14 }
 0xc4d   : > { %5116 = vrcp.f32 %v2626_v20  ;;  %v5111_v36 = vpop.eup %5110  ;;  %v2670_v50 = vpack.c.bf16 %v2656_v46, %v2655_v3 }
 0xc4e   : > { %v2692_v29 = vpop.permute.xlu1 %2691  ;;  %v2672_v57 = vpack.c.bf16 %v2660_v5, %v2659_v25  ;;  %v2661_v61 = vmul.f32 %v5111_v36, %v6702_v4  ;;  %5118 = vrcp.f32 %v2630_v27 }
 0xc4f   : > { %v2690_v19 = vpop.permute.xlu0 %2689 }
 0xc50   : > { %4542 = vmatprep.subr.bf16.mxu0 %v2690_v19  ;;  %4640 = vmatprep.subr.bf16.mxu1 %v2690_v19 }
 0xc51   : > { %4543 = vmatpush3.bf16.msra.mxu0 %v2690_v19  ;;  %4648 = vmatpush3.bf16.msra.mxu1 %v2690_v19  ;;  %v7443_v19 = vld [vmem:[#allocation40_spill] sm:$0xff] }
 0xc52   : > { %4544 = vmatprep.subr.bf16.mxu0 %v2692_v29  ;;  %4641 = vmatprep.subr.bf16.mxu1 %v2692_v29  ;;  %v5113_v44 = vpop.eup %5112  ;;  %v7445_v41 = vpack.i.bf16 %v7443_v19, %v7444_v1  ;;  %v4711_v3 = vpop.permute.xlu1 %4710 }
 0xc53   : > { %v2664_v0 = vmul.f32 %v5113_v44, %v6706_v43 }
 0xc55   : > { %4545 = vmatpush3.bf16.msra.mxu0 %v2692_v29  ;;  %4649 = vmatpush3.bf16.msra.mxu1 %v2692_v29  ;;  %v7446_v29 = vld [vmem:[#allocation41_spill] sm:$0xff] }
 0xc56   : > { %v5115_v60 = vpop.eup %5114  ;;  %4562 = vmatprep.subr.bf16.mxu1 %v4826_v12  ;;  %v7448_v15 = vpack.i.bf16 %v7446_v29, %v7447_v51  ;;  %v4716_v25 = vpop.permute.xlu1 %4715 }
 0xc57   : > { %v2662_v10 = vmul.f32 %v5115_v60, %v6712_v17  ;;  %v5117_v7 = vpop.eup %5116  ;;  %v4712_v60 = vunpack.i.l.bf16 %v4711_v3 }
 0xc58   : > { %4547 = vmatmul.mubr.bf16.vlgmr.msra.gmra.mrb[80].mxu0 %v2670_v50  ;;  %4551 = vmatmul.mubr.bf16.vlgmr.msra.gmra.mrb[48].mxu1 %v2672_v57  ;;  %v2663_v6 = vmul.f32 %v5117_v7, %v6700_v33  ;;  %v5119_v52 = vpop.eup %5118  ;;  %v4713_v57 = vunpack.i.h.bf16 %v4711_v3 }
 0xc59   : > { %v2673_v13 = vpack.c.bf16 %v2662_v10, %v2661_v61  ;;  %v2665_v4 = vmul.f32 %v5119_v52, %v6714_v49  ;;  %4563 = vmatpush3.bf16.msra.mxu1 %v4826_v12  ;;  %v4827_v49 = vld [vmem:[%s7324_s5 + $0x8] sm:$0xff]   ;;  %v7451_v52 = vld [vmem:[#allocation13_spill] sm:$0xff] }
 0xc5a   : > { %v2674_v14 = vpack.c.bf16 %v2664_v0, %v2663_v6  ;;  %4564 = vmatprep.subr.bf16.mxu1 %v4827_v49  ;;  %v4721_v36 = vpop.permute.xlu1 %4720  ;;  %v7450_v6 = vld [vmem:[#allocation10_spill] sm:$0xff] }
 0xc5b   : > { %4554 = vmatprep.mubr.bf16.mxu1 %v2673_v13  ;;  %v4723_v61 = vunpack.i.h.bf16 %v4721_v36  ;;  %v4722_v10 = vunpack.i.l.bf16 %v4721_v36  ;;  %v7449_v13 = vld [vmem:[#allocation12_spill] sm:$0xff] }
 0xc5c   : > { %v2993_v0 = vsel %vm957_vm1, %v7449_v13, %v4713_v57 }
 0xc5d   : > { %4565 = vmatpush3.bf16.msra.mxu1 %v4827_v49 }
 0xc5e   : > { %v4731_v50 = vpop.permute.xlu1 %4730 }
 0xc5f   : > { %v4733_v12 = vunpack.i.h.bf16 %v4731_v50  ;;  %v4732_v49 = vunpack.i.l.bf16 %v4731_v50 }
 0xc60   : > { %4555 = vmatmul.mubr.bf16.gmra.mrb[52].mxu1 %v2674_v14  ;;  %v2992_v14 = vsel %vm957_vm1, %v7450_v6, %v4712_v60 }
 0xc62   : > { %v4741_v16 = vpop.permute.xlu1 %4740 }
 0xc66   : > { %v6816_v48 = vpop.permute.xlu1 %4750 }
 0xc67   : > { %v4752_v60 = vunpack.i.l.bf16 %v6816_v48 }
 0xc7f   : > { %v2632_v58 = vpop.xlane.xlu0 %2631 }
 0xc80   : > { %5120 = vrcp.f32 %v2632_v58  ;;  %v4718_v58 = vunpack.i.h.bf16 %v4716_v25 }
 0xc81   : > { %5122 = vrcp.f32 %v2634_v22 }
 0xc83   : > { %v2636_v47 = vpop.xlane.xlu0 %2635 }
 0xc84   : > { %5124 = vrcp.f32 %v2636_v47  ;;  %v4717_v47 = vunpack.i.l.bf16 %v4716_v25  ;;  %v7458_v25 = vld [vmem:[#allocation15_spill] sm:$0xff] }
 0xc87   : > { %v4706_v44 = vpop.permute.xlu0 %4705 }
 0xc88   : > { %v4708_v34 = vunpack.i.h.bf16 %v4706_v44 }
 0xc8a   : > { %v5121_v28 = vpop.eup %5120 }
 0xc8b   : > { %v2666_v17 = vmul.f32 %v5121_v28, %v6748_v26  ;;  %v5123_v8 = vpop.eup %5122  ;;  %v4726_v40 = vpop.permute.xlu0 %4725  ;;  %v2991_v28 = vsel %vm957_vm1, %v7451_v52, %v4708_v34 }
 0xc8c   : > { %v2667_v33 = vmul.f32 %v5123_v8, %v6708_v35 }
 0xc8d   : > { %v2675_v39 = vpack.c.bf16 %v2666_v17, %v2665_v4  ;;  %v7452_v4 = vld [vmem:[#allocation11_spill] sm:$0xff] }
 0xc8e   : > { %v5125_v43 = vpop.eup %5124 }
 0xc8f   : > { %4558 = vmatprep.mubr.bf16.mxu1 %v2675_v39  ;;  %v2668_v38 = vmul.f32 %v5125_v43, %v6751_v37  ;;  %v3009_v39 = vsel %vm3006_vm0, %v2992_v14, %v4722_v10  ;;  %v3010_v43 = vsel %vm3006_vm0, %v2993_v0, %v4723_v61 }
 0xc91   : > { %v2676_v53 = vpack.c.bf16 %v2668_v38, %v2667_v33 }
 0xc93   : > { %4559 = vmatmul.mubr.bf16.gmra.mrb[56].mxu1 %v2676_v53 }
 0xd2b   : > { %v4548_v26 = vpop.f32.mrb[80].mxu0  ;;  %v4552_v20 = vpop.f32.mrb[48].mxu1 }
 0xd2c   : > { %v2735_v55 = vpop.f32.mrb[81].mxu0  ;;  %v2751_v35 = vpop.f32.mrb[49].mxu1 }
 0xd2d   : > { %v4549_v42 = vpop.f32.mrb[82].mxu0  ;;  %v4553_v37 = vpop.f32.mrb[50].mxu1 }
 0xd2e   : > { %v4754_v62 = vpack.i.bf16 %v4549_v42, %v4548_v26  ;;  %v4774_v63 = vpack.i.bf16 %v4553_v37, %v4552_v20  ;;  %v2738_v56 = vpop.f32.mrb[83].mxu0  ;;  %v2754_v22 = vpop.f32.mrb[51].mxu1  ;;  %v3008_v37 = vsel %vm3006_vm0, %v2991_v28, %v4718_v58 }
 0xd2f   : > { %v4759_v9 = vpack.i.bf16 %v2738_v56, %v2735_v55  ;;  %v4779_v2 = vpack.i.bf16 %v2754_v22, %v2751_v35 }
 0xd30   : > { %4755 = vrot.lane.b32.xlu1 %v4754_v62, %s5259_s15  ;;  %v4742_v62 = vunpack.i.l.bf16 %v4741_v16 }
 0xd31   : > { %4760 = vrot.lane.b32.xlu0 %v4759_v9, %s5259_s15 }
 0xd33   : > { %v4556_v24 = vpop.f32.mrb[52].mxu1 }
 0xd34   : > { %v2767_v31 = vpop.f32.mrb[53].mxu1  ;;  %4770 = vrot.lane.b32.xlu1 %v4769_v11, %s5258_s23 }
 0xd35   : > { %v4557_v27 = vpop.f32.mrb[54].mxu1  ;;  %4765 = vrot.lane.b32.xlu0 %v4764_v59, %s5258_s23 }
 0xd36   : > { %v4794_v23 = vpack.i.bf16 %v4557_v27, %v4556_v24  ;;  %v2770_v21 = vpop.f32.mrb[55].mxu1  ;;  %v4728_v27 = vunpack.i.h.bf16 %v4726_v40 }
 0xd37   : > { %v4799_v18 = vpack.i.bf16 %v2770_v21, %v2767_v31  ;;  %v7453_v21 = vld [vmem:[#allocation14_spill] sm:$0xff] }
 0xd38   : > { %4775 = vrot.lane.b32.xlu1 %v4774_v63, %s5259_s15 }
 0xd39   : > { %4780 = vrot.lane.b32.xlu0 %v4779_v2, %s5259_s15  ;;  %v4743_v2 = vunpack.i.h.bf16 %v4741_v16 }
 0xd3c   : > { %4790 = vrot.lane.b32.xlu1 %v7445_v41, %s5257_s22  ;;  %v7455_v41 = vld [vmem:[#allocation16_spill] sm:$0xff] }
 0xd3d   : > { %4785 = vrot.lane.b32.xlu0 %v7448_v15, %s5257_s22  ;;  %v2997_v29 = vsel %vm957_vm1, %v7455_v41, %v4733_v12 }
 0xd40   : > { %4795 = vrot.lane.b32.xlu1 %v4794_v23, %s5259_s15  ;;  %v4727_v23 = vunpack.i.l.bf16 %v4726_v40 }
 0xd41   : > { %4800 = vrot.lane.b32.xlu0 %v4799_v18, %s5259_s15  ;;  %v2996_v18 = vsel %vm957_vm1, %v7453_v21, %v4732_v49 }
 0xd42   : > { %v3013_v51 = vsel %vm3006_vm0, %v2996_v18, %v4742_v62  ;;  %v2994_v36 = vsel %vm957_vm1, %v7458_v25, %v4727_v23 }
 0xd44   : > { %4810 = vrot.lane.b32.xlu1 %v4809_v45, %s5258_s23  ;;  %v4736_v45 = vpop.permute.xlu0 %4735 }
 0xd45   : > { %4805 = vrot.lane.b32.xlu0 %v4804_v54, %s5258_s23  ;;  %v4707_v54 = vunpack.i.l.bf16 %v4706_v44  ;;  %v4738_v19 = vunpack.i.h.bf16 %v4736_v45  ;;  %v4737_v1 = vunpack.i.l.bf16 %v4736_v45 }
 0xd47   : > { %v2990_v17 = vsel %vm957_vm1, %v7452_v4, %v4707_v54  ;;  %v3011_v40 = vsel %vm3006_vm0, %v2994_v36, %v4737_v1  ;;  %v7460_v4 = vld [vmem:[#allocation20_spill] sm:$0xff] }
 0xd48   : > { %v6818_v7 = vpop.permute.xlu0 %4745  ;;  %v3007_v42 = vsel %vm3006_vm0, %v2990_v17, %v4717_v47  ;;  %v7461_v17 = vld [vmem:[#allocation18_spill] sm:$0xff] }
 0xd49   : > { %v4748_v13 = vunpack.i.h.bf16 %v6818_v7  ;;  %v4747_v0 = vunpack.i.l.bf16 %v6818_v7 }
 0xd66   : > { %v4560_v32 = vpop.f32.mrb[56].mxu1 }
 0xd67   : > { %v2783_v11 = vpop.f32.mrb[57].mxu1 }
 0xd68   : > { %v4561_v30 = vpop.f32.mrb[58].mxu1 }
 0xd69   : > { %v4819_v59 = vpack.i.bf16 %v4561_v30, %v4560_v32  ;;  %v2786_v46 = vpop.f32.mrb[59].mxu1  ;;  %v3014_v32 = vsel %vm3006_vm0, %v2997_v29, %v4743_v2 }
 0xd6a   : > { %v4814_v5 = vpack.i.bf16 %v2786_v46, %v2783_v11  ;;  %v4753_v11 = vunpack.i.h.bf16 %v6816_v48 }
 0xd6b   : > { %4820 = vrot.lane.b32.xlu1 %v4819_v59, %s5259_s15 }
 0xd6c   : > { %4815 = vrot.lane.b32.xlu0 %v4814_v5, %s5259_s15  ;;  %v7457_v5 = vld [vmem:[#allocation17_spill] sm:$0xff]  ;;  %v3001_v48 = vsel %vm957_vm1, %v7460_v4, %v4753_v11 }
 0xd6d   : > { %v2995_v3 = vsel %vm957_vm1, %v7457_v5, %v4728_v27  ;;  %v7470_v5 = vld [vmem:[#allocation23_spill] sm:$0xff] }
 0xd6e   : > { %v3012_v16 = vsel %vm3006_vm0, %v2995_v3, %v4738_v19 }
 0xda2   : > { %v4756_v8 = vpop.permute.xlu1 %4755 }
 0xda3   : > { %v4758_v33 = vunpack.i.h.bf16 %v4756_v8  ;;  %v4757_v38 = vunpack.i.l.bf16 %v4756_v8  ;;  %v4761_v53 = vpop.permute.xlu0 %4760  ;;  %v3000_v8 = vsel %vm957_vm1, %v7461_v17, %v4752_v60 }
 0xda4   : > { %v4763_v26 = vunpack.i.h.bf16 %v4761_v53  ;;  %v4762_v20 = vunpack.i.l.bf16 %v4761_v53 }
 0xda5   : > { %v3027_v55 = vsel %vm3023_vm2, %v3010_v43, %v4758_v33  ;;  %v3026_v35 = vsel %vm3023_vm2, %v3009_v39, %v4757_v38  ;;  %v7463_v43 = vld [vmem:[#allocation21_spill] sm:$0xff]  ;;  %v7464_v33 = vld [vmem:[#allocation19_spill] sm:$0xff] }
 0xda6   : > { %v3041_v63 = vpack.c.bf16 %v3027_v55, %v3026_v35  ;;  %v3024_v56 = vsel %vm3023_vm2, %v3007_v42, %v4762_v20  ;;  %v3025_v22 = vsel %vm3023_vm2, %v3008_v37, %v4763_v26  ;;  %v4771_v9 = vpop.permute.xlu1 %4770  ;;  %v2999_v7 = vsel %vm957_vm1, %v7463_v43, %v4748_v13 }
 0xda7   : > { %v3040_v24 = vpack.c.bf16 %v3025_v22, %v3024_v56  ;;  %v4766_v31 = vpop.permute.xlu0 %4765  ;;  %v4773_v58 = vunpack.i.h.bf16 %v4771_v9  ;;  %v4772_v47 = vunpack.i.l.bf16 %v4771_v9  ;;  %v2998_v38 = vsel %vm957_vm1, %v7464_v33, %v4747_v0  ;;  %v5224_v33 = vld [vmem:[%s5346_s30 + $0x8] sm:$0xff] }
 0xda8   : > { %v4768_v52 = vunpack.i.h.bf16 %v4766_v31  ;;  %v4767_v28 = vunpack.i.l.bf16 %v4766_v31 }
 0xda9   : > { %4566 = vmatprep.mubr.msk.bf16.mxu1 %vm7454_vm3, %v3040_v24  ;;  %v3018_v26 = vsel %vm3006_vm0, %v3001_v48, %v4773_v58  ;;  %v3017_v20 = vsel %vm3006_vm0, %v3000_v8, %v4772_v47  ;;  %v5222_v48 = vld [vmem:[%s5346_s30] sm:$0xff] }
 0xdaa   : > { %v4776_v15 = vpop.permute.xlu1 %4775  ;;  %4567 = vmatmul.mubr.msk.bf16.vlgmr.msra.gmra.mrb[60].mxu1 %vm7456_vm6, %v3041_v63  ;;  %v3015_v42 = vsel %vm3006_vm0, %v2998_v38, %v4767_v28  ;;  %v3016_v37 = vsel %vm3006_vm0, %v2999_v7, %v4768_v52 }
 0xdab   : > { %v4778_v30 = vunpack.i.h.bf16 %v4776_v15  ;;  %v4777_v59 = vunpack.i.l.bf16 %v4776_v15  ;;  %v4781_v46 = vpop.permute.xlu0 %4780 }
 0xdac   : > { %v4783_v44 = vunpack.i.h.bf16 %v4781_v46  ;;  %v4782_v50 = vunpack.i.l.bf16 %v4781_v46 }
 0xdad   : > { %v3031_v45 = vsel %vm3023_vm2, %v3014_v32, %v4778_v30  ;;  %v3030_v57 = vsel %vm3023_vm2, %v3013_v51, %v4777_v59  ;;  %v7467_v51 = vld [vmem:[#allocation24_spill] sm:$0xff]  ;;  %v7468_v32 = vld [vmem:[#allocation22_spill] sm:$0xff]  ;;  %v7469_v59 = vld [vmem:[#allocation25_spill] sm:$0xff] }
 0xdae   : > { %v3043_v34 = vpack.c.bf16 %v3031_v45, %v3030_v57  ;;  %v3028_v54 = vsel %vm3023_vm2, %v3011_v40, %v4782_v50  ;;  %v3029_v61 = vsel %vm3023_vm2, %v3012_v16, %v4783_v44  ;;  %v4791_v10 = vpop.permute.xlu1 %4790 }
 0xdaf   : > { %v3042_v6 = vpack.c.bf16 %v3029_v61, %v3028_v54  ;;  %v4786_v14 = vpop.permute.xlu0 %4785  ;;  %v4793_v31 = vunpack.i.h.bf16 %v4791_v10  ;;  %v4792_v27 = vunpack.i.l.bf16 %v4791_v10 }
 0xdb0   : > { %v4788_v21 = vunpack.i.h.bf16 %v4786_v14  ;;  %v4787_v18 = vunpack.i.l.bf16 %v4786_v14 }
 0xdb1   : > { %4570 = vmatprep.mubr.msk.bf16.mxu1 %vm7459_vm7, %v3042_v6  ;;  %v3005_v15 = vsel %vm957_vm1, %v7467_v51, %v4793_v31  ;;  %v3004_v11 = vsel %vm957_vm1, %v7468_v32, %v4792_v27  ;;  %v6899_v6 = vld [vmem:[%s7325_s6] ss:$0 sm:$0xff] }
 0xdb2   : > { %v4796_v39 = vpop.permute.xlu1 %4795  ;;  %4571 = vmatmul.mubr.msk.bf16.gmra.mrb[64].mxu1 %vm7462_vm8, %v3043_v34  ;;  %v3003_v46 = vsel %vm957_vm1, %v7469_v59, %v4788_v21  ;;  %v3002_v3 = vsel %vm957_vm1, %v7470_v5, %v4787_v18  ;;  %vm7471_vm1 = vmmov %vm7454_vm3 }
 0xdb3   : > { %v4798_v53 = vunpack.i.h.bf16 %v4796_v39  ;;  %v4797_v12 = vunpack.i.l.bf16 %v4796_v39  ;;  %v4801_v49 = vpop.permute.xlu0 %4800  ;;  %vm7472_vm11 = vmmov %vm7471_vm1  ;;  %v5223_v39 = vld [vmem:[%s5346_s30 + $0x10] sm:$0xff] }
 0xdb4   : > { %v4803_v55 = vunpack.i.h.bf16 %v4801_v49  ;;  %v4802_v35 = vunpack.i.l.bf16 %v4801_v49  ;;  %vm7473_vm13 = vmmov %vm7471_vm1 }
 0xdb5   : > { %v3034_v62 = vsel %vm3023_vm2, %v3017_v20, %v4797_v12  ;;  %v3035_v63 = vsel %vm3023_vm2, %v3018_v26, %v4798_v53  ;;  %vm7474_vm14 = vmmov %vm7471_vm1  ;;  %v5225_v20 = vld [vmem:[%s5346_s30 + $0x18] sm:$0xff] }
 0xdb6   : > { %v3045_v56 = vpack.c.bf16 %v3035_v63, %v3034_v62  ;;  %v3032_v22 = vsel %vm3023_vm2, %v3015_v42, %v4802_v35  ;;  %v3033_v9 = vsel %vm3023_vm2, %v3016_v37, %v4803_v55  ;;  %v4811_v24 = vpop.permute.xlu1 %4810  ;;  %vm7475_vm15 = vmmov %vm7471_vm1 }
 0xdb7   : > { %v3044_v2 = vpack.c.bf16 %v3033_v9, %v3032_v22  ;;  %v4806_v23 = vpop.permute.xlu0 %4805  ;;  %v4813_v19 = vunpack.i.h.bf16 %v4811_v24  ;;  %v4812_v1 = vunpack.i.l.bf16 %v4811_v24  ;;  %v5226_v9 = vld [vmem:[%s5346_s30 + $0x20] sm:$0xff]  ;;  %v5227_v24 = vld [vmem:[%s5346_s30 + $0x28] sm:$0xff]  ;;  %vm7476_vm12 = vmmov %vm7471_vm1 }
 0xdb8   : > { %v4808_v41 = vunpack.i.h.bf16 %v4806_v23  ;;  %v4807_v29 = vunpack.i.l.bf16 %v4806_v23  ;;  %v5228_v23 = vld [vmem:[%s5346_s30 + $0x38] sm:$0xff]  ;;  %vm7477_vm4 = vmmov %vm7471_vm1 }
 0xdb9   : > { %4574 = vmatprep.mubr.msk.bf16.mxu1 %vm7465_vm9, %v3044_v2  ;;  %v3021_v50 = vsel %vm3006_vm0, %v3004_v11, %v4812_v1  ;;  %v3022_v40 = vsel %vm3006_vm0, %v3005_v15, %v4813_v19  ;;  %vm7478_vm5 = vmmov %vm7471_vm1 }
 0xdba   : > { %4575 = vmatmul.mubr.msk.bf16.gmra.mrb[68].mxu1 %vm7466_vm10, %v3045_v56  ;;  %v3019_v57 = vsel %vm3006_vm0, %v3002_v3, %v4807_v29  ;;  %v3020_v60 = vsel %vm3006_vm0, %v3003_v46, %v4808_v41  ;;  %v5229_v41 = vld [vmem:[%s5346_s30 + $0x30] sm:$0xff]  ;;  %vm7479_vm0 = vmmov %vm7471_vm1  ;;  %v5230_v3 = vld [vmem:[%s5346_s30 + $0x40] sm:$0xff] }
 0xdbb   : > { %vm7481_vm3 = vmmov %vm7479_vm0 }
 0xdbc   : > { %vm7482_vm6 = vmmov %vm7479_vm0 }
 0xdbd   : > { %vm7483_vm7 = vmmov %vm7479_vm0 }
 0xdbe   : > { %vm7484_vm8 = vmmov %vm7479_vm0 }
 0xdbf   : > { %vm7485_vm9 = vmmov %vm7479_vm0 }
 0xdc0   : > { %vm7486_vm10 = vmmov %vm7479_vm0 }
 0xddd   : > { %v4821_v30 = vpop.permute.xlu1 %4820 }
 0xdde   : > { %v4823_v25 = vunpack.i.h.bf16 %v4821_v30  ;;  %v4822_v36 = vunpack.i.l.bf16 %v4821_v30  ;;  %v4816_v44 = vpop.permute.xlu0 %4815 }
 0xddf   : > { %v4818_v16 = vunpack.i.h.bf16 %v4816_v44  ;;  %v4817_v45 = vunpack.i.l.bf16 %v4816_v44 }
 0xde0   : > { %v3039_v34 = vsel %vm3023_vm2, %v3022_v40, %v4823_v25  ;;  %v3038_v54 = vsel %vm3023_vm2, %v3021_v50, %v4822_v36  ;;  %v5231_v36 = vld [vmem:[%s5346_s30 + $0x48] sm:$0xff]  ;;  %v5232_v40 = vld [vmem:[%s5346_s30 + $0x58] sm:$0xff] }
 0xde1   : > { %v3047_v61 = vpack.c.bf16 %v3039_v34, %v3038_v54  ;;  %v3036_v10 = vsel %vm3023_vm2, %v3019_v57, %v4817_v45  ;;  %v3037_v13 = vsel %vm3023_vm2, %v3020_v60, %v4818_v16  ;;  %vm7480_vm2 = vmmov %vm7479_vm0  ;;  %v5233_v57 = vld [vmem:[%s5346_s30 + $0x50] sm:$0xff] }
 0xde2   : > { %v3046_v0 = vpack.c.bf16 %v3037_v13, %v3036_v10 }
 0xde4   : > { %4578 = vmatprep.mubr.msk.bf16.mxu1 %vm7471_vm1, %v3046_v0  ;;  %vm7487_vm1 = vmmov %vm7479_vm0 }
 0xde5   : > { %4579 = vmatmul.mubr.msk.bf16.gmra.mrb[72].mxu1 %vm7472_vm11, %v3047_v61  ;;  %vm7488_vm11 = vmmov %vm7479_vm0 }
 0xe7d   : > { %v4568_v14 = vpop.f32.mrb[60].mxu1 }
 0xe7e   : > { %v3129_v58 = vpop.f32.mrb[61].mxu1  ;;  %v3138_v47 = vadd.f32 %v4568_v14, %v6899_v6 }
 0xe7f   : > { %v3130_v52 = vadd.f32 %v6899_v6, %v3129_v58  ;;  %v4569_v28 = vpop.f32.mrb[62].mxu1 }
 0xe80   : > { %v3132_v4 = vpop.f32.mrb[63].mxu1  ;;  %v6908_v43 = vadd.f32 %v5223_v39, %v3138_v47  ;;  %v3141_v7 = vadd.f32 %v4569_v28, %v6899_v6  ;;  %v5234_v28 = vld [vmem:[%s5346_s30 + $0x60] sm:$0xff] }
 0xe81   : > { %v6904_v17 = vadd.f32 %v5222_v48, %v3130_v52  ;;  %v3133_v8 = vadd.f32 %v6899_v6, %v3132_v4 }
 0xe82   : > { %v6919_v55 = vadd.f32 %v5225_v20, %v3141_v7  ;;  %v3214_v37 = vsel %vm7475_vm15, %v6908_v43, 0.0  ;;  %v5236_v7 = vld [vmem:[%s5346_s30 + $0x68] sm:$0xff]  ;;  %vm7491_vm15 = vmmov %vm7479_vm0 }
 0xe83   : > { %v6912_v38 = vadd.f32 %v5224_v33, %v3133_v8  ;;  %v3208_v53 = vsel %vm7473_vm13, %v6904_v17, 0.0  ;;  %v5235_v8 = vld [vmem:[%s5346_s30 + $0x70] sm:$0xff]  ;;  %vm7489_vm13 = vmmov %vm7479_vm0 }
 0xe84   : > { %3209 = vadd.xlane.f32.xlu0 %v3208_v53  ;;  %v3217_v27 = vsel %vm7476_vm12, %v6919_v55, 0.0  ;;  %vm7492_vm12 = vmmov %vm7479_vm0 }
 0xe85   : > { %v4572_v12 = vpop.f32.mrb[64].mxu1  ;;  %v3211_v49 = vsel %vm7474_vm14, %v6912_v38, 0.0  ;;  %vm7490_vm14 = vmmov %vm7479_vm0 }
 0xe86   : > { %v3145_v26 = vpop.f32.mrb[65].mxu1  ;;  %3212 = vadd.xlane.f32.xlu1 %v3211_v49  ;;  %v3154_v22 = vadd.f32 %v4572_v12, %v6899_v6  ;;  %v5237_v12 = vld [vmem:[%s5346_s30 + $0x78] sm:$0xff] }
 0xe87   : > { %v3146_v35 = vadd.f32 %v6899_v6, %v3145_v26  ;;  %v4573_v42 = vpop.f32.mrb[66].mxu1 }
 0xe88   : > { %v3148_v62 = vpop.f32.mrb[67].mxu1  ;;  %3215 = vadd.xlane.f32.xlu0 %v3214_v37  ;;  %v3157_v63 = vadd.f32 %v4573_v42, %v6899_v6  ;;  %v6941_v29 = vadd.f32 %v5229_v41, %v3154_v22 }
 0xe89   : > { %v3149_v56 = vadd.f32 %v6899_v6, %v3148_v62  ;;  %v6928_v2 = vadd.f32 %v5226_v9, %v3146_v35 }
 0xe8a   : > { %v6936_v21 = vadd.f32 %v5228_v23, %v3157_v63  ;;  %v3226_v50 = vsel %vm7480_vm2, %v6941_v29, 0.0  ;;  %vm7495_vm2 = vmmov %vm7479_vm0 }
 0xe8b   : > { %v6931_v31 = vadd.f32 %v5227_v24, %v3149_v56  ;;  %v3220_v32 = vsel %vm7478_vm5, %v6928_v2, 0.0  ;;  %vm7494_vm5 = vmmov %vm7479_vm0 }
 0xe8c   : > { %3218 = vadd.xlane.f32.xlu0 %v3217_v27  ;;  %v3229_v46 = vsel %vm7479_vm0, %v6936_v21, 0.0 }
 0xe8d   : > { %v4576_v18 = vpop.f32.mrb[68].mxu1  ;;  %v3223_v19 = vsel %vm7477_vm4, %v6931_v31, 0.0  ;;  %vm7493_vm4 = vmmov %vm7479_vm0 }
 0xe8e   : > { %v3161_v1 = vpop.f32.mrb[69].mxu1  ;;  %3224 = vadd.xlane.f32.xlu1 %v3223_v19  ;;  %v3170_v5 = vadd.f32 %v4576_v18, %v6899_v6 }
 0xe8f   : > { %v3162_v51 = vadd.f32 %v6899_v6, %v3161_v1  ;;  %v4577_v15 = vpop.f32.mrb[70].mxu1 }
 0xe90   : > { %v3164_v11 = vpop.f32.mrb[71].mxu1  ;;  %3221 = vadd.xlane.f32.xlu0 %v3220_v32  ;;  %v3173_v30 = vadd.f32 %v4577_v15, %v6899_v6  ;;  %v6965_v60 = vadd.f32 %v5233_v57, %v3170_v5 }
 0xe91   : > { %v3165_v59 = vadd.f32 %v6899_v6, %v3164_v11  ;;  %v6952_v25 = vadd.f32 %v5230_v3, %v3162_v51 }
 0xe92   : > { %3230 = vadd.xlane.f32.xlu1 %v3229_v46  ;;  %v6960_v16 = vadd.f32 %v5232_v40, %v3173_v30  ;;  %v3238_v61 = vsel %vm7484_vm8, %v6965_v60, 0.0  ;;  %vm7499_vm8 = vmmov %vm7479_vm0 }
 0xe93   : > { %v6955_v44 = vadd.f32 %v5231_v36, %v3165_v59  ;;  %v3232_v34 = vsel %vm7482_vm6, %v6952_v25, 0.0  ;;  %vm7497_vm6 = vmmov %vm7479_vm0 }
 0xe94   : > { %3227 = vadd.xlane.f32.xlu0 %v3226_v50  ;;  %v3241_v54 = vsel %vm7483_vm7, %v6960_v16, 0.0  ;;  %vm7498_vm7 = vmmov %vm7479_vm0 }
 0xe95   : > { %v3235_v45 = vsel %vm7481_vm3, %v6955_v44, 0.0  ;;  %vm7496_vm3 = vmmov %vm7479_vm0 }
 0xe96   : > { %3236 = vadd.xlane.f32.xlu1 %v3235_v45 }
 0xe98   : > { %3233 = vadd.xlane.f32.xlu0 %v3232_v34 }
 0xe9a   : > { %3242 = vadd.xlane.f32.xlu1 %v3241_v54 }
 0xe9c   : > { %3239 = vadd.xlane.f32.xlu0 %v3238_v61 }
 0xeb8   : > { %v4580_v10 = vpop.f32.mrb[72].mxu1 }
 0xeb9   : > { %v3186_v13 = vadd.f32 %v4580_v10, %v6899_v6  ;;  %v3177_v0 = vpop.f32.mrb[73].mxu1 }
 0xeba   : > { %v3178_v14 = vadd.f32 %v6899_v6, %v3177_v0  ;;  %v4581_v58 = vpop.f32.mrb[74].mxu1 }
 0xebb   : > { %v3189_v47 = vadd.f32 %v4581_v58, %v6899_v6  ;;  %v3180_v52 = vpop.f32.mrb[75].mxu1  ;;  %v6981_v39 = vadd.f32 %v5235_v8, %v3186_v13 }
 0xebc   : > { %v6977_v4 = vadd.f32 %v5234_v28, %v3178_v14  ;;  %v3181_v48 = vadd.f32 %v6899_v6, %v3180_v52 }
 0xebd   : > { %v6989_v49 = vadd.f32 %v5237_v12, %v3189_v47  ;;  %v3250_v6 = vsel %vm7487_vm1, %v6981_v39, 0.0  ;;  %vm7502_vm1 = vmmov %vm7479_vm0 }
 0xebe   : > { %v6984_v33 = vadd.f32 %v5236_v7, %v3181_v48  ;;  %v3244_v53 = vsel %vm7485_vm9, %v6977_v4, 0.0  ;;  %vm7500_vm9 = vmmov %vm7479_vm0 }
 0xebf   : > { %3245 = vadd.xlane.f32.xlu0 %v3244_v53  ;;  %v3253_v20 = vsel %vm7488_vm11, %v6989_v49, 0.0  ;;  %vm7503_vm11 = vmmov %vm7479_vm0 }
 0xec0   : > { %v3247_v26 = vsel %vm7486_vm10, %v6984_v33, 0.0  ;;  %vm7501_vm10 = vmmov %vm7479_vm0 }
 0xec1   : > { %3248 = vadd.xlane.f32.xlu1 %v3247_v26 }
 0xec3   : > { %3251 = vadd.xlane.f32.xlu0 %v3250_v6 }
 0xec5   : > { %3254 = vadd.xlane.f32.xlu1 %v3253_v20 }
 0xf11   : > { %v3210_v35 = vpop.xlane.xlu0 %3209 }
 0xf12   : > { %v3256_v42 = vmul.f32 0.03125, %v3210_v35 }
 0xf13   : > { %v3213_v37 = vpop.xlane.xlu1 %3212 }
 0xf14   : > { %v6998_v62 = vsub.f32 %v6904_v17, %v3256_v42  ;;  %v3257_v63 = vmul.f32 0.03125, %v3213_v37 }
 0xf15   : > { %v3216_v56 = vpop.xlane.xlu0 %3215 }
 0xf16   : > { %v7001_v22 = vsub.f32 %v6912_v38, %v3257_v63  ;;  %v3258_v9 = vmul.f32 0.03125, %v3216_v56  ;;  %v3288_v24 = vmul.f32 %v6998_v62, %v6998_v62 }
 0xf18   : > { %v7006_v27 = vsub.f32 %v6908_v43, %v3258_v9  ;;  %v3304_v23 = vsel %vm7489_vm13, %v3288_v24, 0.0  ;;  %v3289_v18 = vmul.f32 %v7001_v22, %v7001_v22  ;;  %vm7504_vm13 = vmmov %vm7479_vm0 }
 0xf19   : > { %3305 = vadd.xlane.f32.xlu0 %v3304_v23  ;;  %v3219_v19 = vpop.xlane.xlu0 %3218 }
 0xf1a   : > { %v3259_v1 = vmul.f32 0.03125, %v3219_v19  ;;  %v3307_v41 = vsel %vm7490_vm14, %v3289_v18, 0.0  ;;  %v3290_v51 = vmul.f32 %v7006_v27, %v7006_v27  ;;  %vm7505_vm14 = vmmov %vm7479_vm0 }
 0xf1b   : > { %3308 = vadd.xlane.f32.xlu1 %v3307_v41  ;;  %v3225_v15 = vpop.xlane.xlu1 %3224 }
 0xf1c   : > { %v7015_v32 = vsub.f32 %v6919_v55, %v3259_v1  ;;  %v3261_v11 = vmul.f32 0.03125, %v3225_v15  ;;  %v3310_v30 = vsel %vm7491_vm15, %v3290_v51, 0.0  ;;  %v4828_v51 = vld [vmem:[%s7328_s9] sm:$0xff]   ;;  %v4829_v15 = vld [vmem:[%s7328_s9 + $0x8] sm:$0xff]   ;;  %vm7506_vm15 = vmmov %vm7479_vm0 }
 0xf1d   : > { %3311 = vadd.xlane.f32.xlu0 %v3310_v30  ;;  %v3222_v59 = vpop.xlane.xlu0 %3221  ;;  %4582 = vmatprep.subr.bf16.mxu0 %v4828_v51 }
 0xf1e   : > { %v7019_v46 = vsub.f32 %v6931_v31, %v3261_v11  ;;  %v3260_v5 = vmul.f32 0.03125, %v3222_v59  ;;  %v3291_v3 = vmul.f32 %v7015_v32, %v7015_v32  ;;  %4583 = vmatpush3.bf16.msra.mxu0 %v4828_v51 }
 0xf1f   : > { %v3231_v36 = vpop.xlane.xlu1 %3230  ;;  %4584 = vmatprep.subr.bf16.mxu0 %v4829_v15 }
 0xf20   : > { %v7024_v50 = vsub.f32 %v6928_v2, %v3260_v5  ;;  %v3263_v40 = vmul.f32 0.03125, %v3231_v36  ;;  %v3313_v45 = vsel %vm7492_vm12, %v3291_v3, 0.0  ;;  %v3293_v57 = vmul.f32 %v7019_v46, %v7019_v46  ;;  %vm7507_vm12 = vmmov %vm7479_vm0 }
 0xf21   : > { %3314 = vadd.xlane.f32.xlu1 %v3313_v45  ;;  %v3228_v34 = vpop.xlane.xlu0 %3227 }
 0xf22   : > { %v7030_v54 = vsub.f32 %v6936_v21, %v3263_v40  ;;  %v3262_v61 = vmul.f32 0.03125, %v3228_v34  ;;  %v3292_v10 = vmul.f32 %v7024_v50, %v7024_v50  ;;  %v3319_v0 = vsel %vm7493_vm4, %v3293_v57, 0.0  ;;  %4585 = vmatpush3.bf16.msra.mxu0 %v4829_v15  ;;  %vm7508_vm4 = vmmov %vm7479_vm0 }
 0xf23   : > { %v3237_v13 = vpop.xlane.xlu1 %3236 }
 0xf24   : > { %v7036_v14 = vsub.f32 %v6941_v29, %v3262_v61  ;;  %v3265_v58 = vmul.f32 0.03125, %v3237_v13  ;;  %v3316_v47 = vsel %vm7494_vm5, %v3292_v10, 0.0  ;;  %v3295_v52 = vmul.f32 %v7030_v54, %v7030_v54  ;;  %vm7509_vm5 = vmmov %vm7479_vm0 }
 0xf25   : > { %3320 = vadd.xlane.f32.xlu1 %v3319_v0  ;;  %3317 = vadd.xlane.f32.xlu0 %v3316_v47  ;;  %v3234_v28 = vpop.xlane.xlu0 %3233 }
 0xf26   : > { %v7042_v48 = vsub.f32 %v6955_v44, %v3265_v58  ;;  %v3264_v8 = vmul.f32 0.03125, %v3234_v28  ;;  %v3294_v7 = vmul.f32 %v7036_v14, %v7036_v14  ;;  %v3325_v12 = vsel %vm7479_vm0, %v3295_v52, 0.0 }
 0xf27   : > { %v3243_v53 = vpop.xlane.xlu1 %3242 }
 0xf28   : > { %v7048_v26 = vsub.f32 %v6952_v25, %v3264_v8  ;;  %v3267_v6 = vmul.f32 0.03125, %v3243_v53  ;;  %v3322_v20 = vsel %vm7495_vm2, %v3294_v7, 0.0  ;;  %v3297_v35 = vmul.f32 %v7042_v48, %v7042_v48  ;;  %vm7510_vm2 = vmmov %vm7479_vm0 }
 0xf29   : > { %3326 = vadd.xlane.f32.xlu1 %v3325_v12  ;;  %3323 = vadd.xlane.f32.xlu0 %v3322_v20  ;;  %v3240_v42 = vpop.xlane.xlu0 %3239 }
 0xf2a   : > { %v7054_v37 = vsub.f32 %v6960_v16, %v3267_v6  ;;  %v3266_v63 = vmul.f32 0.03125, %v3240_v42  ;;  %v3296_v56 = vmul.f32 %v7048_v26, %v7048_v26  ;;  %v3331_v24 = vsel %vm7496_vm3, %v3297_v35, 0.0  ;;  %vm7511_vm3 = vmmov %vm7479_vm0 }
 0xf2c   : > { %v7059_v9 = vsub.f32 %v6965_v60, %v3266_v63  ;;  %v3328_v23 = vsel %vm7497_vm6, %v3296_v56, 0.0  ;;  %v3299_v18 = vmul.f32 %v7054_v37, %v7054_v37  ;;  %vm7512_vm6 = vmmov %vm7479_vm0 }
 0xf2d   : > { %3332 = vadd.xlane.f32.xlu1 %v3331_v24  ;;  %3329 = vadd.xlane.f32.xlu0 %v3328_v23 }
 0xf2e   : > { %v3298_v19 = vmul.f32 %v7059_v9, %v7059_v9  ;;  %v3337_v1 = vsel %vm7498_vm7, %v3299_v18, 0.0  ;;  %vm7513_vm7 = vmmov %vm7479_vm0 }
 0xf30   : > { %v3334_v41 = vsel %vm7499_vm8, %v3298_v19, 0.0  ;;  %vm7514_vm8 = vmmov %vm7479_vm0 }
 0xf31   : > { %3338 = vadd.xlane.f32.xlu1 %v3337_v1  ;;  %3335 = vadd.xlane.f32.xlu0 %v3334_v41 }
 0xf4c   : > { %v3246_v11 = vpop.xlane.xlu0 %3245 }
 0xf4d   : > { %v3268_v30 = vmul.f32 0.03125, %v3246_v11 }
 0xf4e   : > { %v3249_v59 = vpop.xlane.xlu1 %3248 }
 0xf4f   : > { %v7076_v5 = vsub.f32 %v6977_v4, %v3268_v30  ;;  %v3269_v3 = vmul.f32 0.03125, %v3249_v59  ;;  %v7102_v30 = vld [vmem:[%s7326_s7] ss:$0 sm:$0xff] }
 0xf50   : > { %v3252_v36 = vpop.xlane.xlu0 %3251 }
 0xf51   : > { %v7079_v40 = vsub.f32 %v6984_v33, %v3269_v3  ;;  %v3270_v45 = vmul.f32 0.03125, %v3252_v36  ;;  %v3300_v57 = vmul.f32 %v7076_v5, %v7076_v5 }
 0xf52   : > { %v3255_v34 = vpop.xlane.xlu1 %3254 }
 0xf53   : > { %v7084_v61 = vsub.f32 %v6981_v39, %v3270_v45  ;;  %v3271_v10 = vmul.f32 0.03125, %v3255_v34  ;;  %v3340_v13 = vsel %vm7500_vm9, %v3300_v57, 0.0  ;;  %v3301_v0 = vmul.f32 %v7079_v40, %v7079_v40  ;;  %vm7515_vm9 = vmmov %vm7479_vm0 }
 0xf54   : > { %3341 = vadd.xlane.f32.xlu0 %v3340_v13 }
 0xf55   : > { %v7090_v58 = vsub.f32 %v6989_v49, %v3271_v10  ;;  %v3343_v47 = vsel %vm7501_vm10, %v3301_v0, 0.0  ;;  %v3302_v52 = vmul.f32 %v7084_v61, %v7084_v61  ;;  %vm7516_vm10 = vmmov %vm7479_vm0 }
 0xf56   : > { %3344 = vadd.xlane.f32.xlu1 %v3343_v47 }
 0xf57   : > { %v3346_v28 = vsel %vm7502_vm1, %v3302_v52, 0.0  ;;  %v3303_v8 = vmul.f32 %v7090_v58, %v7090_v58  ;;  %vm7517_vm1 = vmmov %vm7479_vm0 }
 0xf58   : > { %3347 = vadd.xlane.f32.xlu0 %v3346_v28 }
 0xf59   : > { %v3349_v7 = vsel %vm7503_vm11, %v3303_v8, 0.0  ;;  %vm7518_vm11 = vmmov %vm7479_vm0 }
 0xf5a   : > { %3350 = vadd.xlane.f32.xlu1 %v3349_v7  ;;  %v7110_v7 = vld [vmem:[%s7327_s8] ss:$0 sm:$0xff] }
 0xfa6   : > { %v3306_v53 = vpop.xlane.xlu0 %3305 }
 0xfa7   : > { %v3352_v12 = vmul.f32 0.03125, %v3306_v53 }
 0xfa8   : > { %v3309_v6 = vpop.xlane.xlu1 %3308 }
 0xfa9   : > { %v3368_v20 = vadd.f32 1e-05, %v3352_v12  ;;  %v3353_v35 = vmul.f32 0.03125, %v3309_v6 }
 0xfaa   : > { %v3312_v42 = vpop.xlane.xlu0 %3311 }
 0xfab   : > { %5126 = vrsqrt.f32 %v3368_v20  ;;  %v3369_v63 = vadd.f32 1e-05, %v3353_v35  ;;  %v3354_v56 = vmul.f32 0.03125, %v3312_v42 }
 0xfad   : > { %5128 = vrsqrt.f32 %v3369_v63  ;;  %v3370_v24 = vadd.f32 1e-05, %v3354_v56 }
 0xfae   : > { %v3315_v23 = vpop.xlane.xlu1 %3314 }
 0xfaf   : > { %5130 = vrsqrt.f32 %v3370_v24  ;;  %v3355_v18 = vmul.f32 0.03125, %v3315_v23 }
 0xfb1   : > { %v3371_v19 = vadd.f32 1e-05, %v3355_v18 }
 0xfb2   : > { %v3321_v1 = vpop.xlane.xlu1 %3320  ;;  %v3318_v41 = vpop.xlane.xlu0 %3317 }
 0xfb3   : > { %5132 = vrsqrt.f32 %v3371_v19  ;;  %v3357_v51 = vmul.f32 0.03125, %v3321_v1  ;;  %v3356_v15 = vmul.f32 0.03125, %v3318_v41 }
 0xfb5   : > { %v5127_v11 = vpop.eup %5126  ;;  %v3373_v59 = vadd.f32 1e-05, %v3357_v51  ;;  %v3372_v3 = vadd.f32 1e-05, %v3356_v15 }
 0xfb6   : > { %v3400_v36 = vmul.f32 %v5127_v11, %v6998_v62  ;;  %v3327_v45 = vpop.xlane.xlu1 %3326  ;;  %v3324_v57 = vpop.xlane.xlu0 %3323 }
 0xfb7   : > { %v5129_v34 = vpop.eup %5128  ;;  %5134 = vrsqrt.f32 %v3373_v59  ;;  %v3359_v10 = vmul.f32 0.03125, %v3327_v45  ;;  %v3358_v13 = vmul.f32 0.03125, %v3324_v57 }
 0xfb8   : > { %v3401_v0 = vmul.f32 %v5129_v34, %v7001_v22  ;;  %5136 = vrsqrt.f32 %v3372_v3  ;;  %v3423_v47 = vmul.f32 %v7102_v30, %v3400_v36 }
 0xfb9   : > { %v5131_v52 = vpop.eup %5130  ;;  %v3375_v28 = vadd.f32 1e-05, %v3359_v10  ;;  %v3374_v8 = vadd.f32 1e-05, %v3358_v13 }
 0xfba   : > { %v3402_v62 = vmul.f32 %v5131_v52, %v7006_v27  ;;  %v3333_v53 = vpop.xlane.xlu1 %3332  ;;  %v3330_v12 = vpop.xlane.xlu0 %3329  ;;  %v3424_v6 = vmul.f32 %v7102_v30, %v3401_v0  ;;  %v3446_v35 = vadd.f32 %v7110_v7, %v3423_v47 }
 0xfbb   : > { %5138 = vrsqrt.f32 %v3375_v28  ;;  %v3361_v20 = vmul.f32 0.03125, %v3333_v53  ;;  %v3360_v22 = vmul.f32 0.03125, %v3330_v12 }
 0xfbc   : > { %5140 = vrsqrt.f32 %v3374_v8  ;;  %v3447_v42 = vadd.f32 %v7110_v7, %v3424_v6  ;;  %v3425_v23 = vmul.f32 %v7102_v30, %v3402_v62 }
 0xfbd   : > { %v5133_v63 = vpop.eup %5132  ;;  %v3377_v56 = vadd.f32 1e-05, %v3361_v20  ;;  %v3376_v24 = vadd.f32 1e-05, %v3360_v22 }
 0xfbe   : > { %v3403_v18 = vmul.f32 %v5133_v63, %v7015_v32  ;;  %v3339_v27 = vpop.xlane.xlu1 %3338  ;;  %v3336_v19 = vpop.xlane.xlu0 %3335  ;;  %v3462_v1 = vpack.c.bf16 %v3447_v42, %v3446_v35  ;;  %v3448_v57 = vadd.f32 %v7110_v7, %v3425_v23 }
 0xfbf   : > { %5142 = vrsqrt.f32 %v3377_v56  ;;  %v3363_v41 = vmul.f32 0.03125, %v3339_v27  ;;  %v3362_v51 = vmul.f32 0.03125, %v3336_v19 }
 0xfc0   : > { %v3426_v15 = vmul.f32 %v7102_v30, %v3403_v18  ;;  %5144 = vrsqrt.f32 %v3376_v24  ;;  %4586 = vmatprep.mubr.msk.bf16.mxu0 %vm7504_vm13, %v3462_v1  ;;  %vm7519_vm13 = vmmov %vm7479_vm0 }
 0xfc1   : > { %v5135_v11 = vpop.eup %5134  ;;  %v3379_v59 = vadd.f32 1e-05, %v3363_v41  ;;  %v3378_v3 = vadd.f32 1e-05, %v3362_v51 }
 0xfc2   : > { %v5137_v36 = vpop.eup %5136  ;;  %v3405_v45 = vmul.f32 %v5135_v11, %v7019_v46  ;;  %v3449_v32 = vadd.f32 %v7110_v7, %v3426_v15 }
 0xfc3   : > { %v3404_v34 = vmul.f32 %v5137_v36, %v7024_v50  ;;  %5146 = vrsqrt.f32 %v3379_v59 }
 0xfc4   : > { %5148 = vrsqrt.f32 %v3378_v3  ;;  %v3463_v10 = vpack.c.bf16 %v3449_v32, %v3448_v57  ;;  %v3428_v13 = vmul.f32 %v7102_v30, %v3405_v45 }
 0xfc5   : > { %v5139_v0 = vpop.eup %5138  ;;  %v3427_v47 = vmul.f32 %v7102_v30, %v3404_v34 }
 0xfc6   : > { %v5141_v52 = vpop.eup %5140  ;;  %v3407_v28 = vmul.f32 %v5139_v0, %v7030_v54  ;;  %4587 = vmatmul.mubr.msk.bf16.vlgmr.msra.gmra.mrb[84].mxu0 %vm7505_vm14, %v3463_v10  ;;  %v3451_v46 = vadd.f32 %v7110_v7, %v3428_v13  ;;  %vm7520_vm14 = vmmov %vm7479_vm0 }
 0xfc7   : > { %v3406_v8 = vmul.f32 %v5141_v52, %v7036_v14  ;;  %v3450_v62 = vadd.f32 %v7110_v7, %v3427_v47 }
 0xfc8   : > { %v3430_v50 = vmul.f32 %v7102_v30, %v3407_v28 }
 0xfc9   : > { %v5143_v53 = vpop.eup %5142  ;;  %v3464_v12 = vpack.c.bf16 %v3451_v46, %v3450_v62  ;;  %v3429_v6 = vmul.f32 %v7102_v30, %v3406_v8 }
 0xfca   : > { %v5145_v20 = vpop.eup %5144  ;;  %v3409_v22 = vmul.f32 %v5143_v53, %v7042_v48  ;;  %v3453_v35 = vadd.f32 %v7110_v7, %v3430_v50 }
 0xfcb   : > { %v3408_v54 = vmul.f32 %v5145_v20, %v7048_v26  ;;  %4590 = vmatprep.mubr.msk.bf16.mxu0 %vm7506_vm15, %v3464_v12  ;;  %v3452_v42 = vadd.f32 %v7110_v7, %v3429_v6  ;;  %vm7521_vm15 = vmmov %vm7479_vm0 }
 0xfcc   : > { %v3432_v14 = vmul.f32 %v7102_v30, %v3409_v22 }
 0xfcd   : > { %v5147_v63 = vpop.eup %5146  ;;  %v3465_v56 = vpack.c.bf16 %v3453_v35, %v3452_v42  ;;  %v3431_v24 = vmul.f32 %v7102_v30, %v3408_v54 }
 0xfce   : > { %v5149_v23 = vpop.eup %5148  ;;  %v3411_v18 = vmul.f32 %v5147_v63, %v7054_v37  ;;  %v3455_v27 = vadd.f32 %v7110_v7, %v3432_v14  ;;  %v4831_v14 = vld [vmem:[%s7330_s11 + $0x8] sm:$0xff]   ;;  %v4834_v63 = vld [vmem:[%s7330_s11 + $0x20] sm:$0xff]  }
 0xfcf   : > { %v3410_v48 = vmul.f32 %v5149_v23, %v7059_v9  ;;  %4591 = vmatmul.mubr.msk.bf16.gmra.mrb[88].mxu0 %vm7507_vm12, %v3465_v56  ;;  %v3454_v26 = vadd.f32 %v7110_v7, %v3431_v24  ;;  %v4835_v56 = vld [vmem:[%s7330_s11 + $0x28] sm:$0xff]   ;;  %v4836_v24 = vld [vmem:[%s7330_s11 + $0x30] sm:$0xff]   ;;  %v4837_v23 = vld [vmem:[%s7330_s11 + $0x38] sm:$0xff]  }
 0xfd0   : > { %v3434_v19 = vmul.f32 %v7102_v30, %v3411_v18  ;;  %v7192_v18 = vld [vmem:[%s7329_s10] ss:$0 sm:$0xff]  ;;  %vm7522_vm12 = vmmov %vm7479_vm0 }
 0xfd1   : > { %v3466_v1 = vpack.c.bf16 %v3455_v27, %v3454_v26  ;;  %v3433_v41 = vmul.f32 %v7102_v30, %v3410_v48 }
 0xfd2   : > { %v3457_v51 = vadd.f32 %v7110_v7, %v3434_v19 }
 0xfd3   : > { %4594 = vmatprep.mubr.msk.bf16.mxu0 %vm7508_vm4, %v3466_v1  ;;  %v3456_v15 = vadd.f32 %v7110_v7, %v3433_v41  ;;  %vm7523_vm4 = vmmov %vm7479_vm0 }
 0xfd5   : > { %v3467_v37 = vpack.c.bf16 %v3457_v51, %v3456_v15 }
 0xfd7   : > { %4595 = vmatmul.mubr.msk.bf16.gmra.mrb[92].mxu0 %vm7509_vm5, %v3467_v37  ;;  %vm7524_vm5 = vmmov %vm7479_vm0 }
 0xfe1   : > { %v3342_v11 = vpop.xlane.xlu0 %3341 }
 0xfe2   : > { %v3364_v9 = vmul.f32 0.03125, %v3342_v11 }
 0xfe3   : > { %v3345_v59 = vpop.xlane.xlu1 %3344 }
 0xfe4   : > { %v3380_v3 = vadd.f32 1e-05, %v3364_v9  ;;  %v3365_v36 = vmul.f32 0.03125, %v3345_v59 }
 0xfe5   : > { %v3348_v45 = vpop.xlane.xlu0 %3347 }
 0xfe6   : > { %5150 = vrsqrt.f32 %v3380_v3  ;;  %v3381_v57 = vadd.f32 1e-05, %v3365_v36  ;;  %v3366_v32 = vmul.f32 0.03125, %v3348_v45 }
 0xfe7   : > { %v3351_v34 = vpop.xlane.xlu1 %3350 }
 0xfe8   : > { %5152 = vrsqrt.f32 %v3381_v57  ;;  %v3382_v10 = vadd.f32 1e-05, %v3366_v32  ;;  %v3367_v13 = vmul.f32 0.03125, %v3351_v34 }
 0xfea   : > { %5154 = vrsqrt.f32 %v3382_v10  ;;  %v3383_v0 = vadd.f32 1e-05, %v3367_v13 }
 0xfec   : > { %5156 = vrsqrt.f32 %v3383_v0 }
 0xff0   : > { %v5151_v47 = vpop.eup %5150 }
 0xff1   : > { %v3412_v52 = vmul.f32 %v5151_v47, %v7076_v5 }
 0xff2   : > { %v5153_v28 = vpop.eup %5152 }
 0xff3   : > { %v3413_v46 = vmul.f32 %v5153_v28, %v7079_v40  ;;  %v3435_v8 = vmul.f32 %v7102_v30, %v3412_v52 }
 0xff4   : > { %v5155_v62 = vpop.eup %5154 }
 0xff5   : > { %v3414_v50 = vmul.f32 %v5155_v62, %v7084_v61  ;;  %v3436_v53 = vmul.f32 %v7102_v30, %v3413_v46  ;;  %v3458_v20 = vadd.f32 %v7110_v7, %v3435_v8 }
 0xff6   : > { %v5157_v12 = vpop.eup %5156 }
 0xff7   : > { %v3415_v6 = vmul.f32 %v5157_v12, %v7090_v58  ;;  %v3459_v22 = vadd.f32 %v7110_v7, %v3436_v53  ;;  %v3437_v35 = vmul.f32 %v7102_v30, %v3414_v50  ;;  %v4830_v58 = vld [vmem:[%s7330_s11] sm:$0xff]  }
 0xff8   : > { %4602 = vmatprep.subr.bf16.mxu1 %v4830_v58 }
 0xff9   : > { %v3468_v5 = vpack.c.bf16 %v3459_v22, %v3458_v20  ;;  %v3438_v54 = vmul.f32 %v7102_v30, %v3415_v6  ;;  %v3460_v40 = vadd.f32 %v7110_v7, %v3437_v35  ;;  %4603 = vmatpush3.bf16.msra.mxu1 %v4830_v58  ;;  %v4832_v30 = vld [vmem:[%s7330_s11 + $0x10] sm:$0xff]  }
 0xffa   : > { %4604 = vmatprep.subr.bf16.mxu1 %v4831_v14 }
 0xffb   : > { %4598 = vmatprep.mubr.msk.bf16.mxu0 %vm7479_vm0, %v3468_v5  ;;  %v3461_v61 = vadd.f32 %v7110_v7, %v3438_v54  ;;  %v4833_v7 = vld [vmem:[%s7330_s11 + $0x18] sm:$0xff]  }
 0xffd   : > { %v3469_v42 = vpack.c.bf16 %v3461_v61, %v3460_v40  ;;  %4605 = vmatpush3.bf16.msra.mxu1 %v4831_v14 }
 0xffe   : > { %4606 = vmatprep.subr.bf16.mxu1 %v4832_v30 }
 0xfff   : > { %4599 = vmatmul.mubr.msk.bf16.gmra.mrb[96].mxu0 %vm7510_vm2, %v3469_v42  ;;  %vm7525_vm2 = vmmov %vm7479_vm0 }
0x1001   : > { %4607 = vmatpush3.bf16.msra.mxu1 %v4832_v30 }
0x1002   : > { %4608 = vmatprep.subr.bf16.mxu1 %v4833_v7 }
0x1005   : > { %4609 = vmatpush3.bf16.msra.mxu1 %v4833_v7 }
0x1006   : > { %4610 = vmatprep.subr.bf16.mxu1 %v4834_v63 }
0x1009   : > { %4611 = vmatpush3.bf16.msra.mxu1 %v4834_v63 }
0x100a   : > { %4612 = vmatprep.subr.bf16.mxu1 %v4835_v56 }
0x100d   : > { %4613 = vmatpush3.bf16.msra.mxu1 %v4835_v56 }
0x100e   : > { %4614 = vmatprep.subr.bf16.mxu1 %v4836_v24 }
0x1011   : > { %4615 = vmatpush3.bf16.msra.mxu1 %v4836_v24 }
0x1012   : > { %4616 = vmatprep.subr.bf16.mxu1 %v4837_v23 }
0x1015   : > { %4617 = vmatpush3.bf16.msra.mxu1 %v4837_v23 }
0x1099   : > { %v4588_v27 = vpop.f32.mrb[84].mxu0 }
0x109a   : > { %v7195_v48 = vadd.f32 %v4588_v27, %v7192_v18  ;;  %v3551_v26 = vpop.f32.mrb[85].mxu0 }
0x109b   : > { %v7198_v19 = vadd.f32 %v7192_v18, %v3551_v26  ;;  %v4589_v1 = vpop.f32.mrb[86].mxu0 }
0x109c   : > { %v4085_v41 = vmul.f32 -1.702, %v7195_v48  ;;  %v7202_v51 = vadd.f32 %v4589_v1, %v7192_v18  ;;  %v3554_v15 = vpop.f32.mrb[87].mxu0 }
0x109d   : > { %v4083_v37 = vmul.f32 -1.702, %v7198_v19  ;;  %v7206_v11 = vadd.f32 %v7192_v18, %v3554_v15 }
0x109e   : > { %v3650_v9 = vmul.f32 1.442695, %v4085_v41  ;;  %v4086_v59 = vmul.f32 -1.702, %v7202_v51 }
0x109f   : > { %v3646_v3 = vmul.f32 1.442695, %v4083_v37  ;;  %v4084_v36 = vmul.f32 -1.702, %v7206_v11 }
0x10a0   : > { %5158 = vpow2.f32 %v3650_v9  ;;  %v3652_v45 = vmul.f32 1.442695, %v4086_v59 }
0x10a1   : > { %5160 = vpow2.f32 %v3646_v3  ;;  %v3648_v57 = vmul.f32 1.442695, %v4084_v36 }
0x10a2   : > { %5162 = vpow2.f32 %v3652_v45  ;;  %v4592_v32 = vpop.f32.mrb[88].mxu0 }
0x10a3   : > { %5164 = vpow2.f32 %v3648_v57  ;;  %v7211_v34 = vadd.f32 %v4592_v32, %v7192_v18  ;;  %v3567_v10 = vpop.f32.mrb[89].mxu0 }
0x10a4   : > { %v7214_v13 = vadd.f32 %v7192_v18, %v3567_v10  ;;  %v4593_v0 = vpop.f32.mrb[90].mxu0 }
0x10a5   : > { %v4089_v47 = vmul.f32 -1.702, %v7211_v34  ;;  %v7218_v52 = vadd.f32 %v4593_v0, %v7192_v18  ;;  %v3570_v28 = vpop.f32.mrb[91].mxu0 }
0x10a6   : > { %v4087_v46 = vmul.f32 -1.702, %v7214_v13  ;;  %v7222_v8 = vadd.f32 %v7192_v18, %v3570_v28 }
0x10a7   : > { %v3658_v62 = vmul.f32 1.442695, %v4089_v47  ;;  %v4090_v50 = vmul.f32 -1.702, %v7218_v52 }
0x10a8   : > { %v3654_v53 = vmul.f32 1.442695, %v4087_v46  ;;  %v4088_v12 = vmul.f32 -1.702, %v7222_v8 }
0x10a9   : > { %5166 = vpow2.f32 %v3658_v62  ;;  %v3660_v6 = vmul.f32 1.442695, %v4090_v50 }
0x10aa   : > { %v5159_v20 = vpop.eup %5158  ;;  %5168 = vpow2.f32 %v3654_v53  ;;  %v3656_v22 = vmul.f32 1.442695, %v4088_v12  ;;  %v4596_v35 = vpop.f32.mrb[92].mxu0 }
0x10ab   : > { %v5161_v5 = vpop.eup %5160  ;;  %v3680_v54 = vadd.f32 1.0, %v5159_v20  ;;  %5170 = vpow2.f32 %v3660_v6  ;;  %v7227_v40 = vadd.f32 %v4596_v35, %v7192_v18  ;;  %v3583_v61 = vpop.f32.mrb[93].mxu0 }
0x10ac   : > { %v5163_v42 = vpop.eup %5162  ;;  %v3678_v58 = vadd.f32 1.0, %v5161_v5  ;;  %5172 = vpow2.f32 %v3656_v22  ;;  %v7230_v14 = vadd.f32 %v7192_v18, %v3583_v61  ;;  %v4597_v30 = vpop.f32.mrb[94].mxu0 }
0x10ad   : > { %v5165_v7 = vpop.eup %5164  ;;  %5174 = vrcp.f32 %v3680_v54  ;;  %v3681_v63 = vadd.f32 1.0, %v5163_v42  ;;  %v4093_v56 = vmul.f32 -1.702, %v7227_v40  ;;  %v7234_v24 = vadd.f32 %v4597_v30, %v7192_v18  ;;  %v3586_v23 = vpop.f32.mrb[95].mxu0 }
0x10ae   : > { %5176 = vrcp.f32 %v3678_v58  ;;  %v3679_v27 = vadd.f32 1.0, %v5165_v7  ;;  %v4091_v26 = vmul.f32 -1.702, %v7230_v14  ;;  %v7238_v1 = vadd.f32 %v7192_v18, %v3586_v23 }
0x10af   : > { %5178 = vrcp.f32 %v3681_v63  ;;  %v3666_v41 = vmul.f32 1.442695, %v4093_v56  ;;  %v4094_v15 = vmul.f32 -1.702, %v7234_v24 }
0x10b0   : > { %5180 = vrcp.f32 %v3679_v27  ;;  %v3662_v37 = vmul.f32 1.442695, %v4091_v26  ;;  %v4092_v9 = vmul.f32 -1.702, %v7238_v1 }
0x10b1   : > { %5182 = vpow2.f32 %v3666_v41  ;;  %v3668_v59 = vmul.f32 1.442695, %v4094_v15 }
0x10b2   : > { %5184 = vpow2.f32 %v3662_v37  ;;  %v3664_v3 = vmul.f32 1.442695, %v4092_v9 }
0x10b3   : > { %v5167_v36 = vpop.eup %5166  ;;  %5186 = vpow2.f32 %v3668_v59 }
0x10b4   : > { %v5169_v45 = vpop.eup %5168  ;;  %v3684_v57 = vadd.f32 1.0, %v5167_v36  ;;  %5188 = vpow2.f32 %v3664_v3 }
0x10b5   : > { %v5171_v32 = vpop.eup %5170  ;;  %v3682_v10 = vadd.f32 1.0, %v5169_v45 }
0x10b6   : > { %v5173_v0 = vpop.eup %5172  ;;  %5190 = vrcp.f32 %v3684_v57  ;;  %v3685_v47 = vadd.f32 1.0, %v5171_v32 }
0x10b7   : > { %v5175_v28 = vpop.eup %5174  ;;  %5192 = vrcp.f32 %v3682_v10  ;;  %v3683_v46 = vadd.f32 1.0, %v5173_v0 }
0x10b8   : > { %v5177_v62 = vpop.eup %5176  ;;  %5194 = vrcp.f32 %v3685_v47  ;;  %v3728_v12 = vmul.f32 %v5175_v28, %v7195_v48 }
0x10b9   : > { %v5179_v50 = vpop.eup %5178  ;;  %5196 = vrcp.f32 %v3683_v46  ;;  %v3726_v22 = vmul.f32 %v5177_v62, %v7198_v19 }
0x10ba   : > { %v5181_v53 = vpop.eup %5180  ;;  %v3729_v6 = vmul.f32 %v5179_v50, %v7202_v51 }
0x10bb   : > { %v5183_v20 = vpop.eup %5182  ;;  %v3727_v35 = vmul.f32 %v5181_v53, %v7206_v11 }
0x10bc   : > { %v5185_v5 = vpop.eup %5184  ;;  %v3743_v54 = vpack.c.bf16 %v3729_v6, %v3728_v12  ;;  %v3688_v61 = vadd.f32 1.0, %v5183_v20 }
0x10bd   : > { %v5187_v42 = vpop.eup %5186  ;;  %v3686_v58 = vadd.f32 1.0, %v5185_v5  ;;  %v3742_v30 = vpack.c.bf16 %v3727_v35, %v3726_v22 }
0x10be   : > { %v5189_v7 = vpop.eup %5188  ;;  %5198 = vrcp.f32 %v3688_v61  ;;  %v3689_v63 = vadd.f32 1.0, %v5187_v42 }
0x10bf   : > { %5200 = vrcp.f32 %v3686_v58  ;;  %v3687_v56 = vadd.f32 1.0, %v5189_v7  ;;  %4618 = vmatprep.mubr.bf16.mxu1 %v3742_v30 }
0x10c0   : > { %v5191_v48 = vpop.eup %5190  ;;  %5202 = vrcp.f32 %v3689_v63  ;;  %4619 = vmatmul.mubr.bf16.vlgmr.msra.gmra.mrb[76].mxu1 %v3743_v54 }
0x10c1   : > { %v5193_v51 = vpop.eup %5192  ;;  %5204 = vrcp.f32 %v3687_v56  ;;  %v3732_v11 = vmul.f32 %v5191_v48, %v7211_v34 }
0x10c2   : > { %v5195_v19 = vpop.eup %5194  ;;  %v3730_v26 = vmul.f32 %v5193_v51, %v7214_v13 }
0x10c3   : > { %v5197_v23 = vpop.eup %5196  ;;  %v3733_v27 = vmul.f32 %v5195_v19, %v7218_v52 }
0x10c4   : > { %v3731_v41 = vmul.f32 %v5197_v23, %v7222_v8 }
0x10c5   : > { %v3745_v15 = vpack.c.bf16 %v3733_v27, %v3732_v11 }
0x10c6   : > { %v3744_v37 = vpack.c.bf16 %v3731_v41, %v3730_v26  ;;  %v4099_v26 = vld [vmem:[%s7331_s12] ss:$0 sm:$0xff] }
0x10c8   : > { %v5199_v9 = vpop.eup %5198  ;;  %4622 = vmatprep.mubr.bf16.mxu1 %v3744_v37 }
0x10c9   : > { %v5201_v59 = vpop.eup %5200  ;;  %4623 = vmatmul.mubr.bf16.gmra.mrb[80].mxu1 %v3745_v15  ;;  %v3736_v45 = vmul.f32 %v5199_v9, %v7227_v40 }
0x10ca   : > { %v5203_v3 = vpop.eup %5202  ;;  %v3734_v34 = vmul.f32 %v5201_v59, %v7230_v14 }
0x10cb   : > { %v5205_v36 = vpop.eup %5204  ;;  %v3737_v57 = vmul.f32 %v5203_v3, %v7234_v24 }
0x10cc   : > { %v3735_v52 = vmul.f32 %v5205_v36, %v7238_v1 }
0x10cd   : > { %v3747_v32 = vpack.c.bf16 %v3737_v57, %v3736_v45 }
0x10ce   : > { %v3746_v13 = vpack.c.bf16 %v3735_v52, %v3734_v34 }
0x10d0   : > { %4626 = vmatprep.mubr.bf16.mxu1 %v3746_v13 }
0x10d1   : > { %4627 = vmatmul.mubr.bf16.gmra.mrb[84].mxu1 %v3747_v32 }
0x10d2   : > { %v4600_v8 = vpop.f32.mrb[96].mxu0 }
0x10d3   : > { %v3608_v10 = vadd.f32 %v4600_v8, %v7192_v18  ;;  %v3599_v0 = vpop.f32.mrb[97].mxu0 }
0x10d4   : > { %v3600_v47 = vadd.f32 %v7192_v18, %v3599_v0  ;;  %v4601_v28 = vpop.f32.mrb[98].mxu0 }
0x10d5   : > { %v4097_v46 = vmul.f32 -1.702, %v3608_v10  ;;  %v3611_v40 = vadd.f32 %v4601_v28, %v7192_v18  ;;  %v3602_v62 = vpop.f32.mrb[99].mxu0 }
0x10d6   : > { %v4095_v24 = vmul.f32 -1.702, %v3600_v47  ;;  %v3603_v14 = vadd.f32 %v7192_v18, %v3602_v62 }
0x10d7   : > { %v3674_v50 = vmul.f32 1.442695, %v4097_v46  ;;  %v4098_v1 = vmul.f32 -1.702, %v3611_v40 }
0x10d8   : > { %v3670_v53 = vmul.f32 1.442695, %v4095_v24  ;;  %v4096_v12 = vmul.f32 -1.702, %v3603_v14 }
0x10d9   : > { %5206 = vpow2.f32 %v3674_v50  ;;  %v3676_v6 = vmul.f32 1.442695, %v4098_v1 }
0x10da   : > { %5208 = vpow2.f32 %v3670_v53  ;;  %v3672_v20 = vmul.f32 1.442695, %v4096_v12 }
0x10db   : > { %5210 = vpow2.f32 %v3676_v6 }
0x10dc   : > { %5212 = vpow2.f32 %v3672_v20 }
0x10e3   : > { %v5207_v22 = vpop.eup %5206 }
0x10e4   : > { %v5209_v35 = vpop.eup %5208  ;;  %v3692_v5 = vadd.f32 1.0, %v5207_v22 }
0x10e5   : > { %v5211_v54 = vpop.eup %5210  ;;  %v3690_v61 = vadd.f32 1.0, %v5209_v35 }
0x10e6   : > { %v5213_v42 = vpop.eup %5212  ;;  %5214 = vrcp.f32 %v3692_v5  ;;  %v3693_v58 = vadd.f32 1.0, %v5211_v54 }
0x10e7   : > { %5216 = vrcp.f32 %v3690_v61  ;;  %v3691_v18 = vadd.f32 1.0, %v5213_v42 }
0x10e8   : > { %5218 = vrcp.f32 %v3693_v58 }
0x10e9   : > { %5220 = vrcp.f32 %v3691_v18 }
0x10f0   : > { %v5215_v30 = vpop.eup %5214 }
0x10f1   : > { %v5217_v7 = vpop.eup %5216  ;;  %v3740_v48 = vmul.f32 %v5215_v30, %v3608_v10 }
0x10f2   : > { %v5219_v63 = vpop.eup %5218  ;;  %v3738_v19 = vmul.f32 %v5217_v7, %v3600_v47 }
0x10f3   : > { %v5221_v56 = vpop.eup %5220  ;;  %v3741_v51 = vmul.f32 %v5219_v63, %v3611_v40 }
0x10f4   : > { %v3739_v23 = vmul.f32 %v5221_v56, %v3603_v14 }
0x10f5   : > { %v3749_v11 = vpack.c.bf16 %v3741_v51, %v3740_v48 }
0x10f6   : > { %v3748_v27 = vpack.c.bf16 %v3739_v23, %v3738_v19 }
0x10f8   : > { %4630 = vmatprep.mubr.bf16.mxu1 %v3748_v27 }
0x10f9   : > { %4631 = vmatmul.mubr.bf16.gmra.mrb[88].mxu1 %v3749_v11 }
0x1193   : > { %v4620_v41 = vpop.f32.mrb[76].mxu1 }
0x1194   : > { %v3864_v15 = vadd.f32 %v4620_v41, %v4099_v26  ;;  %v3855_v37 = vpop.f32.mrb[77].mxu1 }
0x1195   : > { %v3856_v9 = vadd.f32 %v4099_v26, %v3855_v37  ;;  %v4621_v59 = vpop.f32.mrb[78].mxu1 }
0x1196   : > { %v3920_v3 = vadd.f32 %v3864_v15, %v6908_v43  ;;  %v3867_v36 = vadd.f32 %v4621_v59, %v4099_v26  ;;  %v3858_v45 = vpop.f32.mrb[79].mxu1 }
0x1197   : > { %v3918_v57 = vadd.f32 %v3856_v9, %v6904_v17  ;;  %v3859_v34 = vadd.f32 %v4099_v26, %v3858_v45 }
0x1198   : > { %3936 = vst.msk [vmem:[%s7266_s19 + $0x10] sm:$0xff] %vm7511_vm3, %v3920_v3  ;;  %v3921_v52 = vadd.f32 %v3867_v36, %v6919_v55 }
0x1199   : > { %3934 = vst.msk [vmem:[%s7266_s19] sm:$0xff] %vm7512_vm6, %v3918_v57  ;;  %v3919_v32 = vadd.f32 %v3859_v34, %v6912_v38 }
0x119a   : > { %3937 = vst.msk [vmem:[%s7266_s19 + $0x18] sm:$0xff] %vm7513_vm7, %v3921_v52 }
0x119b   : > { %3935 = vst.msk [vmem:[%s7266_s19 + $0x8] sm:$0xff] %vm7514_vm8, %v3919_v32 }
0x119c   : > { %v4624_v43 = vpop.f32.mrb[80].mxu1 }
0x119d   : > { %v3880_v13 = vadd.f32 %v4624_v43, %v4099_v26  ;;  %v3871_v17 = vpop.f32.mrb[81].mxu1 }
0x119e   : > { %v3872_v8 = vadd.f32 %v4099_v26, %v3871_v17  ;;  %v4625_v10 = vpop.f32.mrb[82].mxu1 }
0x119f   : > { %v3924_v0 = vadd.f32 %v3880_v13, %v6941_v29  ;;  %v3883_v47 = vadd.f32 %v4625_v10, %v4099_v26  ;;  %v3874_v55 = vpop.f32.mrb[83].mxu1 }
0x11a0   : > { %v3922_v28 = vadd.f32 %v3872_v8, %v6928_v2  ;;  %v3875_v46 = vadd.f32 %v4099_v26, %v3874_v55 }
0x11a1   : > { %3940 = vst.msk [vmem:[%s7266_s19 + $0x30] sm:$0xff] %vm7515_vm9, %v3924_v0  ;;  %v3925_v38 = vadd.f32 %v3883_v47, %v6936_v21 }
0x11a2   : > { %3938 = vst.msk [vmem:[%s7266_s19 + $0x20] sm:$0xff] %vm7516_vm10, %v3922_v28  ;;  %v3923_v40 = vadd.f32 %v3875_v46, %v6931_v31 }
0x11a3   : > { %3941 = vst.msk [vmem:[%s7266_s19 + $0x38] sm:$0xff] %vm7517_vm1, %v3925_v38 }
0x11a4   : > { %3939 = vst.msk [vmem:[%s7266_s19 + $0x28] sm:$0xff] %vm7518_vm11, %v3923_v40  ;;  %v4628_v29 = vpop.f32.mrb[84].mxu1 }
0x11a5   : > { %v3896_v62 = vadd.f32 %v4628_v29, %v4099_v26  ;;  %v3887_v2 = vpop.f32.mrb[85].mxu1 }
0x11a6   : > { %v3888_v24 = vadd.f32 %v4099_v26, %v3887_v2  ;;  %v4629_v14 = vpop.f32.mrb[86].mxu1 }
0x11a7   : > { %v3928_v50 = vadd.f32 %v3896_v62, %v6965_v60  ;;  %v3899_v1 = vadd.f32 %v4629_v14, %v4099_v26  ;;  %v3890_v21 = vpop.f32.mrb[87].mxu1 }
0x11a8   : > { %v3926_v53 = vadd.f32 %v3888_v24, %v6952_v25  ;;  %v3891_v12 = vadd.f32 %v4099_v26, %v3890_v21 }
0x11a9   : > { %3944 = vst.msk [vmem:[%s7266_s19 + $0x50] sm:$0xff] %vm7519_vm13, %v3928_v50  ;;  %v3929_v31 = vadd.f32 %v3899_v1, %v6960_v16 }
0x11aa   : > { %3942 = vst.msk [vmem:[%s7266_s19 + $0x40] sm:$0xff] %vm7520_vm14, %v3926_v53  ;;  %v3927_v6 = vadd.f32 %v3891_v12, %v6955_v44 }
0x11ab   : > { %3945 = vst.msk [vmem:[%s7266_s19 + $0x58] sm:$0xff] %vm7521_vm15, %v3929_v31 }
0x11ac   : > { %3943 = vst.msk [vmem:[%s7266_s19 + $0x48] sm:$0xff] %vm7522_vm12, %v3927_v6 }
0x11cc   : > { %v4632_v60 = vpop.f32.mrb[88].mxu1 }
0x11cd   : > { %v3912_v20 = vadd.f32 %v4632_v60, %v4099_v26  ;;  %v3903_v25 = vpop.f32.mrb[89].mxu1 }
0x11ce   : > { %v3904_v22 = vadd.f32 %v4099_v26, %v3903_v25  ;;  %v4633_v35 = vpop.f32.mrb[90].mxu1 }
0x11cf   : > { %v3932_v5 = vadd.f32 %v3912_v20, %v6981_v39  ;;  %v3915_v54 = vadd.f32 %v4633_v35, %v4099_v26  ;;  %v3906_v16 = vpop.f32.mrb[91].mxu1 }
0x11d0   : > { %v3930_v61 = vadd.f32 %v3904_v22, %v6977_v4  ;;  %v3907_v42 = vadd.f32 %v4099_v26, %v3906_v16 }
0x11d1   : > { %3948 = vst.msk [vmem:[%s7266_s19 + $0x70] sm:$0xff] %vm7523_vm4, %v3932_v5  ;;  %v3933_v44 = vadd.f32 %v3915_v54, %v6989_v49 }
0x11d2   : > { %3946 = vst.msk [vmem:[%s7266_s19 + $0x60] sm:$0xff] %vm7524_vm5, %v3930_v61  ;;  %v3931_v58 = vadd.f32 %v3907_v42, %v6984_v33 }
0x11d3   : > { %3949 = vst.msk [vmem:[%s7266_s19 + $0x78] sm:$0xff] %vm7479_vm0, %v3933_v44 }
0x11d4   : > { %3947 = vst.msk [vmem:[%s7266_s19 + $0x68] sm:$0xff] %vm7525_vm2, %v3931_v58 }
0x11d5 PF: > { %s23_s25 = sadd.s32 1, %s5244_s25  }
0x11d6   : > { %p20_p4 = scmp.ge.s32.totalorder %s23_s25, 4  }
0x11d8   :  { %22 = sbr.rel (!%p20_p4) target bundleno = 1 (0x1), region = 102 }

</bundles_post_ra>
